<compile_context>
chip_gen: v5e
topology: v5e:2x2
jax: 0.10.0
libtpu: 0.0.40
codegen_flags: <defaults>
</compile_context>

<pallas_src>
import functools

import jax
import jax.numpy as jnp
from jax.experimental import pallas as pl
from jax.experimental.pallas import tpu as pltpu


def critic_kernel(xa_ref,
                  w1_ref, b1_ref,
                  w2o_ref, w2a_ref, b2_ref,
                  w3_ref, b3_ref,
                  w4_ref, b4_ref,
                  out_ref, *, obs_dim):
    xa = xa_ref[...]                               # (TILE_B, obs_dim+act_dim) f32
    x = xa[:, :obs_dim].astype(jnp.bfloat16)       # obs part, bf16 MXU input
    a = xa[:, obs_dim:]                            # acts part, stays f32

    # fc1 + relu (bf16 MXU inputs, f32 accumulation).  K = obs_dim is tiny but
    # stays on the MXU: moving it to VPU FMAs would make the VPU the binding
    # unit while the MXU still has slack from fc2/fc3.
    h1 = jnp.dot(x, w1_ref[...], preferred_element_type=jnp.float32) + b1_ref[...]
    h1 = jnp.maximum(h1, 0.0).astype(jnp.bfloat16)   # keep only bf16 copy live

    # fc2 over concat([h1, acts], 1) + relu, concat folded into a split matmul.
    h2 = jnp.dot(h1, w2o_ref[...], preferred_element_type=jnp.float32) + b2_ref[...]
    # acts branch: K = act_dim is tiny -> statically unrolled VPU broadcast-FMAs
    # instead of a mostly-empty MXU contraction.
    w2a = w2a_ref[...]                              # (act_dim, 1024) f32
    for k in range(w2a.shape[0]):
        h2 = h2 + a[:, k:k + 1] * w2a[k:k + 1, :]
    h2 = jnp.maximum(h2, 0.0).astype(jnp.bfloat16)  # keep only bf16 copy live

    # fc3 + relu (kept f32: small (tile_b, 384) tile, feeds the f32 fc4 reduce).
    h3 = jnp.dot(h2, w3_ref[...], preferred_element_type=jnp.float32) + b3_ref[...]
    h3 = jnp.maximum(h3, 0.0)

    # fc4 (out_features = 1): VPU multiply + XLU row reduce instead of a
    # degenerate 1/128-lane MXU matmul.
    out_ref[...] = (jnp.sum(h3 * w4_ref[...], axis=-1, keepdims=True)
                    + b4_ref[...])


def _pick_tile_b(B, max_tile=512):
    """Adaptive batch tile: multiple of 8 (or == B) so blocks are (8,128)-legal,
    no host-side padding when a divisor exists, capped at max_tile, and split
    into >= 2 grid steps when possible so v7x's 2nd TensorCore gets work."""
    if B <= 8:
        return B                                   # tiny acting batch: 1 full block
    best = 0
    t = 8
    cap = min(B, max_tile)
    while t <= cap:
        if B % t == 0:
            best = t
        t += 8
    if best == 0:
        # no multiple-of-8 divisor: single full-batch block if it fits, else pad.
        return B if B <= max_tile else max_tile
    if best == B and (B // 2) % 8 == 0:
        best = B // 2                              # >= 2 grid steps (megacore)
    return best


def critic_forward(x, acts, params, *, tile_b=None, max_tile=512):
    """x: [B, obs_dim] f32, acts: [B, act_dim] f32  ->  [B, 1] f32."""
    B, obs_dim = x.shape
    act_dim = acts.shape[1]
    if tile_b is None:
        tile_b = _pick_tile_b(B, max_tile)

    # Fuse obs + acts into one input -> one input DMA per grid step.
    xa = jnp.concatenate([x, acts], axis=1)        # (B, obs_dim + act_dim)

    b_pad = pl.cdiv(B, tile_b) * tile_b
    if b_pad != B:                                 # only pad when unavoidable
        xa = jnp.pad(xa, ((0, b_pad - B), (0, 0)))

    (w1, b1, w2o, w2a, b2, w3, b3, w4row, b4) = params

    # Weights/biases: constant block index -> DMA'd once, VMEM-resident across
    # the batch grid.  xa / out: tiled along the batch axis.
    def resident(arr):
        return pl.BlockSpec(arr.shape, lambda i: (0, 0))

    kernel = functools.partial(critic_kernel, obs_dim=obs_dim)

    out = pl.pallas_call(
        kernel,
        out_shape=jax.ShapeDtypeStruct((b_pad, 1), jnp.float32),
        grid=(b_pad // tile_b,),
        in_specs=[
            pl.BlockSpec((tile_b, obs_dim + act_dim), lambda i: (i, 0)),
            resident(w1), resident(b1),
            resident(w2o), resident(w2a), resident(b2),
            resident(w3), resident(b3),
            resident(w4row), resident(b4),
        ],
        out_specs=pl.BlockSpec((tile_b, 1), lambda i: (i, 0)),
        compiler_params=pltpu.CompilerParams(
            dimension_semantics=("parallel",)),
    )(xa, w1, b1, w2o, w2a, b2, w3, b3, w4row, b4)
    return out[:B]


def _round_up(n, m):
    return ((n + m - 1) // m) * m


def init_params(key, num_agents, dim_o, dim_a):
    obs_dim = dim_o * num_agents
    act_dim = dim_a * num_agents
    h1_raw = 1024 + obs_dim                 # fc1 out (torch)
    h1 = _round_up(h1_raw, 128)             # lane-dense fc1 out (1040 -> 1152)
    h3_raw = 300                            # fc3 out (torch)
    h3 = _round_up(h3_raw, 128)             # lane-dense fc3 out (300 -> 384)

    def lin(k, fan_in, fan_out):
        kw, kb = jax.random.split(k)
        bound = 1.0 / jnp.sqrt(fan_in)
        w = jax.random.uniform(kw, (fan_in, fan_out), jnp.float32, -bound, bound)
        b = jax.random.uniform(kb, (1, fan_out), jnp.float32, -bound, bound)
        return w, b

    k1, k2, k3, k4 = jax.random.split(key, 4)
    w1, b1 = lin(k1, obs_dim, h1_raw)
    w2, b2 = lin(k2, h1_raw + act_dim, 1024)
    w3, b3 = lin(k3, 1024, h3_raw)
    w4, b4 = lin(k4, h3_raw, 1)

    # Zero-pad fc1/fc3 output dims to multiples of 128 (numerically exact).
    w1 = jnp.pad(w1, ((0, 0), (0, h1 - h1_raw)))
    b1 = jnp.pad(b1, ((0, 0), (0, h1 - h1_raw)))
    w2o = jnp.pad(w2[:h1_raw, :], ((0, h1 - h1_raw), (0, 0)))
    w2a = w2[h1_raw:, :]                              # (act_dim, 1024) stays f32
    w3 = jnp.pad(w3, ((0, 0), (0, h3 - h3_raw)))
    b3 = jnp.pad(b3, ((0, 0), (0, h3 - h3_raw)))
    w4row = jnp.pad(w4.T, ((0, 0), (0, h3 - h3_raw)))  # (1, h3) f32 VPU reduce

    # bf16 for the big matmul weights (halves weight-DMA bytes, native MXU
    # input); biases, the tiny acts-branch weight and the fc4 row stay f32.
    bf = lambda w: w.astype(jnp.bfloat16)
    return (bf(w1), b1, bf(w2o), w2a, b2, bf(w3), b3, w4row, b4)


def critic_ref(x, acts, params):
    """Pure-JAX f32 reference using the same (bf16-rounded, zero-padded) params."""
    (w1, b1, w2o, w2a, b2, w3, b3, w4row, b4) = params
    f = lambda w: w.astype(jnp.float32)
    h1 = jax.nn.relu(x @ f(w1) + b1)
    h2 = jax.nn.relu(h1 @ f(w2o) + acts @ f(w2a) + b2)
    h3 = jax.nn.relu(h2 @ f(w3) + b3)
    return jnp.sum(h3 * w4row, axis=-1, keepdims=True) + b4


if __name__ == "__main__":
    num_agents = 2
    dim_o = 8
    dim_a = 2

    obs_dim = dim_o * num_agents   # 16
    act_dim = dim_a * num_agents   # 4

    key = jax.random.PRNGKey(0)
    kp, kx, ka, kx2, ka2 = jax.random.split(key, 5)
    params = init_params(kp, num_agents, dim_o, dim_a)

    # Acting path: tiny batch -> tile_b = 8, no padding, single grid step.
    batch = 8
    x = jax.random.normal(kx, (batch, obs_dim), jnp.float32)
    acts = jax.random.normal(ka, (batch, act_dim), jnp.float32)
    out = jax.block_until_ready(critic_forward(x, acts, params))
    ref = critic_ref(x, acts, params)
    assert out.shape == (batch, 1)
    # Kernel runs bf16 MXU math with f32 accumulation; reference is f32.
    assert jnp.allclose(out, ref, atol=5e-2, rtol=5e-2)

    # Multi-tile path: B = 48 -> tile_b = 24, grid = 2 (exercises resident
    # weights across grid steps and the parallel batch axis), still no padding.
    batch2 = 48
    x2 = jax.random.normal(kx2, (batch2, obs_dim), jnp.float32)
    acts2 = jax.random.normal(ka2, (batch2, act_dim), jnp.float32)
    out2 = jax.block_until_ready(critic_forward(x2, acts2, params))
    ref2 = critic_ref(x2, acts2, params)
    assert out2.shape == (batch2, 1)
    assert jnp.allclose(out2, ref2, atol=5e-2, rtol=5e-2)

    print("KERNEL_OK")
</pallas_src>

<mosaic_0001>
module attributes {stable_mosaic.version = 11 : i64} {
  func.func @critic_kernel(%arg0: i32, %arg1: memref<8x20xf32, #tpu.memory_space<vmem>>, %arg2: memref<16x1152xbf16, #tpu.memory_space<vmem>>, %arg3: memref<1x1152xf32, #tpu.memory_space<vmem>>, %arg4: memref<1152x1024xbf16, #tpu.memory_space<vmem>>, %arg5: memref<4x1024xf32, #tpu.memory_space<vmem>>, %arg6: memref<1x1024xf32, #tpu.memory_space<vmem>>, %arg7: memref<1024x384xbf16, #tpu.memory_space<vmem>>, %arg8: memref<1x384xf32, #tpu.memory_space<vmem>>, %arg9: memref<1x384xf32, #tpu.memory_space<vmem>>, %arg10: memref<1x1xf32, #tpu.memory_space<vmem>>, %arg11: memref<8x1xf32, #tpu.memory_space<vmem>>) attributes {dimension_semantics = [#tpu.dimension_semantics<parallel>], iteration_bounds = array<i64: 1>, scalar_prefetch = 0 : i64, scratch_operands = 0 : i64, tpu.core_type = #tpu.core_type<tc>, window_params = [{transform_indices = @transform_0, window_bounds = array<i64: 8, 20>}, {pipeline_mode = #tpu.pipeline_mode<synchronous>, transform_indices = @transform_1, window_bounds = array<i64: 16, 1152>}, {pipeline_mode = #tpu.pipeline_mode<synchronous>, transform_indices = @transform_2, window_bounds = array<i64: 1, 1152>}, {pipeline_mode = #tpu.pipeline_mode<synchronous>, transform_indices = @transform_3, window_bounds = array<i64: 1152, 1024>}, {pipeline_mode = #tpu.pipeline_mode<synchronous>, transform_indices = @transform_4, window_bounds = array<i64: 4, 1024>}, {pipeline_mode = #tpu.pipeline_mode<synchronous>, transform_indices = @transform_5, window_bounds = array<i64: 1, 1024>}, {pipeline_mode = #tpu.pipeline_mode<synchronous>, transform_indices = @transform_6, window_bounds = array<i64: 1024, 384>}, {pipeline_mode = #tpu.pipeline_mode<synchronous>, transform_indices = @transform_7, window_bounds = array<i64: 1, 384>}, {pipeline_mode = #tpu.pipeline_mode<synchronous>, transform_indices = @transform_8, window_bounds = array<i64: 1, 384>}, {pipeline_mode = #tpu.pipeline_mode<synchronous>, transform_indices = @transform_9, window_bounds = array<i64: 1, 1>}, {transform_indices = @transform_10, window_bounds = array<i64: 8, 1>}]} {
    %c0 = arith.constant 0 : index
    %c0_0 = arith.constant 0 : index
    %0 = vector.load %arg1[%c0, %c0_0] : memref<8x20xf32, #tpu.memory_space<vmem>>, vector<8x20xf32>
    %1 = vector.extract_strided_slice %0 {offsets = [0, 0], sizes = [8, 16], strides = [1, 1]} : vector<8x20xf32> to vector<8x16xf32>
    %2 = arith.truncf %1 : vector<8x16xf32> to vector<8x16xbf16>
    %3 = vector.extract_strided_slice %0 {offsets = [0, 16], sizes = [8, 4], strides = [1, 1]} : vector<8x20xf32> to vector<8x4xf32>
    %c0_1 = arith.constant 0 : index
    %c0_2 = arith.constant 0 : index
    %4 = vector.load %arg2[%c0_1, %c0_2] : memref<16x1152xbf16, #tpu.memory_space<vmem>>, vector<16x1152xbf16>
    %cst = arith.constant dense<0.000000e+00> : vector<8x1152xf32>
    %5 = tpu.matmul %2, %4, %cst {dimension_numbers = #tpu.dot_dimension_numbers<[1], [0], [0], [1], [0, 0, 1, 1], [], []>} : vector<8x16xbf16>, vector<16x1152xbf16>, vector<8x1152xf32> -> vector<8x1152xf32>
    %c0_3 = arith.constant 0 : index
    %c0_4 = arith.constant 0 : index
    %6 = vector.load %arg3[%c0_3, %c0_4] : memref<1x1152xf32, #tpu.memory_space<vmem>>, vector<1x1152xf32>
    %7 = vector.broadcast %6 : vector<1x1152xf32> to vector<8x1152xf32>
    %8 = arith.addf %5, %7 : vector<8x1152xf32>
    %cst_5 = arith.constant 0.000000e+00 : f32
    %9 = vector.broadcast %cst_5 : f32 to vector<8x1152xf32>
    %10 = arith.maximumf %8, %9 : vector<8x1152xf32>
    %11 = arith.truncf %10 : vector<8x1152xf32> to vector<8x1152xbf16>
    %c0_6 = arith.constant 0 : index
    %c0_7 = arith.constant 0 : index
    %12 = vector.load %arg4[%c0_6, %c0_7] : memref<1152x1024xbf16, #tpu.memory_space<vmem>>, vector<1152x1024xbf16>
    %cst_8 = arith.constant dense<0.000000e+00> : vector<8x1024xf32>
    %13 = tpu.matmul %11, %12, %cst_8 {dimension_numbers = #tpu.dot_dimension_numbers<[1], [0], [0], [1], [0, 0, 1, 1], [], []>} : vector<8x1152xbf16>, vector<1152x1024xbf16>, vector<8x1024xf32> -> vector<8x1024xf32>
    %c0_9 = arith.constant 0 : index
    %c0_10 = arith.constant 0 : index
    %14 = vector.load %arg6[%c0_9, %c0_10] : memref<1x1024xf32, #tpu.memory_space<vmem>>, vector<1x1024xf32>
    %15 = vector.broadcast %14 : vector<1x1024xf32> to vector<8x1024xf32>
    %16 = arith.addf %13, %15 : vector<8x1024xf32>
    %c0_11 = arith.constant 0 : index
    %c0_12 = arith.constant 0 : index
    %17 = vector.load %arg5[%c0_11, %c0_12] : memref<4x1024xf32, #tpu.memory_space<vmem>>, vector<4x1024xf32>
    %18 = vector.extract_strided_slice %3 {offsets = [0, 0], sizes = [8, 1], strides = [1, 1]} : vector<8x4xf32> to vector<8x1xf32>
    %19 = vector.extract_strided_slice %17 {offsets = [0, 0], sizes = [1, 1024], strides = [1, 1]} : vector<4x1024xf32> to vector<1x1024xf32>
    %20 = vector.broadcast %18 : vector<8x1xf32> to vector<8x1024xf32>
    %21 = vector.broadcast %19 : vector<1x1024xf32> to vector<8x1024xf32>
    %22 = arith.mulf %20, %21 : vector<8x1024xf32>
    %23 = arith.addf %16, %22 : vector<8x1024xf32>
    %24 = vector.extract_strided_slice %3 {offsets = [0, 1], sizes = [8, 1], strides = [1, 1]} : vector<8x4xf32> to vector<8x1xf32>
    %25 = vector.extract_strided_slice %17 {offsets = [1, 0], sizes = [1, 1024], strides = [1, 1]} : vector<4x1024xf32> to vector<1x1024xf32>
    %26 = vector.broadcast %24 : vector<8x1xf32> to vector<8x1024xf32>
    %27 = vector.broadcast %25 : vector<1x1024xf32> to vector<8x1024xf32>
    %28 = arith.mulf %26, %27 : vector<8x1024xf32>
    %29 = arith.addf %23, %28 : vector<8x1024xf32>
    %30 = vector.extract_strided_slice %3 {offsets = [0, 2], sizes = [8, 1], strides = [1, 1]} : vector<8x4xf32> to vector<8x1xf32>
    %31 = vector.extract_strided_slice %17 {offsets = [2, 0], sizes = [1, 1024], strides = [1, 1]} : vector<4x1024xf32> to vector<1x1024xf32>
    %32 = vector.broadcast %30 : vector<8x1xf32> to vector<8x1024xf32>
    %33 = vector.broadcast %31 : vector<1x1024xf32> to vector<8x1024xf32>
    %34 = arith.mulf %32, %33 : vector<8x1024xf32>
    %35 = arith.addf %29, %34 : vector<8x1024xf32>
    %36 = vector.extract_strided_slice %3 {offsets = [0, 3], sizes = [8, 1], strides = [1, 1]} : vector<8x4xf32> to vector<8x1xf32>
    %37 = vector.extract_strided_slice %17 {offsets = [3, 0], sizes = [1, 1024], strides = [1, 1]} : vector<4x1024xf32> to vector<1x1024xf32>
    %38 = vector.broadcast %36 : vector<8x1xf32> to vector<8x1024xf32>
    %39 = vector.broadcast %37 : vector<1x1024xf32> to vector<8x1024xf32>
    %40 = arith.mulf %38, %39 : vector<8x1024xf32>
    %41 = arith.addf %35, %40 : vector<8x1024xf32>
    %cst_13 = arith.constant 0.000000e+00 : f32
    %42 = vector.broadcast %cst_13 : f32 to vector<8x1024xf32>
    %43 = arith.maximumf %41, %42 : vector<8x1024xf32>
    %44 = arith.truncf %43 : vector<8x1024xf32> to vector<8x1024xbf16>
    %c0_14 = arith.constant 0 : index
    %c0_15 = arith.constant 0 : index
    %45 = vector.load %arg7[%c0_14, %c0_15] : memref<1024x384xbf16, #tpu.memory_space<vmem>>, vector<1024x384xbf16>
    %cst_16 = arith.constant dense<0.000000e+00> : vector<8x384xf32>
    %46 = tpu.matmul %44, %45, %cst_16 {dimension_numbers = #tpu.dot_dimension_numbers<[1], [0], [0], [1], [0, 0, 1, 1], [], []>} : vector<8x1024xbf16>, vector<1024x384xbf16>, vector<8x384xf32> -> vector<8x384xf32>
    %c0_17 = arith.constant 0 : index
    %c0_18 = arith.constant 0 : index
    %47 = vector.load %arg8[%c0_17, %c0_18] : memref<1x384xf32, #tpu.memory_space<vmem>>, vector<1x384xf32>
    %48 = vector.broadcast %47 : vector<1x384xf32> to vector<8x384xf32>
    %49 = arith.addf %46, %48 : vector<8x384xf32>
    %cst_19 = arith.constant 0.000000e+00 : f32
    %50 = vector.broadcast %cst_19 : f32 to vector<8x384xf32>
    %51 = arith.maximumf %49, %50 : vector<8x384xf32>
    %c0_20 = arith.constant 0 : index
    %c0_21 = arith.constant 0 : index
    %52 = vector.load %arg9[%c0_20, %c0_21] : memref<1x384xf32, #tpu.memory_space<vmem>>, vector<1x384xf32>
    %53 = vector.broadcast %52 : vector<1x384xf32> to vector<8x384xf32>
    %54 = arith.mulf %51, %53 : vector<8x384xf32>
    %cst_22 = arith.constant dense<0.000000e+00> : vector<8xf32>
    %55 = vector.multi_reduction <add>, %54, %cst_22 [1] : vector<8x384xf32> to vector<8xf32>
    %56 = vector.shape_cast %55 : vector<8xf32> to vector<8x1xf32>
    %c0_23 = arith.constant 0 : index
    %c0_24 = arith.constant 0 : index
    %57 = vector.load %arg10[%c0_23, %c0_24] : memref<1x1xf32, #tpu.memory_space<vmem>>, vector<1x1xf32>
    %58 = vector.broadcast %57 : vector<1x1xf32> to vector<8x1xf32>
    %59 = arith.addf %56, %58 : vector<8x1xf32>
    %c0_25 = arith.constant 0 : index
    %c0_26 = arith.constant 0 : index
    %60 = vector.load %arg11[%c0_25, %c0_26] : memref<8x1xf32, #tpu.memory_space<vmem>>, vector<8x1xf32>
    tpu.vector_store %arg11[%c0_25, %c0_26], %59 {strides = array<i32>} : memref<8x1xf32, #tpu.memory_space<vmem>>, vector<8x1xf32>,
    return
  }
  func.func @transform_0(%arg0: i32) -> (i32, i32) {
    %c0_i32 = arith.constant 0 : i32
    %c0_i32_0 = arith.constant 0 : i32
    return %arg0, %c0_i32 : i32, i32
  }
  func.func @transform_1(%arg0: i32) -> (i32, i32) {
    %c0_i32 = arith.constant 0 : i32
    %c0_i32_0 = arith.constant 0 : i32
    %c0_i32_1 = arith.constant 0 : i32
    return %c0_i32, %c0_i32_0 : i32, i32
  }
  func.func @transform_2(%arg0: i32) -> (i32, i32) {
    %c0_i32 = arith.constant 0 : i32
    %c0_i32_0 = arith.constant 0 : i32
    %c0_i32_1 = arith.constant 0 : i32
    return %c0_i32, %c0_i32_0 : i32, i32
  }
  func.func @transform_3(%arg0: i32) -> (i32, i32) {
    %c0_i32 = arith.constant 0 : i32
    %c0_i32_0 = arith.constant 0 : i32
    %c0_i32_1 = arith.constant 0 : i32
    return %c0_i32, %c0_i32_0 : i32, i32
  }
  func.func @transform_4(%arg0: i32) -> (i32, i32) {
    %c0_i32 = arith.constant 0 : i32
    %c0_i32_0 = arith.constant 0 : i32
    %c0_i32_1 = arith.constant 0 : i32
    return %c0_i32, %c0_i32_0 : i32, i32
  }
  func.func @transform_5(%arg0: i32) -> (i32, i32) {
    %c0_i32 = arith.constant 0 : i32
    %c0_i32_0 = arith.constant 0 : i32
    %c0_i32_1 = arith.constant 0 : i32
    return %c0_i32, %c0_i32_0 : i32, i32
  }
  func.func @transform_6(%arg0: i32) -> (i32, i32) {
    %c0_i32 = arith.constant 0 : i32
    %c0_i32_0 = arith.constant 0 : i32
    %c0_i32_1 = arith.constant 0 : i32
    return %c0_i32, %c0_i32_0 : i32, i32
  }
  func.func @transform_7(%arg0: i32) -> (i32, i32) {
    %c0_i32 = arith.constant 0 : i32
    %c0_i32_0 = arith.constant 0 : i32
    %c0_i32_1 = arith.constant 0 : i32
    return %c0_i32, %c0_i32_0 : i32, i32
  }
  func.func @transform_8(%arg0: i32) -> (i32, i32) {
    %c0_i32 = arith.constant 0 : i32
    %c0_i32_0 = arith.constant 0 : i32
    %c0_i32_1 = arith.constant 0 : i32
    return %c0_i32, %c0_i32_0 : i32, i32
  }
  func.func @transform_9(%arg0: i32) -> (i32, i32) {
    %c0_i32 = arith.constant 0 : i32
    %c0_i32_0 = arith.constant 0 : i32
    %c0_i32_1 = arith.constant 0 : i32
    return %c0_i32, %c0_i32_0 : i32, i32
  }
  func.func @transform_10(%arg0: i32) -> (i32, i32) {
    %c0_i32 = arith.constant 0 : i32
    %c0_i32_0 = arith.constant 0 : i32
    return %arg0, %c0_i32 : i32, i32
  }
}

</mosaic_0001>

<bundles_post_ra>
// kernel: tpu_custom_call.1
= control target key start
LH: loop header
LB: loop body
LE: loop exit
PB: predicated region body
PF: predicated region fallthrough
CT: control target
= control target key end

     0   :  { %s11269_s0 = inlined_call_operand.hbm [shape: f32[8,20], index: 0, kind: input, shape index: {}]   ;;  %s11270_s1 = inlined_call_operand.hbm [shape: bf16[16,1152], index: 1, kind: input, shape index: {}]   ;;  %s11271_s2 = inlined_call_operand.hbm [shape: f32[1,1152], index: 2, kind: input, shape index: {}]   ;;  %s11272_s3 = inlined_call_operand.hbm [shape: bf16[1152,1024], index: 3, kind: input, shape index: {}]   ;;  %s11273_s4 = inlined_call_operand.hbm [shape: f32[4,1024], index: 4, kind: input, shape index: {}]   ;;  %s11274_s5 = inlined_call_operand.hbm [shape: f32[1,1024], index: 5, kind: input, shape index: {}]   ;;  %s11275_s6 = inlined_call_operand.hbm [shape: bf16[1024,384], index: 6, kind: input, shape index: {}]   ;;  %s11276_s7 = inlined_call_operand.hbm [shape: f32[1,384], index: 7, kind: input, shape index: {}]   ;;  %s11277_s8 = inlined_call_operand.hbm [shape: f32[1,384], index: 8, kind: input, shape index: {}]   ;;  %s11278_s9 = inlined_call_operand.<no memory space> [shape: f32[1,1], index: 9, kind: input, shape index: {}]   ;;  %s11279_s10 = inlined_call_operand.vmem [shape: f32[8,1], index: 10, kind: output, shape index: {}]  }
   0x1   :  { %v15_v0 = vstv %s11278_s9 }
   0x2   :  { %16 = vst [vmem:[#allocation2] sm:$0x1] %v15_v0 }
   0x3   :  { %17 = vsyncpa [#allocation4], 0 }
   0x4   :  { %18 = vsyncpa [#allocation6], 0 }
   0x5   :  { %19 = vsyncpa [#allocation9], 0 }
   0x6   :  { %20 = vsyncpa [#allocation12], 0  ;;  %s37_s17 = sshll.u32 %s11270_s1, 4  ;;  %s38_s17 = int_to_ptr.hbm [resolvable:$true] %s37_s17 }
   0x7   :  { %21 = vsyncpa [#allocation15], 0  ;;  %s10779_s18 = smov [#allocation5]   ;;  %s61_s22 = sshll.u32 %s11272_s3, 4  ;;  %s62_s22 = int_to_ptr.hbm [resolvable:$true] %s61_s22 }
   0x8   :  { %s39_s19 = sshll.u32 %s10779_s18, 4  ;;  %s10780_s23 = smov 576   ;;  %s40_s19 = int_to_ptr.vmem [resolvable:$true] %s39_s19 }
   0x9   :  { %s10781_s9 = smov 36   ;;  %s10782_s24 = smov [#allocation8]  }
   0xa   :  { %45 = dma.hbm_to_vmem [thread:$0]  %s38_s17, 1152, %s40_s19, [#allocation6], %s10780_s23, %s10780_s23, %s10781_s9  }
   0xb   :  { %s63_s25 = sshll.u32 %s10782_s24, 4  ;;  %s10783_s26 = smov 512   ;;  %s64_s25 = int_to_ptr.vmem [resolvable:$true] %s63_s25 }
   0xc   :  { %s10784_s27 = smov 32   ;;  %s86_s29 = sshll.u32 %s11274_s5, 4  ;;  %s87_s29 = int_to_ptr.hbm [resolvable:$true] %s86_s29 }
   0xd   :  { %69 = dma.hbm_to_vmem [thread:$0]  %s62_s22, 73728, %s64_s25, [#allocation9], %s10783_s26, %s10783_s26, %s10784_s27  }
   0xe   :  { %s10785_s30 = smov [#allocation11]   ;;  %s110_s13 = sshll.u32 %s11276_s7, 4  ;;  %s111_s13 = int_to_ptr.hbm [resolvable:$true] %s110_s13 }
   0xf   :  { %s88_s11 = sshll.u32 %s10785_s30, 4  ;;  %s10786_s14 = smov [#allocation14]   ;;  %s89_s11 = int_to_ptr.vmem [resolvable:$true] %s88_s11 }
  0x10   :  { %91 = dma.hbm_to_vmem [thread:$0]  %s87_s29, 128, %s89_s11, [#allocation12]  }
  0x11   :  { %s112_s15 = sshll.u32 %s10786_s14, 4  ;;  %s27_s18 = sshll.u32 %s11269_s0, 4  ;;  %s113_s15 = int_to_ptr.vmem [resolvable:$true] %s112_s15  ;;  %s28_s18 = int_to_ptr.hbm [resolvable:$true] %s27_s18 }
  0x12   :  { %115 = dma.hbm_to_vmem [thread:$0]  %s111_s13, 48, %s113_s15, [#allocation15]  }
  0x13   :  { %s51_s20 = sshll.u32 %s11271_s2, 4  ;;  %s10787_s21 = smov [#allocation3]   ;;  %s52_s20 = int_to_ptr.hbm [resolvable:$true] %s51_s20 }
  0x14   :  { %s29_s22 = sshll.u32 %s10787_s21, 4  ;;  %s10788_s7 = smov [#allocation7]   ;;  %s30_s22 = int_to_ptr.vmem [resolvable:$true] %s29_s22 }
  0x15   :  { %32 = dma.hbm_to_vmem [thread:$0]  %s28_s18, 128, %s30_s22, [#allocation4]  }
  0x16   :  { %s53_s23 = sshll.u32 %s10788_s7, 4  ;;  %s75_s25 = sshll.u32 %s11273_s4, 4  ;;  %s54_s23 = int_to_ptr.vmem [resolvable:$true] %s53_s23  ;;  %s76_s25 = int_to_ptr.hbm [resolvable:$true] %s75_s25 }
  0x17   :  { %56 = dma.hbm_to_vmem [thread:$0]  %s52_s20, 144, %s54_s23, [#allocation6]  }
  0x18   :  { %s96_s27 = sshll.u32 %s11275_s6, 4  ;;  %s10789_s1 = smov [#allocation10]   ;;  %s97_s27 = int_to_ptr.hbm [resolvable:$true] %s96_s27 }
  0x19   :  { %s77_s2 = sshll.u32 %s10789_s1, 4  ;;  %s10790_s28 = smov [#allocation13]   ;;  %s78_s2 = int_to_ptr.vmem [resolvable:$true] %s77_s2 }
  0x1a   :  { %80 = dma.hbm_to_vmem [thread:$0]  %s76_s25, 512, %s78_s2, [#allocation9]  }
  0x1b   :  { %s98_s29 = sshll.u32 %s10790_s28, 4  ;;  %s10791_s30 = smov 192   ;;  %s99_s29 = int_to_ptr.vmem [resolvable:$true] %s98_s29 }
  0x1c   :  { %s10792_s11 = smov 12   ;;  %s121_s3 = sshll.u32 %s11277_s8, 4  ;;  %s122_s3 = int_to_ptr.hbm [resolvable:$true] %s121_s3 }
  0x1d   :  { %104 = dma.hbm_to_vmem [thread:$0]  %s97_s27, 24576, %s99_s29, [#allocation12], %s10791_s30, %s10791_s30, %s10792_s11  }
  0x1e   :  { %s10793_s13 = smov [#allocation16]  }
  0x1f   :  { %s123_s14 = sshll.u32 %s10793_s13, 4  ;;  %s124_s14 = int_to_ptr.vmem [resolvable:$true] %s123_s14 }
  0x20   :  { %126 = dma.hbm_to_vmem [thread:$0]  %s122_s3, 48, %s124_s14, [#allocation15]  }
  0x21   :  { %10769 = dma.done.wait [#allocation4], 128  }
  0x22   :  { %10770 = vsyncadd [#allocation4], 4294967168 }
  0x23   :  { %10771 = dma.done.wait [#allocation6], 1296  }
  0x24   :  { %10772 = vsyncadd [#allocation6], 4294966000 }
  0x25   :  { %10773 = dma.done.wait [#allocation9], 74240  }
  0x26   :  { %10774 = vsyncadd [#allocation9], 4294893056 }
  0x27   :  { %10775 = dma.done.wait [#allocation12], 24704  }
  0x28   :  { %10776 = vsyncadd [#allocation12], 4294942592 }
  0x29   :  { %10777 = dma.done.wait [#allocation15], 96  }
  0x2a   :  { %10778 = vsyncadd [#allocation15], 4294967200  ;;  %v6632_v1 = vld [vmem:[#allocation5] sm:$0xf]  ;;  %v9751_v2 = vld [vmem:[#allocation5 + $0x20] sm:$0xf0] }
  0x2b   :  { %v9747_v3 = vld [vmem:[#allocation5 + $0x4] sm:$0xf]  ;;  %v6633_v4 = vor.u32 %v9751_v2, %v6632_v1  ;;  %v6634_v5 = vld [vmem:[#allocation5 + $0x24] sm:$0xf0]  ;;  %v9752_v7 = vld [vmem:[#allocation5 + $0x28] sm:$0xf0] }
  0x2c   :  { %v6640_v6 = vld [vmem:[#allocation5 + $0x8] sm:$0xf]  ;;  %v6637_v8 = vor.u32 %v9747_v3, %v6634_v5  ;;  %v9748_v10 = vld [vmem:[#allocation5 + $0xc] sm:$0xf]  ;;  %v6642_v11 = vld [vmem:[#allocation5 + $0x2c] sm:$0xf0] }
  0x2d   :  { %v6641_v9 = vor.u32 %v9752_v7, %v6640_v6  ;;  %v10883_v12 = vld [vmem:[#allocation3] sm:$0xff]  ;;  %vm246_vm0 = vcmask 130048   ;;  %257 = vmatpush.bf16.msra.mxu0 %v6633_v4  ;;  %v6645_v13 = vor.u32 %v9748_v10, %v6642_v11  ;;  %v6648_v15 = vld [vmem:[#allocation5 + $0x10] sm:$0xf]  ;;  %v9753_v16 = vld [vmem:[#allocation5 + $0x30] sm:$0xf0] }
  0x2e   :  { %v10887_v14 = vpack.c.bf16 %v10883_v12, %v10883_v12  ;;  %v9749_v17 = vld [vmem:[#allocation5 + $0x14] sm:$0xf]  ;;  %270 = vmatpush.bf16.msra.mxu1 %v6637_v8  ;;  %v6649_v18 = vor.u32 %v9753_v16, %v6648_v15  ;;  %v6650_v19 = vld [vmem:[#allocation5 + $0x34] sm:$0xf0]  ;;  %v9754_v21 = vld [vmem:[#allocation5 + $0x38] sm:$0xf0] }
  0x2f   :  { %283 = vmatpush.bf16.msra.mxu2 %v6641_v9  ;;  %v6656_v20 = vld [vmem:[#allocation5 + $0x18] sm:$0xf]  ;;  %296 = vmatpush.bf16.msra.mxu3 %v6645_v13  ;;  %v6653_v22 = vor.u32 %v9749_v17, %v6650_v19  ;;  %v9750_v24 = vld [vmem:[#allocation5 + $0x1c] sm:$0xf]  ;;  %v6658_v25 = vld [vmem:[#allocation5 + $0x3c] sm:$0xf0] }
  0x30   :  { %v6657_v23 = vor.u32 %v9754_v21, %v6656_v20  ;;  %v6664_v26 = vld [vmem:[#allocation5 + $0x20] sm:$0xf]  ;;  %6666 = vmatmul.msk.bf16.vlgmr.msra.gmra.mxu0 %vm246_vm0, %v10887_v14  ;;  %v6661_v27 = vor.u32 %v9750_v24, %v6658_v25  ;;  %v9755_v28 = vld [vmem:[#allocation5 + $0x40] sm:$0xf0]  ;;  %v6901_v29 = vld [vmem:[#allocation8 + $0x1c0] sm:$0xf] }
  0x31   :  { %v9816_v30 = vld [vmem:[#allocation8 + $0x1dc] sm:$0xf0]  ;;  %6667 = vmatmul.msk.bf16.vlgmr.msra.gmra.mxu1 %vm246_vm0, %v10887_v14  ;;  %v6665_v31 = vor.u32 %v9755_v28, %v6664_v26  ;;  %309 = vmatpush.bf16.msrb.mxu0 %v6649_v18  ;;  %vm6619_vm1 = vcmask 7168  }
  0x32   :  { %6668 = vmatmul.msk.bf16.vlgmr.msra.gmra.mxu2 %vm246_vm0, %v10887_v14  ;;  %v6902_v32 = vor.u32 %v9816_v30, %v6901_v29  ;;  %v7157_v33 = vld [vmem:[#allocation8 + $0x3c0] sm:$0xf]  ;;  %6669 = vmatmul.msk.bf16.vlgmr.msra.gmra.mxu3 %vm246_vm0, %v10887_v14 }
  0x33   :  { %v9880_v34 = vld [vmem:[#allocation8 + $0x3dc] sm:$0xf0]  ;;  %322 = vmatpush.bf16.msrb.mxu1 %v6653_v22  ;;  %335 = vmatpush.bf16.msrb.mxu2 %v6657_v23 }
  0x34   :  { %v6869_v35 = vld [vmem:[#allocation8 + $0x180] sm:$0xf]  ;;  %v7158_v36 = vor.u32 %v9880_v34, %v7157_v33  ;;  %348 = vmatpush.bf16.msrb.mxu3 %v6661_v27 }
  0x35   :  { %v9808_v37 = vld [vmem:[#allocation8 + $0x19c] sm:$0xf0]  ;;  %361 = vmatpush.bf16.msra.mxu0 %v6665_v31 }
  0x36   :  { %v7125_v38 = vld [vmem:[#allocation8 + $0x380] sm:$0xf]  ;;  %v6870_v43 = vor.u32 %v9808_v37, %v6869_v35 }
  0x37   :  { %v9872_v39 = vld [vmem:[#allocation8 + $0x39c] sm:$0xf0]  ;;  %3859 = vmatpush.bf16.msra.mxu1 %v6902_v32  ;;  %3872 = vmatpush.bf16.msra.mxu2 %v7158_v36 }
  0x38   :  { %v7413_v40 = vld [vmem:[#allocation8 + $0x5c0] sm:$0xf]  ;;  %v7126_v44 = vor.u32 %v9872_v39, %v7125_v38 }
  0x39   :  { %v9944_v41 = vld [vmem:[#allocation8 + $0x5dc] sm:$0xf0] }
  0x3a   :  { %v7414_v42 = vor.u32 %v9944_v41, %v7413_v40  ;;  %v6837_v45 = vld [vmem:[#allocation8 + $0x140] sm:$0xf] }
  0x3b   :  { %v9800_v46 = vld [vmem:[#allocation8 + $0x15c] sm:$0xf0]  ;;  %3860 = vmatpush.bf16.msra.mxu1 %v6870_v43  ;;  %3873 = vmatpush.bf16.msra.mxu2 %v7126_v44 }
  0x3c   :  { %v7381_v47 = vld [vmem:[#allocation8 + $0x580] sm:$0xf]  ;;  %3885 = vmatpush.bf16.msra.mxu3 %v7414_v42  ;;  %v6838_v54 = vor.u32 %v9800_v46, %v6837_v45 }
  0x3d   :  { %v7093_v48 = vld [vmem:[#allocation8 + $0x340] sm:$0xf] }
  0x3e   :  { %v9864_v49 = vld [vmem:[#allocation8 + $0x35c] sm:$0xf0] }
  0x3f   :  { %v9936_v50 = vld [vmem:[#allocation8 + $0x59c] sm:$0xf0]  ;;  %v7094_v55 = vor.u32 %v9864_v49, %v7093_v48  ;;  %3861 = vmatpush.bf16.msra.mxu1 %v6838_v54 }
  0x40   :  { %v7382_v51 = vor.u32 %v9936_v50, %v7381_v47  ;;  %v7349_v52 = vld [vmem:[#allocation8 + $0x540] sm:$0xf]  ;;  %6670 = vmatmul.msk.bf16.vlgmr.msrb.gmra.mxu0 %vm246_vm0, %v10887_v14 }
  0x41   :  { %v9928_v53 = vld [vmem:[#allocation8 + $0x55c] sm:$0xf0]  ;;  %3874 = vmatpush.bf16.msra.mxu2 %v7094_v55  ;;  %6671 = vmatmul.msk.bf16.vlgmr.msrb.gmra.mxu1 %vm246_vm0, %v10887_v14 }
  0x42   :  { %3886 = vmatpush.bf16.msra.mxu3 %v7382_v51  ;;  %v7350_v56 = vor.u32 %v9928_v53, %v7349_v52  ;;  %v7669_v57 = vld [vmem:[#allocation8 + $0x7c0] sm:$0xf]  ;;  %6672 = vmatmul.msk.bf16.vlgmr.msrb.gmra.mxu2 %vm246_vm0, %v10887_v14 }
  0x43   :  { %v10008_v58 = vld [vmem:[#allocation8 + $0x7dc] sm:$0xf0]  ;;  %6673 = vmatmul.msk.bf16.vlgmr.msrb.gmra.mxu3 %vm246_vm0, %v10887_v14 }
  0x44   :  { %v6805_v59 = vld [vmem:[#allocation8 + $0x100] sm:$0xf]  ;;  %v7670_v1 = vor.u32 %v10008_v58, %v7669_v57 }
  0x45   :  { %v9792_v60 = vld [vmem:[#allocation8 + $0x11c] sm:$0xf0] }
  0x46   :  { %v7061_v61 = vld [vmem:[#allocation8 + $0x300] sm:$0xf]  ;;  %3887 = vmatpush.bf16.msra.mxu3 %v7350_v56  ;;  %v6806_v4 = vor.u32 %v9792_v60, %v6805_v59  ;;  %3898 = vmatpush.bf16.msrb.mxu0 %v7670_v1 }
  0x47   :  { %v9856_v62 = vld [vmem:[#allocation8 + $0x31c] sm:$0xf0] }
  0x48   :  { %v7317_v63 = vld [vmem:[#allocation8 + $0x500] sm:$0xf]  ;;  %v7062_v5 = vor.u32 %v9856_v62, %v7061_v61  ;;  %3862 = vmatpush.bf16.msra.mxu1 %v6806_v4 }
  0x49   :  { %v9920_v0 = vld [vmem:[#allocation8 + $0x51c] sm:$0xf0] }
  0x4a   :  { %v7637_v2 = vld [vmem:[#allocation8 + $0x780] sm:$0xf]  ;;  %v7318_v10 = vor.u32 %v9920_v0, %v7317_v63  ;;  %3875 = vmatpush.bf16.msra.mxu2 %v7062_v5 }
  0x4b   :  { %v10000_v3 = vld [vmem:[#allocation8 + $0x79c] sm:$0xf0] }
  0x4c   :  { %v6773_v6 = vld [vmem:[#allocation8 + $0xc0] sm:$0xf]  ;;  %v7638_v15 = vor.u32 %v10000_v3, %v7637_v2  ;;  %3888 = vmatpush.bf16.msra.mxu3 %v7318_v10 }
  0x4d   :  { %v9784_v7 = vld [vmem:[#allocation8 + $0xdc] sm:$0xf0] }
  0x4e   :  { %v7029_v8 = vld [vmem:[#allocation8 + $0x2c0] sm:$0xf]  ;;  %v6774_v18 = vor.u32 %v9784_v7, %v6773_v6  ;;  %3899 = vmatpush.bf16.msrb.mxu0 %v7638_v15 }
  0x4f   :  { %v9848_v9 = vld [vmem:[#allocation8 + $0x2dc] sm:$0xf0] }
  0x50   :  { %v7285_v11 = vld [vmem:[#allocation8 + $0x4c0] sm:$0xf]  ;;  %v7030_v19 = vor.u32 %v9848_v9, %v7029_v8  ;;  %3863 = vmatpush.bf16.msra.mxu1 %v6774_v18  ;;  %6674 = vmatmul.msk.bf16.vlgmr.msra.gmra.mxu0 %vm246_vm0, %v10887_v14 }
  0x51   :  { %v9912_v13 = vld [vmem:[#allocation8 + $0x4dc] sm:$0xf0] }
  0x52   :  { %v7605_v16 = vld [vmem:[#allocation8 + $0x740] sm:$0xf]  ;;  %v7286_v24 = vor.u32 %v9912_v13, %v7285_v11  ;;  %3876 = vmatpush.bf16.msra.mxu2 %v7030_v19 }
  0x53   :  { %v9992_v17 = vld [vmem:[#allocation8 + $0x75c] sm:$0xf0] }
  0x54   :  { %v6741_v20 = vld [vmem:[#allocation8 + $0x80] sm:$0xf]  ;;  %v7606_v27 = vor.u32 %v9992_v17, %v7605_v16  ;;  %3889 = vmatpush.bf16.msra.mxu3 %v7286_v24 }
  0x55   :  { %v9776_v21 = vld [vmem:[#allocation8 + $0x9c] sm:$0xf0] }
  0x56   :  { %v6997_v22 = vld [vmem:[#allocation8 + $0x280] sm:$0xf]  ;;  %v6742_v30 = vor.u32 %v9776_v21, %v6741_v20  ;;  %3900 = vmatpush.bf16.msrb.mxu0 %v7606_v27 }
  0x57   :  { %v9840_v23 = vld [vmem:[#allocation8 + $0x29c] sm:$0xf0] }
  0x58   :  { %v7253_v25 = vld [vmem:[#allocation8 + $0x480] sm:$0xf]  ;;  %v6998_v31 = vor.u32 %v9840_v23, %v6997_v22  ;;  %3864 = vmatpush.bf16.msra.mxu1 %v6742_v30 }
  0x59   :  { %v9904_v26 = vld [vmem:[#allocation8 + $0x49c] sm:$0xf0] }
  0x5a   :  { %v7573_v28 = vld [vmem:[#allocation8 + $0x700] sm:$0xf]  ;;  %v7254_v36 = vor.u32 %v9904_v26, %v7253_v25  ;;  %3877 = vmatpush.bf16.msra.mxu2 %v6998_v31 }
  0x5b   :  { %v9984_v29 = vld [vmem:[#allocation8 + $0x71c] sm:$0xf0] }
  0x5c   :  { %v6709_v32 = vld [vmem:[#allocation8 + $0x40] sm:$0xf]  ;;  %v7574_v39 = vor.u32 %v9984_v29, %v7573_v28  ;;  %3890 = vmatpush.bf16.msra.mxu3 %v7254_v36 }
  0x5d   :  { %v9768_v33 = vld [vmem:[#allocation8 + $0x5c] sm:$0xf0] }
  0x5e   :  { %v6965_v34 = vld [vmem:[#allocation8 + $0x240] sm:$0xf]  ;;  %v6710_v42 = vor.u32 %v9768_v33, %v6709_v32  ;;  %3901 = vmatpush.bf16.msrb.mxu0 %v7574_v39 }
  0x5f   :  { %v9832_v35 = vld [vmem:[#allocation8 + $0x25c] sm:$0xf0] }
  0x60   :  { %v7221_v37 = vld [vmem:[#allocation8 + $0x440] sm:$0xf]  ;;  %v6966_v43 = vor.u32 %v9832_v35, %v6965_v34  ;;  %3865 = vmatpush.bf16.msra.mxu1 %v6710_v42 }
  0x61   :  { %v9896_v38 = vld [vmem:[#allocation8 + $0x45c] sm:$0xf0] }
  0x62   :  { %v7541_v40 = vld [vmem:[#allocation8 + $0x6c0] sm:$0xf]  ;;  %v7222_v49 = vor.u32 %v9896_v38, %v7221_v37  ;;  %3878 = vmatpush.bf16.msra.mxu2 %v6966_v43 }
  0x63   :  { %v9976_v41 = vld [vmem:[#allocation8 + $0x6dc] sm:$0xf0] }
  0x64   :  { %v6677_v44 = vld [vmem:[#allocation8] sm:$0xf]  ;;  %v7542_v53 = vor.u32 %v9976_v41, %v7541_v40  ;;  %3891 = vmatpush.bf16.msra.mxu3 %v7222_v49 }
  0x65   :  { %v9760_v45 = vld [vmem:[#allocation8 + $0x1c] sm:$0xf0] }
  0x66   :  { %v6933_v46 = vld [vmem:[#allocation8 + $0x200] sm:$0xf]  ;;  %v6678_v58 = vor.u32 %v9760_v45, %v6677_v44  ;;  %3902 = vmatpush.bf16.msrb.mxu0 %v7542_v53 }
  0x67   :  { %v9824_v47 = vld [vmem:[#allocation8 + $0x21c] sm:$0xf0] }
  0x68   :  { %v7925_v48 = vld [vmem:[#allocation8 + $0x9c0] sm:$0xf]  ;;  %v6934_v59 = vor.u32 %v9824_v47, %v6933_v46  ;;  %3866 = vmatpush.bf16.msra.mxu1 %v6678_v58 }
  0x69   :  { %v10072_v50 = vld [vmem:[#allocation8 + $0x9dc] sm:$0xf0] }
  0x6a   :  { %v8181_v51 = vld [vmem:[#allocation8 + $0xbc0] sm:$0xf]  ;;  %v7926_v62 = vor.u32 %v10072_v50, %v7925_v48  ;;  %3879 = vmatpush.bf16.msra.mxu2 %v6934_v59 }
  0x6b   :  { %v10136_v52 = vld [vmem:[#allocation8 + $0xbdc] sm:$0xf0] }
  0x6c   :  { %v7509_v54 = vld [vmem:[#allocation8 + $0x680] sm:$0xf]  ;;  %v8182_v63 = vor.u32 %v10136_v52, %v8181_v51  ;;  %3911 = vmatpush.bf16.msrb.mxu1 %v7926_v62 }
  0x6d   :  { %v7189_v55 = vld [vmem:[#allocation8 + $0x400] sm:$0xf] }
  0x6e   :  { %v9888_v56 = vld [vmem:[#allocation8 + $0x41c] sm:$0xf0]  ;;  %3924 = vmatpush.bf16.msrb.mxu2 %v8182_v63 }
  0x6f   :  { %v9968_v57 = vld [vmem:[#allocation8 + $0x69c] sm:$0xf0]  ;;  %v7190_v4 = vor.u32 %v9888_v56, %v7189_v55 }
  0x70   :  { %v8437_v60 = vld [vmem:[#allocation8 + $0xdc0] sm:$0xf]  ;;  %v7510_v5 = vor.u32 %v9968_v57, %v7509_v54 }
  0x71   :  { %v10200_v61 = vld [vmem:[#allocation8 + $0xddc] sm:$0xf0]  ;;  %3892 = vmatpush.bf16.msra.mxu3 %v7190_v4 }
  0x72   :  { %v7893_v0 = vld [vmem:[#allocation8 + $0x980] sm:$0xf]  ;;  %v8438_v8 = vor.u32 %v10200_v61, %v8437_v60  ;;  %3903 = vmatpush.bf16.msrb.mxu0 %v7510_v5 }
  0x73   :  { %v10064_v1 = vld [vmem:[#allocation8 + $0x99c] sm:$0xf0] }
  0x74   :  { %v8149_v2 = vld [vmem:[#allocation8 + $0xb80] sm:$0xf]  ;;  %v7894_v14 = vor.u32 %v10064_v1, %v7893_v0 }
  0x75   :  { %v10128_v3 = vld [vmem:[#allocation8 + $0xb9c] sm:$0xf0]  ;;  %3937 = vmatpush.bf16.msrb.mxu3 %v8438_v8 }
  0x76   :  { %v7477_v6 = vld [vmem:[#allocation8 + $0x640] sm:$0xf]  ;;  %v8150_v11 = vor.u32 %v10128_v3, %v8149_v2  ;;  %3912 = vmatpush.bf16.msrb.mxu1 %v7894_v14 }
  0x77   :  { %v9960_v7 = vld [vmem:[#allocation8 + $0x65c] sm:$0xf0] }
  0x78   :  { %v8405_v9 = vld [vmem:[#allocation8 + $0xd80] sm:$0xf]  ;;  %v7478_v18 = vor.u32 %v9960_v7, %v7477_v6  ;;  %3925 = vmatpush.bf16.msrb.mxu2 %v8150_v11 }
  0x79   :  { %v10192_v10 = vld [vmem:[#allocation8 + $0xd9c] sm:$0xf0] }
  0x7a   :  { %v7861_v13 = vld [vmem:[#allocation8 + $0x940] sm:$0xf]  ;;  %v8406_v20 = vor.u32 %v10192_v10, %v8405_v9  ;;  %3904 = vmatpush.bf16.msrb.mxu0 %v7478_v18 }
  0x7b   :  { %v10056_v15 = vld [vmem:[#allocation8 + $0x95c] sm:$0xf0] }
  0x7c   :  { %v8117_v16 = vld [vmem:[#allocation8 + $0xb40] sm:$0xf]  ;;  %v7862_v26 = vor.u32 %v10056_v15, %v7861_v13  ;;  %3938 = vmatpush.bf16.msrb.mxu3 %v8406_v20 }
  0x7d   :  { %v10120_v17 = vld [vmem:[#allocation8 + $0xb5c] sm:$0xf0] }
  0x7e   :  { %v7445_v19 = vld [vmem:[#allocation8 + $0x600] sm:$0xf]  ;;  %v8118_v27 = vor.u32 %v10120_v17, %v8117_v16  ;;  %3913 = vmatpush.bf16.msrb.mxu1 %v7862_v26 }
  0x7f   :  { %v9952_v21 = vld [vmem:[#allocation8 + $0x61c] sm:$0xf0] }
  0x80   :  { %v8373_v22 = vld [vmem:[#allocation8 + $0xd40] sm:$0xf]  ;;  %v7446_v32 = vor.u32 %v9952_v21, %v7445_v19  ;;  %3926 = vmatpush.bf16.msrb.mxu2 %v8118_v27 }
  0x81   :  { %v10184_v23 = vld [vmem:[#allocation8 + $0xd5c] sm:$0xf0] }
  0x82   :  { %v8693_v24 = vld [vmem:[#allocation8 + $0xfc0] sm:$0xf]  ;;  %v8374_v33 = vor.u32 %v10184_v23, %v8373_v22  ;;  %3905 = vmatpush.bf16.msrb.mxu0 %v7446_v32 }
  0x83   :  { %v10264_v25 = vld [vmem:[#allocation8 + $0xfdc] sm:$0xf0] }
  0x84   :  { %v7829_v28 = vld [vmem:[#allocation8 + $0x900] sm:$0xf]  ;;  %v8694_v34 = vor.u32 %v10264_v25, %v8693_v24  ;;  %3939 = vmatpush.bf16.msrb.mxu3 %v8374_v33 }
  0x85   :  { %v10048_v29 = vld [vmem:[#allocation8 + $0x91c] sm:$0xf0] }
  0x86   :  { %v8085_v30 = vld [vmem:[#allocation8 + $0xb00] sm:$0xf]  ;;  %v7830_v39 = vor.u32 %v10048_v29, %v7829_v28  ;;  %3950 = vmatpush.bf16.msra.mxu0 %v8694_v34  ;;  %v10907_v34 = vld [vmem:[#allocation7] sm:$0xff] }
  0x87   :  { %v10112_v31 = vld [vmem:[#allocation8 + $0xb1c] sm:$0xf0] }
  0x88   :  { %v8341_v35 = vld [vmem:[#allocation8 + $0xd00] sm:$0xf]  ;;  %v8086_v40 = vor.u32 %v10112_v31, %v8085_v30  ;;  %3914 = vmatpush.bf16.msrb.mxu1 %v7830_v39 }
  0x89   :  { %v10176_v36 = vld [vmem:[#allocation8 + $0xd1c] sm:$0xf0] }
  0x8a   :  { %v8661_v37 = vld [vmem:[#allocation8 + $0xf80] sm:$0xf]  ;;  %v8342_v45 = vor.u32 %v10176_v36, %v8341_v35  ;;  %3927 = vmatpush.bf16.msrb.mxu2 %v8086_v40  ;;  %v182_v35 = vperm.slane %v10907_v34, 0  ;;  %v183_v36 = vperm.slane %v10907_v34, 1 }
  0x8b   :  { %v10256_v38 = vld [vmem:[#allocation8 + $0xf9c] sm:$0xf0] }
  0x8c   :  { %v7797_v41 = vld [vmem:[#allocation8 + $0x8c0] sm:$0xf]  ;;  %v8662_v46 = vor.u32 %v10256_v38, %v8661_v37  ;;  %3940 = vmatpush.bf16.msrb.mxu3 %v8342_v45 }
  0x8d   :  { %v10040_v42 = vld [vmem:[#allocation8 + $0x8dc] sm:$0xf0] }
  0x8e   :  { %v8053_v43 = vld [vmem:[#allocation8 + $0xac0] sm:$0xf]  ;;  %v7798_v49 = vor.u32 %v10040_v42, %v7797_v41  ;;  %3951 = vmatpush.bf16.msra.mxu0 %v8662_v46 }
  0x8f   :  { %v10104_v44 = vld [vmem:[#allocation8 + $0xadc] sm:$0xf0] }
  0x90   :  { %v8629_v47 = vld [vmem:[#allocation8 + $0xf40] sm:$0xf]  ;;  %v8054_v50 = vor.u32 %v10104_v44, %v8053_v43  ;;  %3915 = vmatpush.bf16.msrb.mxu1 %v7798_v49  ;;  %v9812_v43 = vld [vmem:[#allocation8 + $0x1c4] sm:$0xf] }
  0x91   :  { %v10248_v48 = vld [vmem:[#allocation8 + $0xf5c] sm:$0xf0]  ;;  %v6903_v44 = vld [vmem:[#allocation8 + $0x1e0] sm:$0xf0] }
  0x92   :  { %v7765_v51 = vld [vmem:[#allocation8 + $0x880] sm:$0xf]  ;;  %v8630_v55 = vor.u32 %v10248_v48, %v8629_v47  ;;  %3928 = vmatpush.bf16.msrb.mxu2 %v8054_v50  ;;  %v184_v47 = vperm.slane %v10907_v34, 2  ;;  %v185_v50 = vperm.slane %v10907_v34, 3 }
  0x93   :  { %v10032_v52 = vld [vmem:[#allocation8 + $0x89c] sm:$0xf0] }
  0x94   :  { %v8021_v53 = vld [vmem:[#allocation8 + $0xa80] sm:$0xf]  ;;  %v7766_v58 = vor.u32 %v10032_v52, %v7765_v51  ;;  %3952 = vmatpush.bf16.msra.mxu0 %v8630_v55  ;;  %v6906_v51 = vor.u32 %v9812_v43, %v6903_v44  ;;  %v9804_v55 = vld [vmem:[#allocation8 + $0x184] sm:$0xf]  ;;  %v10795_v44 = vmov 18  }
  0x95   :  { %v10096_v54 = vld [vmem:[#allocation8 + $0xa9c] sm:$0xf0]  ;;  %10545 = vset.pattern.permute.xlu1 %v10795_v44  ;;  %v10004_v44 = vld [vmem:[#allocation8 + $0x7c4] sm:$0xf] }
  0x96   :  { %v8597_v56 = vld [vmem:[#allocation8 + $0xf00] sm:$0xf]  ;;  %v8022_v59 = vor.u32 %v10096_v54, %v8021_v53  ;;  %3916 = vmatpush.bf16.msrb.mxu1 %v7766_v58  ;;  %v9876_v58 = vld [vmem:[#allocation8 + $0x3c4] sm:$0xf]  ;;  %4893 = vperm.xlu1 %10545, %v10883_v12  }
  0x97   :  { %v10240_v57 = vld [vmem:[#allocation8 + $0xf1c] sm:$0xf0] }
  0x98   :  { %v8598_v60 = vor.u32 %v10240_v57, %v8597_v56  ;;  %3929 = vmatpush.bf16.msrb.mxu2 %v8022_v59  ;;  %v8309_v61 = vld [vmem:[#allocation8 + $0xcc0] sm:$0xf]  ;;  %v6871_v56 = vld [vmem:[#allocation8 + $0x1a0] sm:$0xf0] }
  0x99   :  { %v10168_v62 = vld [vmem:[#allocation8 + $0xcdc] sm:$0xf0] }
  0x9a   :  { %3953 = vmatpush.bf16.msra.mxu0 %v8598_v60  ;;  %v8565_v63 = vld [vmem:[#allocation8 + $0xec0] sm:$0xf]  ;;  %v8310_v0 = vor.u32 %v10168_v62, %v8309_v61 }
  0x9b   :  { %v10232_v1 = vld [vmem:[#allocation8 + $0xedc] sm:$0xf0] }
  0x9c   :  { %v8566_v2 = vor.u32 %v10232_v1, %v8565_v63  ;;  %v7733_v3 = vld [vmem:[#allocation8 + $0x840] sm:$0xf]  ;;  %3941 = vmatpush.bf16.msrb.mxu3 %v8310_v0  ;;  %v7159_v63 = vld [vmem:[#allocation8 + $0x3e0] sm:$0xf0] }
  0x9d   :  { %v10024_v4 = vld [vmem:[#allocation8 + $0x85c] sm:$0xf0]  ;;  %v9940_v0 = vld [vmem:[#allocation8 + $0x5c4] sm:$0xf] }
  0x9e   :  { %v7734_v5 = vor.u32 %v10024_v4, %v7733_v3  ;;  %v7989_v6 = vld [vmem:[#allocation8 + $0xa40] sm:$0xf]  ;;  %3954 = vmatpush.bf16.msra.mxu0 %v8566_v2  ;;  %v7415_v1 = vld [vmem:[#allocation8 + $0x5e0] sm:$0xf0]  ;;  %v6874_v4 = vor.u32 %v9804_v55, %v6871_v56 }
  0x9f   :  { %v10088_v7 = vld [vmem:[#allocation8 + $0xa5c] sm:$0xf0] }
  0xa0   :  { %v7990_v8 = vor.u32 %v10088_v7, %v7989_v6  ;;  %v8277_v9 = vld [vmem:[#allocation8 + $0xc80] sm:$0xf]  ;;  %3917 = vmatpush.bf16.msrb.mxu1 %v7734_v5 }
  0xa1   :  { %v10160_v10 = vld [vmem:[#allocation8 + $0xc9c] sm:$0xf0] }
  0xa2   :  { %v8533_v14 = vld [vmem:[#allocation8 + $0xe80] sm:$0xf]  ;;  %v8278_v11 = vor.u32 %v10160_v10, %v8277_v9  ;;  %3930 = vmatpush.bf16.msrb.mxu2 %v7990_v8  ;;  %v9796_v8 = vld [vmem:[#allocation8 + $0x144] sm:$0xf] }
  0xa3   :  { %v10224_v13 = vld [vmem:[#allocation8 + $0xe9c] sm:$0xf0]  ;;  %v6839_v9 = vld [vmem:[#allocation8 + $0x160] sm:$0xf0] }
  0xa4   :  { %v8534_v15 = vor.u32 %v10224_v13, %v8533_v14  ;;  %v7701_v16 = vld [vmem:[#allocation8 + $0x800] sm:$0xf]  ;;  %3942 = vmatpush.bf16.msrb.mxu3 %v8278_v11  ;;  %v7162_v14 = vor.u32 %v9876_v58, %v7159_v63  ;;  %v7418_v11 = vor.u32 %v9940_v0, %v7415_v1  ;;  %v9868_v13 = vld [vmem:[#allocation8 + $0x384] sm:$0xf] }
  0xa5   :  { %v10016_v17 = vld [vmem:[#allocation8 + $0x81c] sm:$0xf0]  ;;  %v7063_v58 = vld [vmem:[#allocation8 + $0x320] sm:$0xf0] }
  0xa6   :  { %v7957_v18 = vld [vmem:[#allocation8 + $0xa00] sm:$0xf]  ;;  %v7702_v19 = vor.u32 %v10016_v17, %v7701_v16  ;;  %3955 = vmatpush.bf16.msra.mxu0 %v8534_v15  ;;  %v186_v17 = vperm.slane %v10907_v34, 4  ;;  %v7319_v63 = vld [vmem:[#allocation8 + $0x520] sm:$0xf0] }
  0xa7   :  { %v10080_v20 = vld [vmem:[#allocation8 + $0xa1c] sm:$0xf0] }
  0xa8   :  { %v7958_v21 = vor.u32 %v10080_v20, %v7957_v18  ;;  %3918 = vmatpush.bf16.msrb.mxu1 %v7702_v19  ;;  %v8245_v22 = vld [vmem:[#allocation8 + $0xc40] sm:$0xf]  ;;  %v7127_v18 = vld [vmem:[#allocation8 + $0x3a0] sm:$0xf0] }
  0xa9   :  { %v10152_v23 = vld [vmem:[#allocation8 + $0xc5c] sm:$0xf0]  ;;  %v9932_v19 = vld [vmem:[#allocation8 + $0x584] sm:$0xf] }
  0xaa   :  { %3931 = vmatpush.bf16.msrb.mxu2 %v7958_v21  ;;  %v8246_v24 = vor.u32 %v10152_v23, %v8245_v22  ;;  %v8501_v25 = vld [vmem:[#allocation8 + $0xe40] sm:$0xf]  ;;  %v6842_v21 = vor.u32 %v9796_v8, %v6839_v9  ;;  %v7383_v22 = vld [vmem:[#allocation8 + $0x5a0] sm:$0xf0] }
  0xab   :  { %v10216_v26 = vld [vmem:[#allocation8 + $0xe5c] sm:$0xf0] }
  0xac   :  { %v8502_v27 = vor.u32 %v10216_v26, %v8501_v25  ;;  %3943 = vmatpush.bf16.msrb.mxu3 %v8246_v24  ;;  %v8213_v28 = vld [vmem:[#allocation8 + $0xc00] sm:$0xf]  ;;  %v10794_v25 = vmov 16   ;;  %v187_v26 = vperm.slane %v10907_v34, 5 }
  0xad   :  { %v10144_v29 = vld [vmem:[#allocation8 + $0xc1c] sm:$0xf0]  ;;  %v259_v37 = vpop.f32.mrf.mxu0  ;;  %10543 = vset.pattern.permute.xlu0 %v10794_v25  ;;  %v9764_v25 = vld [vmem:[#allocation8 + $0x44] sm:$0xf] }
  0xae   :  { %3956 = vmatpush.bf16.msra.mxu0 %v8502_v27  ;;  %v8214_v30 = vor.u32 %v10144_v29, %v8213_v28  ;;  %v8469_v31 = vld [vmem:[#allocation8 + $0xe00] sm:$0xf]  ;;  %v260_v38 = vadd.f32 %v259_v37, %v182_v35  ;;  %v272_v39 = vpop.f32.mrf.mxu1  ;;  %v9788_v27 = vld [vmem:[#allocation8 + $0x104] sm:$0xf]  ;;  %4801 = vperm.xlu0 %10543, %v10883_v12  }
  0xaf   :  { %v10208_v32 = vld [vmem:[#allocation8 + $0xe1c] sm:$0xf0]  ;;  %v273_v42 = vadd.f32 %v272_v39, %v183_v36  ;;  %v6807_v28 = vld [vmem:[#allocation8 + $0x120] sm:$0xf0] }
  0xb0   :  { %v8470_v33 = vor.u32 %v10208_v32, %v8469_v31  ;;  %3944 = vmatpush.bf16.msrb.mxu3 %v8214_v30  ;;  %v8949_v40 = vld [vmem:[#allocation8 + $0x11c0] sm:$0xf]  ;;  %v367_v45 = vmax.f32 %v260_v38, 0.0  ;;  %v7130_v30 = vor.u32 %v9868_v13, %v7127_v18  ;;  %v9860_v36 = vld [vmem:[#allocation8 + $0x344] sm:$0xf] }
  0xb1   :  { %v10328_v41 = vld [vmem:[#allocation8 + $0x11dc] sm:$0xf0]  ;;  %v368_v46 = vmax.f32 %v273_v42, 0.0  ;;  %v7095_v37 = vld [vmem:[#allocation8 + $0x360] sm:$0xf0] }
  0xb2   :  { %3957 = vmatpush.bf16.msra.mxu0 %v8470_v33  ;;  %v8950_v48 = vor.u32 %v10328_v41, %v8949_v40  ;;  %v10912_v49 = vpack.c.bf16 %v367_v45, %v367_v45  ;;  %v8917_v52 = vld [vmem:[#allocation8 + $0x1180] sm:$0xf]  ;;  %v7386_v33 = vor.u32 %v9932_v19, %v7383_v22  ;;  %v6810_v40 = vor.u32 %v9788_v27, %v6807_v28  ;;  %v9924_v41 = vld [vmem:[#allocation8 + $0x544] sm:$0xf] }
  0xb3   :  { %v10320_v53 = vld [vmem:[#allocation8 + $0x119c] sm:$0xf0]  ;;  %v10915_v54 = vpack.c.bf16 %v368_v46, %v368_v46  ;;  %v7351_v42 = vld [vmem:[#allocation8 + $0x560] sm:$0xf0]  ;;  %v10797_v27 = vmov 19  }
  0xb4   :  { %3867 = vmatmul.bf16.vlgmr.msra.gmra.mxu1 %v10912_v49  ;;  %v8918_v62 = vor.u32 %v10320_v53, %v8917_v52  ;;  %v8885_v5 = vld [vmem:[#allocation8 + $0x1140] sm:$0xf]  ;;  %v188_v52 = vperm.slane %v10907_v34, 6  ;;  %v9852_v53 = vld [vmem:[#allocation8 + $0x304] sm:$0xf]  ;;  %v7354_v56 = vor.u32 %v9924_v41, %v7351_v42  ;;  %10546 = vset.pattern.permute.xlu1 %v10797_v27 }
  0xb5   :  { %v285_v57 = vpop.f32.mrf.mxu2  ;;  %v298_v60 = vpop.f32.mrf.mxu3  ;;  %3880 = vmatmul.bf16.vlgmr.msra.gmra.mxu2 %v10915_v54  ;;  %3963 = vmatpush.bf16.msra.mxu1 %v8950_v48  ;;  %v10312_v6 = vld [vmem:[#allocation8 + $0x115c] sm:$0xf0]  ;;  %v6775_v48 = vld [vmem:[#allocation8 + $0xe0] sm:$0xf0] }
  0xb6   :  { %v286_v59 = vadd.f32 %v285_v57, %v184_v47  ;;  %v261_v61 = vpop.f32.mrf.mxu0  ;;  %v299_v2 = vadd.f32 %v298_v60, %v185_v50  ;;  %3976 = vmatpush.bf16.msra.mxu2 %v6906_v51  ;;  %v274_v3 = vpop.f32.mrf.mxu1  ;;  %v8886_v16 = vor.u32 %v10312_v6, %v8885_v5  ;;  %v8853_v23 = vld [vmem:[#allocation8 + $0x1100] sm:$0xf]  ;;  %v9780_v47 = vld [vmem:[#allocation8 + $0xc4] sm:$0xf]  ;;  %v7098_v51 = vor.u32 %v9860_v36, %v7095_v37 }
  0xb7   :  { %v10304_v24 = vld [vmem:[#allocation8 + $0x111c] sm:$0xf0]  ;;  %v189_v57 = vperm.slane %v10907_v34, 7  ;;  %v9772_v3 = vld [vmem:[#allocation8 + $0x84] sm:$0xf]  ;;  %v10796_v5 = vmov 17   ;;  %v7066_v34 = vor.u32 %v9852_v53, %v7063_v58  ;;  %4937 = vperm.xlu1 %10546, %v10883_v12  }
  0xb8   :  { %v369_v7 = vmax.f32 %v286_v59, 0.0  ;;  %v370_v10 = vmax.f32 %v299_v2, 0.0  ;;  %v8854_v35 = vor.u32 %v10304_v24, %v8853_v23  ;;  %v8821_v43 = vld [vmem:[#allocation8 + $0x10c0] sm:$0xf]  ;;  %v9916_v59 = vld [vmem:[#allocation8 + $0x504] sm:$0xf]  ;;  %10544 = vset.pattern.permute.xlu0 %v10796_v5 }
  0xb9   :  { %3964 = vmatpush.bf16.msra.mxu1 %v8918_v62  ;;  %v10296_v46 = vld [vmem:[#allocation8 + $0x10dc] sm:$0xf0]  ;;  %v6778_v62 = vor.u32 %v9780_v47, %v6775_v48  ;;  %v9908_v13 = vld [vmem:[#allocation8 + $0x4c4] sm:$0xf]  ;;  %4849 = vperm.xlu0 %10544, %v10883_v12  }
  0xba   :  { %v10919_v15 = vpack.c.bf16 %v369_v7, %v369_v7  ;;  %v10922_v20 = vpack.c.bf16 %v370_v10, %v370_v10  ;;  %3977 = vmatpush.bf16.msra.mxu2 %v6874_v4  ;;  %v8822_v61 = vor.u32 %v10296_v46, %v8821_v43  ;;  %v8789_v0 = vld [vmem:[#allocation8 + $0x1080] sm:$0xf]  ;;  %v6743_v4 = vld [vmem:[#allocation8 + $0xa0] sm:$0xf0] }
  0xbb   :  { %v10288_v2 = vld [vmem:[#allocation8 + $0x109c] sm:$0xf0]  ;;  %v9844_v7 = vld [vmem:[#allocation8 + $0x2c4] sm:$0xf]  ;;  %v6746_v19 = vor.u32 %v9772_v3, %v6743_v4 }
  0xbc   :  { %3893 = vmatmul.bf16.vlgmr.msra.gmra.mxu3 %v10919_v15  ;;  %3906 = vmatmul.bf16.vlgmr.msrb.gmra.mxu0 %v10922_v20  ;;  %v8790_v18 = vor.u32 %v10288_v2, %v8789_v0  ;;  %v10280_v22 = vld [vmem:[#allocation8 + $0x105c] sm:$0xf0]  ;;  %v9900_v36 = vld [vmem:[#allocation8 + $0x484] sm:$0xf] }
  0xbd   :  { %3989 = vmatpush.bf16.msra.mxu3 %v7162_v14  ;;  %v287_v29 = vpop.f32.mrf.mxu2  ;;  %4002 = vmatpush.bf16.msrb.mxu0 %v7418_v11  ;;  %v300_v31 = vpop.f32.mrf.mxu3  ;;  %v7322_v14 = vor.u32 %v9916_v59, %v7319_v63  ;;  %v7031_v11 = vld [vmem:[#allocation8 + $0x2e0] sm:$0xf0]  ;;  %v8725_v41 = vld [vmem:[#allocation8 + $0x1000] sm:$0xf] }
  0xbe   :  { %3965 = vmatpush.bf16.msra.mxu1 %v8886_v16  ;;  %v311_v32 = vpop.f32.mrf.mxu0  ;;  %3978 = vmatpush.bf16.msra.mxu2 %v6842_v21  ;;  %v324_v39 = vpop.f32.mrf.mxu1  ;;  %v7287_v16 = vld [vmem:[#allocation8 + $0x4e0] sm:$0xf0]  ;;  %v8757_v21 = vld [vmem:[#allocation8 + $0x1040] sm:$0xf]  ;;  %v7034_v29 = vor.u32 %v9844_v7, %v7031_v11 }
  0xbf   :  { %v312_v38 = vadd.f32 %v311_v32, %v186_v17  ;;  %v325_v45 = vadd.f32 %v324_v39, %v187_v26  ;;  %v6711_v26 = vld [vmem:[#allocation8 + $0x60] sm:$0xf0]  ;;  %v7290_v32 = vor.u32 %v9908_v13, %v7287_v16  ;;  %v10272_v42 = vld [vmem:[#allocation8 + $0x101c] sm:$0xf0] }
  0xc0   :  { %v6714_v39 = vor.u32 %v9764_v25, %v6711_v26  ;;  %v9756_v43 = vld [vmem:[#allocation8 + $0x4] sm:$0xf]  ;;  %v8726_v58 = vor.u32 %v10272_v42, %v8725_v41 }
  0xc1   :  { %v371_v50 = vmax.f32 %v312_v38, 0.0  ;;  %3990 = vmatpush.bf16.msra.mxu3 %v7130_v30  ;;  %v372_v55 = vmax.f32 %v325_v45, 0.0  ;;  %4003 = vmatpush.bf16.msrb.mxu0 %v7386_v33  ;;  %v10548_v30 = vld [vmem:[#allocation7 + $0x8] ss:$0 sm:$0xff]  ;;  %v9836_v33 = vld [vmem:[#allocation8 + $0x284] sm:$0xf]  ;;  %v8758_v38 = vor.u32 %v10280_v22, %v8757_v21 }
  0xc2   :  { %3966 = vmatpush.bf16.msra.mxu1 %v8854_v35  ;;  %3979 = vmatpush.bf16.msra.mxu2 %v6810_v40  ;;  %v6999_v35 = vld [vmem:[#allocation8 + $0x2a0] sm:$0xf0] }
  0xc3   :  { %v10931_v60 = vpack.c.bf16 %v371_v50, %v371_v50  ;;  %v10933_v1 = vpack.c.bf16 %v372_v55, %v372_v55  ;;  %v7255_v40 = vld [vmem:[#allocation8 + $0x4a0] sm:$0xf0]  ;;  %v7002_v45 = vor.u32 %v9836_v33, %v6999_v35  ;;  %10547 = vset.pattern.permute.xlu0 %v10797_v27 }
  0xc4   :  { %v6679_v12 = vld [vmem:[#allocation8 + $0x20] sm:$0xf0] }
  0xc5   :  { %3991 = vmatpush.bf16.msra.mxu3 %v7098_v51  ;;  %v337_v6 = vpop.f32.mrf.mxu2  ;;  %3919 = vmatmul.bf16.vlgmr.msrb.gmra.mxu1 %v10931_v60  ;;  %v7671_v47 = vld [vmem:[#allocation8 + $0x7e0] sm:$0xf0]  ;;  %v6682_v59 = vor.u32 %v9756_v43, %v6679_v12 }
  0xc6   :  { %4004 = vmatpush.bf16.msrb.mxu0 %v7354_v56  ;;  %v338_v8 = vadd.f32 %v337_v6, %v188_v52  ;;  %v350_v9 = vpop.f32.mrf.mxu3  ;;  %3932 = vmatmul.bf16.vlgmr.msrb.gmra.mxu2 %v10933_v1  ;;  %v313_v10 = vpop.f32.mrf.mxu0  ;;  %v10068_v48 = vld [vmem:[#allocation8 + $0x9c4] sm:$0xf]  ;;  %v7258_v52 = vor.u32 %v9900_v36, %v7255_v40  ;;  %v7674_v63 = vor.u32 %v10004_v44, %v7671_v47 }
  0xc7   :  { %v351_v17 = vadd.f32 %v350_v9, %v189_v57  ;;  %3967 = vmatpush.bf16.msra.mxu1 %v8822_v61  ;;  %3980 = vmatpush.bf16.msra.mxu2 %v6778_v62  ;;  %v326_v23 = vpop.f32.mrf.mxu1  ;;  %v7927_v50 = vld [vmem:[#allocation8 + $0x9e0] sm:$0xf0] }
  0xc8   :  { %v373_v24 = vmax.f32 %v338_v8, 0.0  ;;  %v9828_v53 = vld [vmem:[#allocation8 + $0x244] sm:$0xf]  ;;  %v7930_v0 = vor.u32 %v10068_v48, %v7927_v50 }
  0xc9   :  { %v374_v28 = vmax.f32 %v351_v17, 0.0  ;;  %3992 = vmatpush.bf16.msra.mxu3 %v7066_v34  ;;  %v6967_v55 = vld [vmem:[#allocation8 + $0x260] sm:$0xf0] }
  0xca   :  { %v10939_v31 = vpack.c.bf16 %v373_v24, %v373_v24  ;;  %4005 = vmatpush.bf16.msrb.mxu0 %v7322_v14  ;;  %v9892_v61 = vld [vmem:[#allocation8 + $0x444] sm:$0xf]  ;;  %v6970_v5 = vor.u32 %v9828_v53, %v6967_v55 }
  0xcb   :  { %v10941_v37 = vpack.c.bf16 %v374_v28, %v374_v28  ;;  %3968 = vmatpush.bf16.msra.mxu1 %v8790_v18  ;;  %3981 = vmatpush.bf16.msra.mxu2 %v6746_v19  ;;  %v7223_v62 = vld [vmem:[#allocation8 + $0x460] sm:$0xf0] }
  0xcc   :  { %3945 = vmatmul.bf16.vlgmr.msrb.gmra.mxu3 %v10939_v31  ;;  %v9996_v2 = vld [vmem:[#allocation8 + $0x784] sm:$0xf]  ;;  %v7226_v7 = vor.u32 %v9892_v61, %v7223_v62 }
  0xcd   :  { %3958 = vmatmul.bf16.vlgmr.msra.gmra.mxu0 %v10941_v37  ;;  %3993 = vmatpush.bf16.msra.mxu3 %v7034_v29  ;;  %v339_v46 = vpop.f32.mrf.mxu2  ;;  %v7639_v3 = vld [vmem:[#allocation8 + $0x7a0] sm:$0xf0] }
  0xce   :  { %4006 = vmatpush.bf16.msrb.mxu0 %v7290_v32  ;;  %v363_v51 = vpop.f32.mrf.mxu0  ;;  %v352_v56 = vpop.f32.mrf.mxu3  ;;  %v10060_v6 = vld [vmem:[#allocation8 + $0x984] sm:$0xf]  ;;  %v7642_v17 = vor.u32 %v9996_v2, %v7639_v3 }
  0xcf   :  { %3969 = vmatpush.bf16.msra.mxu1 %v8758_v38  ;;  %3982 = vmatpush.bf16.msra.mxu2 %v6714_v39  ;;  %v364_v57 = vadd.f32 %v10548_v30, %v363_v51  ;;  %v7895_v34 = vld [vmem:[#allocation8 + $0x9a0] sm:$0xf0] }
  0xd0   :  { %v9820_v8 = vld [vmem:[#allocation8 + $0x204] sm:$0xf]  ;;  %v7898_v18 = vor.u32 %v10060_v6, %v7895_v34 }
  0xd1   :  { %v375_v4 = vmax.f32 %v364_v57, 0.0  ;;  %3994 = vmatpush.bf16.msra.mxu3 %v7002_v45  ;;  %v6935_v9 = vld [vmem:[#allocation8 + $0x220] sm:$0xf0] }
  0xd2   :  { %4007 = vmatpush.bf16.msrb.mxu0 %v7258_v52  ;;  %v9884_v10 = vld [vmem:[#allocation8 + $0x404] sm:$0xf]  ;;  %v6938_v23 = vor.u32 %v9820_v8, %v6935_v9 }
  0xd3   :  { %v10945_v14 = vpack.c.bf16 %v375_v4, %v375_v4  ;;  %3970 = vmatpush.bf16.msra.mxu1 %v8726_v58  ;;  %3983 = vmatpush.bf16.msra.mxu2 %v6682_v59  ;;  %v7191_v11 = vld [vmem:[#allocation8 + $0x420] sm:$0xf0] }
  0xd4   :  { %v10132_v13 = vld [vmem:[#allocation8 + $0xbc4] sm:$0xf]  ;;  %v7194_v27 = vor.u32 %v9884_v10, %v7191_v11 }
  0xd5   :  { %v8183_v16 = vld [vmem:[#allocation8 + $0xbe0] sm:$0xf0]  ;;  %3995 = vmatpush.bf16.msra.mxu3 %v6970_v5 }
  0xd6   :  { %v10196_v19 = vld [vmem:[#allocation8 + $0xdc4] sm:$0xf]  ;;  %4008 = vmatpush.bf16.msrb.mxu0 %v7226_v7  ;;  %3971 = vmatmul.bf16.vlgmr.msra.gmra.mxu1 %v10945_v14  ;;  %v8186_v28 = vor.u32 %v10132_v13, %v8183_v16  ;;  %v365_v29 = vpop.f32.mrf.mxu0 }
  0xd7   :  { %4015 = vmatpush.bf16.msrb.mxu1 %v7674_v63  ;;  %4028 = vmatpush.bf16.msrb.mxu2 %v7930_v0  ;;  %v8439_v21 = vld [vmem:[#allocation8 + $0xde0] sm:$0xf0] }
  0xd8   :  { %v9988_v22 = vld [vmem:[#allocation8 + $0x744] sm:$0xf]  ;;  %3984 = vmatmul.bf16.vlgmr.msra.gmra.mxu2 %v10912_v49  ;;  %v8442_v30 = vor.u32 %v10196_v19, %v8439_v21 }
  0xd9   :  { %v7607_v24 = vld [vmem:[#allocation8 + $0x760] sm:$0xf0]  ;;  %3996 = vmatpush.bf16.msra.mxu3 %v6938_v23 }
  0xda   :  { %v10052_v25 = vld [vmem:[#allocation8 + $0x944] sm:$0xf]  ;;  %v7610_v35 = vor.u32 %v9988_v22, %v7607_v24  ;;  %4009 = vmatpush.bf16.msrb.mxu0 %v7194_v27 }
  0xdb   :  { %v7863_v26 = vld [vmem:[#allocation8 + $0x960] sm:$0xf0]  ;;  %4016 = vmatpush.bf16.msrb.mxu1 %v7642_v17  ;;  %4029 = vmatpush.bf16.msrb.mxu2 %v7898_v18 }
  0xdc   :  { %v10124_v32 = vld [vmem:[#allocation8 + $0xb84] sm:$0xf]  ;;  %v7866_v36 = vor.u32 %v10052_v25, %v7863_v26  ;;  %3997 = vmatmul.bf16.vlgmr.msra.gmra.mxu3 %v10915_v54 }
  0xdd   :  { %v8151_v33 = vld [vmem:[#allocation8 + $0xba0] sm:$0xf0]  ;;  %4041 = vmatpush.bf16.msrb.mxu3 %v8186_v28  ;;  %4010 = vmatmul.bf16.vlgmr.msrb.gmra.mxu0 %v10919_v15 }
  0xde   :  { %v10188_v38 = vld [vmem:[#allocation8 + $0xd84] sm:$0xf]  ;;  %v8154_v12 = vor.u32 %v10124_v32, %v8151_v33  ;;  %4054 = vmatpush.bf16.msra.mxu0 %v8442_v30 }
  0xdf   :  { %v8407_v39 = vld [vmem:[#allocation8 + $0xda0] sm:$0xf0]  ;;  %4017 = vmatpush.bf16.msrb.mxu1 %v7610_v35  ;;  %4030 = vmatpush.bf16.msrb.mxu2 %v7866_v36 }
  0xe0   :  { %v9980_v40 = vld [vmem:[#allocation8 + $0x704] sm:$0xf]  ;;  %v8410_v44 = vor.u32 %v10188_v38, %v8407_v39 }
  0xe1   :  { %v7575_v41 = vld [vmem:[#allocation8 + $0x720] sm:$0xf0]  ;;  %4042 = vmatpush.bf16.msrb.mxu3 %v8154_v12 }
  0xe2   :  { %v10044_v42 = vld [vmem:[#allocation8 + $0x904] sm:$0xf]  ;;  %v7578_v47 = vor.u32 %v9980_v40, %v7575_v41  ;;  %4055 = vmatpush.bf16.msra.mxu0 %v8410_v44 }
  0xe3   :  { %v7831_v43 = vld [vmem:[#allocation8 + $0x920] sm:$0xf0] }
  0xe4   :  { %v10116_v45 = vld [vmem:[#allocation8 + $0xb44] sm:$0xf]  ;;  %v7834_v48 = vor.u32 %v10044_v42, %v7831_v43  ;;  %4018 = vmatpush.bf16.msrb.mxu1 %v7578_v47 }
  0xe5   :  { %v8119_v46 = vld [vmem:[#allocation8 + $0xb60] sm:$0xf0] }
  0xe6   :  { %v10180_v50 = vld [vmem:[#allocation8 + $0xd44] sm:$0xf]  ;;  %v8122_v57 = vor.u32 %v10116_v45, %v8119_v46  ;;  %4031 = vmatpush.bf16.msrb.mxu2 %v7834_v48 }
  0xe7   :  { %v8375_v51 = vld [vmem:[#allocation8 + $0xd60] sm:$0xf0] }
  0xe8   :  { %v9972_v52 = vld [vmem:[#allocation8 + $0x6c4] sm:$0xf]  ;;  %v8378_v58 = vor.u32 %v10180_v50, %v8375_v51  ;;  %4043 = vmatpush.bf16.msrb.mxu3 %v8122_v57 }
  0xe9   :  { %v7543_v53 = vld [vmem:[#allocation8 + $0x6e0] sm:$0xf0] }
  0xea   :  { %v10036_v55 = vld [vmem:[#allocation8 + $0x8c4] sm:$0xf]  ;;  %v7546_v62 = vor.u32 %v9972_v52, %v7543_v53  ;;  %4056 = vmatpush.bf16.msra.mxu0 %v8378_v58 }
  0xeb   :  { %v7799_v56 = vld [vmem:[#allocation8 + $0x8e0] sm:$0xf0] }
  0xec   :  { %v10108_v59 = vld [vmem:[#allocation8 + $0xb04] sm:$0xf]  ;;  %v7802_v63 = vor.u32 %v10036_v55, %v7799_v56  ;;  %4019 = vmatpush.bf16.msrb.mxu1 %v7546_v62 }
  0xed   :  { %v8087_v61 = vld [vmem:[#allocation8 + $0xb20] sm:$0xf0] }
  0xee   :  { %v10172_v0 = vld [vmem:[#allocation8 + $0xd04] sm:$0xf]  ;;  %v8090_v34 = vor.u32 %v10108_v59, %v8087_v61  ;;  %4032 = vmatpush.bf16.msrb.mxu2 %v7802_v63  ;;  %v6909_v63 = vld [vmem:[#allocation8 + $0x1c8] sm:$0xf] }
  0xef   :  { %v8343_v2 = vld [vmem:[#allocation8 + $0xd20] sm:$0xf0] }
  0xf0   :  { %v9964_v3 = vld [vmem:[#allocation8 + $0x684] sm:$0xf]  ;;  %v8346_v7 = vor.u32 %v10172_v0, %v8343_v2  ;;  %4044 = vmatpush.bf16.msrb.mxu3 %v8090_v34  ;;  %v9817_v0 = vld [vmem:[#allocation8 + $0x1e4] sm:$0xf0] }
  0xf1   :  { %v7511_v4 = vld [vmem:[#allocation8 + $0x6a0] sm:$0xf0] }
  0xf2   :  { %v10028_v5 = vld [vmem:[#allocation8 + $0x884] sm:$0xf]  ;;  %v7514_v10 = vor.u32 %v9964_v3, %v7511_v4  ;;  %4057 = vmatpush.bf16.msra.mxu0 %v8346_v7  ;;  %v7165_v4 = vld [vmem:[#allocation8 + $0x3c8] sm:$0xf] }
  0xf3   :  { %v7767_v6 = vld [vmem:[#allocation8 + $0x8a0] sm:$0xf0] }
  0xf4   :  { %v10100_v8 = vld [vmem:[#allocation8 + $0xac4] sm:$0xf]  ;;  %v7770_v11 = vor.u32 %v10028_v5, %v7767_v6  ;;  %4020 = vmatpush.bf16.msrb.mxu1 %v7514_v10  ;;  %v9881_v5 = vld [vmem:[#allocation8 + $0x3e4] sm:$0xf0] }
  0xf5   :  { %v8055_v9 = vld [vmem:[#allocation8 + $0xae0] sm:$0xf0] }
  0xf6   :  { %v10164_v13 = vld [vmem:[#allocation8 + $0xcc4] sm:$0xf]  ;;  %v8058_v22 = vor.u32 %v10100_v8, %v8055_v9  ;;  %4033 = vmatpush.bf16.msrb.mxu2 %v7770_v11  ;;  %v6910_v9 = vor.u32 %v9817_v0, %v6909_v63 }
  0xf7   :  { %v8311_v16 = vld [vmem:[#allocation8 + $0xce0] sm:$0xf0] }
  0xf8   :  { %v9956_v17 = vld [vmem:[#allocation8 + $0x644] sm:$0xf]  ;;  %v8314_v23 = vor.u32 %v10164_v13, %v8311_v16  ;;  %4045 = vmatpush.bf16.msrb.mxu3 %v8058_v22  ;;  %v7166_v13 = vor.u32 %v9881_v5, %v7165_v4  ;;  %v6877_v16 = vld [vmem:[#allocation8 + $0x188] sm:$0xf] }
  0xf9   :  { %v7479_v18 = vld [vmem:[#allocation8 + $0x660] sm:$0xf0] }
  0xfa   :  { %v10020_v19 = vld [vmem:[#allocation8 + $0x844] sm:$0xf]  ;;  %v7482_v27 = vor.u32 %v9956_v17, %v7479_v18  ;;  %4058 = vmatpush.bf16.msra.mxu0 %v8314_v23  ;;  %v9809_v17 = vld [vmem:[#allocation8 + $0x1a4] sm:$0xf0] }
  0xfb   :  { %v7735_v21 = vld [vmem:[#allocation8 + $0x860] sm:$0xf0] }
  0xfc   :  { %v10092_v24 = vld [vmem:[#allocation8 + $0xa84] sm:$0xf]  ;;  %v7738_v28 = vor.u32 %v10020_v19, %v7735_v21  ;;  %4021 = vmatpush.bf16.msrb.mxu1 %v7482_v27  ;;  %v7133_v19 = vld [vmem:[#allocation8 + $0x388] sm:$0xf] }
  0xfd   :  { %v8023_v25 = vld [vmem:[#allocation8 + $0xaa0] sm:$0xf0]  ;;  %v9873_v21 = vld [vmem:[#allocation8 + $0x3a4] sm:$0xf0] }
  0xfe   :  { %v10156_v26 = vld [vmem:[#allocation8 + $0xc84] sm:$0xf]  ;;  %v8026_v38 = vor.u32 %v10092_v24, %v8023_v25  ;;  %4034 = vmatpush.bf16.msrb.mxu2 %v7738_v28  ;;  %v6878_v25 = vor.u32 %v9809_v17, %v6877_v16  ;;  %v7134_v28 = vor.u32 %v9873_v21, %v7133_v19  ;;  %v7421_v21 = vld [vmem:[#allocation8 + $0x5c8] sm:$0xf] }
  0xff   :  { %v8279_v29 = vld [vmem:[#allocation8 + $0xca0] sm:$0xf0] }
 0x100   :  { %v9948_v30 = vld [vmem:[#allocation8 + $0x604] sm:$0xf]  ;;  %v8282_v42 = vor.u32 %v10156_v26, %v8279_v29  ;;  %4046 = vmatpush.bf16.msrb.mxu3 %v8026_v38  ;;  %v6845_v29 = vld [vmem:[#allocation8 + $0x148] sm:$0xf] }
 0x101   :  { %v7447_v32 = vld [vmem:[#allocation8 + $0x620] sm:$0xf0] }
 0x102   :  { %v10012_v33 = vld [vmem:[#allocation8 + $0x804] sm:$0xf]  ;;  %v7450_v44 = vor.u32 %v9948_v30, %v7447_v32  ;;  %4059 = vmatpush.bf16.msra.mxu0 %v8282_v42  ;;  %v9801_v30 = vld [vmem:[#allocation8 + $0x164] sm:$0xf0] }
 0x103   :  { %v7703_v35 = vld [vmem:[#allocation8 + $0x820] sm:$0xf0] }
 0x104   :  { %v10260_v36 = vld [vmem:[#allocation8 + $0xfc4] sm:$0xf]  ;;  %v7706_v45 = vor.u32 %v10012_v33, %v7703_v35  ;;  %4022 = vmatpush.bf16.msrb.mxu1 %v7450_v44  ;;  %v7101_v33 = vld [vmem:[#allocation8 + $0x348] sm:$0xf] }
 0x105   :  { %v8695_v39 = vld [vmem:[#allocation8 + $0xfe0] sm:$0xf0]  ;;  %v9865_v35 = vld [vmem:[#allocation8 + $0x364] sm:$0xf0] }
 0x106   :  { %v10324_v40 = vld [vmem:[#allocation8 + $0x11c4] sm:$0xf]  ;;  %v8698_v48 = vor.u32 %v10260_v36, %v8695_v39  ;;  %4035 = vmatpush.bf16.msrb.mxu2 %v7706_v45  ;;  %v9793_v44 = vld [vmem:[#allocation8 + $0x124] sm:$0xf0] }
 0x107   :  { %v8951_v41 = vld [vmem:[#allocation8 + $0x11e0] sm:$0xf0]  ;;  %4023 = vmatmul.bf16.vlgmr.msrb.gmra.mxu1 %v10922_v20 }
 0x108   :  { %v10084_v43 = vld [vmem:[#allocation8 + $0xa44] sm:$0xf]  ;;  %v8954_v50 = vor.u32 %v10324_v40, %v8951_v41  ;;  %4067 = vmatpush.bf16.msra.mxu1 %v8698_v48  ;;  %v6846_v40 = vor.u32 %v9801_v30, %v6845_v29  ;;  %v6973_v29 = vld [vmem:[#allocation8 + $0x248] sm:$0xf] }
 0x109   :  { %v7991_v12 = vld [vmem:[#allocation8 + $0xa60] sm:$0xf0]  ;;  %4036 = vmatmul.bf16.vlgmr.msrb.gmra.mxu2 %v10931_v60  ;;  %v9833_v30 = vld [vmem:[#allocation8 + $0x264] sm:$0xf0] }
 0x10a   :  { %v10148_v46 = vld [vmem:[#allocation8 + $0xc44] sm:$0xf]  ;;  %v7994_v52 = vor.u32 %v10084_v43, %v7991_v12  ;;  %4080 = vmatpush.bf16.msra.mxu2 %v8954_v50  ;;  %v7102_v43 = vor.u32 %v9865_v35, %v7101_v33  ;;  %v6813_v12 = vld [vmem:[#allocation8 + $0x108] sm:$0xf] }
 0x10b   :  { %v8247_v47 = vld [vmem:[#allocation8 + $0xc60] sm:$0xf0]  ;;  %v7389_v35 = vld [vmem:[#allocation8 + $0x588] sm:$0xf] }
 0x10c   :  { %v10252_v51 = vld [vmem:[#allocation8 + $0xf84] sm:$0xf]  ;;  %v8250_v57 = vor.u32 %v10148_v46, %v8247_v47  ;;  %4047 = vmatpush.bf16.msrb.mxu3 %v7994_v52  ;;  %v7069_v46 = vld [vmem:[#allocation8 + $0x308] sm:$0xf]  ;;  %v6814_v52 = vor.u32 %v9793_v44, %v6813_v12 }
 0x10d   :  { %v8663_v53 = vld [vmem:[#allocation8 + $0xfa0] sm:$0xf0]  ;;  %v9857_v47 = vld [vmem:[#allocation8 + $0x324] sm:$0xf0] }
 0x10e   :  { %v10316_v55 = vld [vmem:[#allocation8 + $0x1184] sm:$0xf]  ;;  %v8666_v2 = vor.u32 %v10252_v51, %v8663_v53  ;;  %4060 = vmatpush.bf16.msra.mxu0 %v8250_v57  ;;  %v6781_v57 = vld [vmem:[#allocation8 + $0xc8] sm:$0xf] }
 0x10f   :  { %v8919_v56 = vld [vmem:[#allocation8 + $0x11a0] sm:$0xf0]  ;;  %v9761_v12 = vld [vmem:[#allocation8 + $0x24] sm:$0xf0] }
 0x110   :  { %v10076_v58 = vld [vmem:[#allocation8 + $0xa04] sm:$0xf]  ;;  %v8922_v3 = vor.u32 %v10316_v55, %v8919_v56  ;;  %4068 = vmatpush.bf16.msra.mxu1 %v8666_v2  ;;  %v7070_v56 = vor.u32 %v9857_v47, %v7069_v46  ;;  %v6941_v44 = vld [vmem:[#allocation8 + $0x208] sm:$0xf] }
 0x111   :  { %v7959_v59 = vld [vmem:[#allocation8 + $0xa20] sm:$0xf0]  ;;  %v7933_v46 = vld [vmem:[#allocation8 + $0x9c8] sm:$0xf] }
 0x112   :  { %v10140_v61 = vld [vmem:[#allocation8 + $0xc04] sm:$0xf]  ;;  %v7962_v6 = vor.u32 %v10076_v58, %v7959_v59  ;;  %4081 = vmatpush.bf16.msra.mxu2 %v8922_v3  ;;  %v9785_v58 = vld [vmem:[#allocation8 + $0xe4] sm:$0xf0] }
 0x113   :  { %v8215_v62 = vld [vmem:[#allocation8 + $0xc20] sm:$0xf0]  ;;  %v6782_v3 = vor.u32 %v9785_v58, %v6781_v57  ;;  %v10073_v47 = vld [vmem:[#allocation8 + $0x9e4] sm:$0xf0] }
 0x114   :  { %v10244_v34 = vld [vmem:[#allocation8 + $0xf44] sm:$0xf]  ;;  %v8218_v8 = vor.u32 %v10140_v61, %v8215_v62  ;;  %4048 = vmatpush.bf16.msrb.mxu3 %v7962_v6  ;;  %v7037_v61 = vld [vmem:[#allocation8 + $0x2c8] sm:$0xf]  ;;  %v7934_v58 = vor.u32 %v10073_v47, %v7933_v46 }
 0x115   :  { %v8631_v7 = vld [vmem:[#allocation8 + $0xf60] sm:$0xf0]  ;;  %v9849_v62 = vld [vmem:[#allocation8 + $0x2e4] sm:$0xf0] }
 0x116   :  { %v10308_v10 = vld [vmem:[#allocation8 + $0x1144] sm:$0xf]  ;;  %v8634_v18 = vor.u32 %v10244_v34, %v8631_v7  ;;  %4061 = vmatpush.bf16.msra.mxu0 %v8218_v8  ;;  %v7038_v6 = vor.u32 %v9849_v62, %v7037_v61  ;;  %v6749_v34 = vld [vmem:[#allocation8 + $0x88] sm:$0xf] }
 0x117   :  { %v8887_v11 = vld [vmem:[#allocation8 + $0x1160] sm:$0xf0]  ;;  %4049 = vmatmul.bf16.vlgmr.msrb.gmra.mxu3 %v10933_v1  ;;  %v9777_v7 = vld [vmem:[#allocation8 + $0xa4] sm:$0xf0] }
 0x118   :  { %v8890_v22 = vor.u32 %v10308_v10, %v8887_v11  ;;  %v10236_v23 = vld [vmem:[#allocation8 + $0xf04] sm:$0xf]  ;;  %4093 = vmatpush.bf16.msra.mxu3 %v6910_v9  ;;  %4069 = vmatpush.bf16.msra.mxu1 %v8634_v18  ;;  %v7005_v9 = vld [vmem:[#allocation8 + $0x288] sm:$0xf]  ;;  %v6750_v19 = vor.u32 %v9777_v7, %v6749_v34 }
 0x119   :  { %v8599_v24 = vld [vmem:[#allocation8 + $0xf20] sm:$0xf0]  ;;  %4062 = vmatmul.bf16.vlgmr.msra.gmra.mxu0 %v10939_v31  ;;  %v9841_v10 = vld [vmem:[#allocation8 + $0x2a4] sm:$0xf0] }
 0x11a   :  { %v10300_v26 = vld [vmem:[#allocation8 + $0x1104] sm:$0xf]  ;;  %4106 = vmatpush.bf16.msrb.mxu0 %v7166_v13  ;;  %v8602_v32 = vor.u32 %v10236_v23, %v8599_v24  ;;  %4082 = vmatpush.bf16.msra.mxu2 %v8890_v22  ;;  %v9945_v22 = vld [vmem:[#allocation8 + $0x5e4] sm:$0xf0]  ;;  %v7006_v24 = vor.u32 %v9841_v10, %v7005_v9 }
 0x11b   :  { %v8855_v27 = vld [vmem:[#allocation8 + $0x1120] sm:$0xf0]  ;;  %v7677_v23 = vld [vmem:[#allocation8 + $0x7c8] sm:$0xf]  ;;  %v7422_v33 = vor.u32 %v9945_v22, %v7421_v21 }
 0x11c   :  { %v8858_v36 = vor.u32 %v10300_v26, %v8855_v27  ;;  %v10228_v38 = vld [vmem:[#allocation8 + $0xec4] sm:$0xf]  ;;  %4094 = vmatpush.bf16.msra.mxu3 %v6878_v25  ;;  %4070 = vmatpush.bf16.msra.mxu1 %v8602_v32  ;;  %v10009_v25 = vld [vmem:[#allocation8 + $0x7e4] sm:$0xf0] }
 0x11d   :  { %v8567_v39 = vld [vmem:[#allocation8 + $0xee0] sm:$0xf0]  ;;  %v6717_v26 = vld [vmem:[#allocation8 + $0x48] sm:$0xf] }
 0x11e   :  { %v10292_v41 = vld [vmem:[#allocation8 + $0x10c4] sm:$0xf]  ;;  %4107 = vmatpush.bf16.msrb.mxu0 %v7134_v28  ;;  %v8570_v45 = vor.u32 %v10228_v38, %v8567_v39  ;;  %4083 = vmatpush.bf16.msra.mxu2 %v8858_v36  ;;  %v9769_v27 = vld [vmem:[#allocation8 + $0x64] sm:$0xf0]  ;;  %v7678_v36 = vor.u32 %v10009_v25, %v7677_v23 }
 0x11f   :  { %v8823_v42 = vld [vmem:[#allocation8 + $0x10e0] sm:$0xf0]  ;;  %v6718_v38 = vor.u32 %v9769_v27, %v6717_v26  ;;  %v9937_v39 = vld [vmem:[#allocation8 + $0x5a4] sm:$0xf0] }
 0x120   :  { %v8826_v48 = vor.u32 %v10292_v41, %v8823_v42  ;;  %v10220_v50 = vld [vmem:[#allocation8 + $0xe84] sm:$0xf]  ;;  %4095 = vmatpush.bf16.msra.mxu3 %v6846_v40  ;;  %4071 = vmatpush.bf16.msra.mxu1 %v8570_v45  ;;  %v7645_v40 = vld [vmem:[#allocation8 + $0x788] sm:$0xf]  ;;  %v6974_v42 = vor.u32 %v9833_v30, %v6973_v29 }
 0x121   :  { %v8535_v51 = vld [vmem:[#allocation8 + $0xea0] sm:$0xf0]  ;;  %v10001_v41 = vld [vmem:[#allocation8 + $0x7a4] sm:$0xf0] }
 0x122   :  { %v10284_v53 = vld [vmem:[#allocation8 + $0x1084] sm:$0xf]  ;;  %4108 = vmatpush.bf16.msrb.mxu0 %v7102_v43  ;;  %v8538_v59 = vor.u32 %v10220_v50, %v8535_v51  ;;  %4084 = vmatpush.bf16.msra.mxu2 %v8826_v48  ;;  %v6685_v43 = vld [vmem:[#allocation8 + $0x8] sm:$0xf]  ;;  %v7390_v48 = vor.u32 %v9937_v39, %v7389_v35 }
 0x123   :  { %v8791_v55 = vld [vmem:[#allocation8 + $0x10a0] sm:$0xf0]  ;;  %v9825_v45 = vld [vmem:[#allocation8 + $0x224] sm:$0xf0] }
 0x124   :  { %v8794_v63 = vor.u32 %v10284_v53, %v8791_v55  ;;  %v10212_v0 = vld [vmem:[#allocation8 + $0xe44] sm:$0xf]  ;;  %4096 = vmatpush.bf16.msra.mxu3 %v6814_v52  ;;  %4072 = vmatpush.bf16.msra.mxu1 %v8538_v59  ;;  %v8189_v50 = vld [vmem:[#allocation8 + $0xbc8] sm:$0xf]  ;;  %v7646_v52 = vor.u32 %v10001_v41, %v7645_v40  ;;  %v6686_v53 = vor.u32 %v9761_v12, %v6685_v43 }
 0x125   :  { %v8503_v2 = vld [vmem:[#allocation8 + $0xe60] sm:$0xf0]  ;;  %v10137_v51 = vld [vmem:[#allocation8 + $0xbe4] sm:$0xf0]  ;;  %v6942_v57 = vor.u32 %v9825_v45, %v6941_v44 }
 0x126   :  { %v10276_v4 = vld [vmem:[#allocation8 + $0x1044] sm:$0xf]  ;;  %4109 = vmatpush.bf16.msrb.mxu0 %v7070_v56  ;;  %v8506_v8 = vor.u32 %v10212_v0, %v8503_v2  ;;  %4085 = vmatpush.bf16.msra.mxu2 %v8794_v63  ;;  %v7357_v55 = vld [vmem:[#allocation8 + $0x548] sm:$0xf]  ;;  %v8190_v62 = vor.u32 %v10137_v51, %v8189_v50 }
 0x127   :  { %v8759_v5 = vld [vmem:[#allocation8 + $0x1060] sm:$0xf0]  ;;  %v9929_v56 = vld [vmem:[#allocation8 + $0x564] sm:$0xf0] }
 0x128   :  { %v10204_v11 = vld [vmem:[#allocation8 + $0xe04] sm:$0xf]  ;;  %v8762_v13 = vor.u32 %v10276_v4, %v8759_v5  ;;  %4097 = vmatpush.bf16.msra.mxu3 %v6782_v3  ;;  %4073 = vmatpush.bf16.msra.mxu1 %v8506_v8  ;;  %v7613_v59 = vld [vmem:[#allocation8 + $0x748] sm:$0xf]  ;;  %v7358_v2 = vor.u32 %v9929_v56, %v7357_v55 }
 0x129   :  { %v8471_v16 = vld [vmem:[#allocation8 + $0xe20] sm:$0xf0]  ;;  %v9993_v61 = vld [vmem:[#allocation8 + $0x764] sm:$0xf0] }
 0x12a   :  { %v10268_v17 = vld [vmem:[#allocation8 + $0x1004] sm:$0xf]  ;;  %4110 = vmatpush.bf16.msrb.mxu0 %v7038_v6  ;;  %v8474_v28 = vor.u32 %v10204_v11, %v8471_v16  ;;  %4086 = vmatpush.bf16.msra.mxu2 %v8762_v13  ;;  %v7901_v63 = vld [vmem:[#allocation8 + $0x988] sm:$0xf]  ;;  %v7614_v5 = vor.u32 %v9993_v61, %v7613_v59 }
 0x12b   :  { %v8727_v18 = vld [vmem:[#allocation8 + $0x1020] sm:$0xf0]  ;;  %v10065_v0 = vld [vmem:[#allocation8 + $0x9a4] sm:$0xf0] }
 0x12c   :  { %v8730_v32 = vor.u32 %v10268_v17, %v8727_v18  ;;  %4098 = vmatpush.bf16.msra.mxu3 %v6750_v19  ;;  %4074 = vmatpush.bf16.msra.mxu1 %v8474_v28  ;;  %v8157_v3 = vld [vmem:[#allocation8 + $0xb88] sm:$0xf]  ;;  %v7902_v7 = vor.u32 %v10065_v0, %v7901_v63 }
 0x12d   :  { %v10129_v4 = vld [vmem:[#allocation8 + $0xba4] sm:$0xf0] }
 0x12e   :  { %4111 = vmatpush.bf16.msrb.mxu0 %v7006_v24  ;;  %4087 = vmatpush.bf16.msra.mxu2 %v8730_v32  ;;  %v7325_v6 = vld [vmem:[#allocation8 + $0x508] sm:$0xf]  ;;  %v8158_v10 = vor.u32 %v10129_v4, %v8157_v3 }
 0x12f   :  { %4075 = vmatmul.bf16.vlgmr.msra.gmra.mxu1 %v10941_v37  ;;  %v9921_v34 = vld [vmem:[#allocation8 + $0x524] sm:$0xf0] }
 0x130   :  { %4119 = vmatpush.bf16.msrb.mxu1 %v7422_v33  ;;  %4099 = vmatpush.bf16.msra.mxu3 %v6718_v38  ;;  %v7581_v8 = vld [vmem:[#allocation8 + $0x708] sm:$0xf]  ;;  %v7326_v16 = vor.u32 %v9921_v34, %v7325_v6 }
 0x131   :  { %4088 = vmatmul.bf16.vlgmr.msra.gmra.mxu2 %v10945_v14  ;;  %v9985_v9 = vld [vmem:[#allocation8 + $0x724] sm:$0xf0] }
 0x132   :  { %4132 = vmatpush.bf16.msrb.mxu2 %v7678_v36  ;;  %4112 = vmatpush.bf16.msrb.mxu0 %v6974_v42  ;;  %v7869_v11 = vld [vmem:[#allocation8 + $0x948] sm:$0xf]  ;;  %v7582_v19 = vor.u32 %v9985_v9, %v7581_v8 }
 0x133   :  { %v10057_v13 = vld [vmem:[#allocation8 + $0x964] sm:$0xf0] }
 0x134   :  { %4120 = vmatpush.bf16.msrb.mxu1 %v7390_v48  ;;  %4100 = vmatpush.bf16.msra.mxu3 %v6686_v53  ;;  %v8125_v17 = vld [vmem:[#allocation8 + $0xb48] sm:$0xf]  ;;  %v7870_v23 = vor.u32 %v10057_v13, %v7869_v11 }
 0x135   :  { %v10121_v18 = vld [vmem:[#allocation8 + $0xb64] sm:$0xf0] }
 0x136   :  { %4133 = vmatpush.bf16.msrb.mxu2 %v7646_v52  ;;  %4113 = vmatpush.bf16.msrb.mxu0 %v6942_v57  ;;  %v7293_v21 = vld [vmem:[#allocation8 + $0x4c8] sm:$0xf]  ;;  %v8126_v26 = vor.u32 %v10121_v18, %v8125_v17 }
 0x137   :  { %4101 = vmatmul.bf16.vlgmr.msra.gmra.mxu3 %v10912_v49  ;;  %v9913_v22 = vld [vmem:[#allocation8 + $0x4e4] sm:$0xf0] }
 0x138   :  { %4145 = vmatpush.bf16.msrb.mxu3 %v7934_v58  ;;  %4121 = vmatpush.bf16.msrb.mxu1 %v7358_v2  ;;  %v7549_v24 = vld [vmem:[#allocation8 + $0x6c8] sm:$0xf]  ;;  %v7294_v29 = vor.u32 %v9913_v22, %v7293_v21 }
 0x139   :  { %4114 = vmatmul.bf16.vlgmr.msrb.gmra.mxu0 %v10915_v54  ;;  %v9977_v25 = vld [vmem:[#allocation8 + $0x6e4] sm:$0xf0] }
 0x13a   :  { %4158 = vmatpush.bf16.msra.mxu0 %v8190_v62  ;;  %4134 = vmatpush.bf16.msrb.mxu2 %v7614_v5  ;;  %v7837_v27 = vld [vmem:[#allocation8 + $0x908] sm:$0xf]  ;;  %v7550_v33 = vor.u32 %v9977_v25, %v7549_v24 }
 0x13b   :  { %v10049_v28 = vld [vmem:[#allocation8 + $0x924] sm:$0xf0] }
 0x13c   :  { %4146 = vmatpush.bf16.msrb.mxu3 %v7902_v7  ;;  %4122 = vmatpush.bf16.msrb.mxu1 %v7326_v16  ;;  %v8093_v30 = vld [vmem:[#allocation8 + $0xb08] sm:$0xf]  ;;  %v7838_v38 = vor.u32 %v10049_v28, %v7837_v27 }
 0x13d   :  { %v10113_v32 = vld [vmem:[#allocation8 + $0xb24] sm:$0xf0] }
 0x13e   :  { %4159 = vmatpush.bf16.msra.mxu0 %v8158_v10  ;;  %4135 = vmatpush.bf16.msrb.mxu2 %v7582_v19  ;;  %v7261_v35 = vld [vmem:[#allocation8 + $0x488] sm:$0xf]  ;;  %v8094_v41 = vor.u32 %v10113_v32, %v8093_v30 }
 0x13f   :  { %v9905_v36 = vld [vmem:[#allocation8 + $0x4a4] sm:$0xf0] }
 0x140   :  { %4147 = vmatpush.bf16.msrb.mxu3 %v7870_v23  ;;  %v7517_v39 = vld [vmem:[#allocation8 + $0x688] sm:$0xf]  ;;  %4123 = vmatpush.bf16.msrb.mxu1 %v7294_v29  ;;  %v7262_v12 = vor.u32 %v9905_v36, %v7261_v35  ;;  %v9813_v35 = vld [vmem:[#allocation8 + $0x1cc] sm:$0xf] }
 0x141   :  { %v9969_v40 = vld [vmem:[#allocation8 + $0x6a4] sm:$0xf0]  ;;  %v6911_v36 = vld [vmem:[#allocation8 + $0x1e8] sm:$0xf0] }
 0x142   :  { %4160 = vmatpush.bf16.msra.mxu0 %v8126_v26  ;;  %v7805_v42 = vld [vmem:[#allocation8 + $0x8c8] sm:$0xf]  ;;  %4136 = vmatpush.bf16.msrb.mxu2 %v7550_v33  ;;  %v7518_v46 = vor.u32 %v9969_v40, %v7517_v39 }
 0x143   :  { %v10041_v43 = vld [vmem:[#allocation8 + $0x8e4] sm:$0xf0] }
 0x144   :  { %v8061_v44 = vld [vmem:[#allocation8 + $0xac8] sm:$0xf]  ;;  %4148 = vmatpush.bf16.msrb.mxu3 %v7838_v38  ;;  %v7806_v50 = vor.u32 %v10041_v43, %v7805_v42  ;;  %4124 = vmatpush.bf16.msrb.mxu1 %v7262_v12 }
 0x145   :  { %v10105_v45 = vld [vmem:[#allocation8 + $0xae4] sm:$0xf0] }
 0x146   :  { %v7229_v47 = vld [vmem:[#allocation8 + $0x448] sm:$0xf]  ;;  %4161 = vmatpush.bf16.msra.mxu0 %v8094_v41  ;;  %v8062_v53 = vor.u32 %v10105_v45, %v8061_v44  ;;  %4137 = vmatpush.bf16.msrb.mxu2 %v7518_v46  ;;  %v6914_v45 = vor.u32 %v9813_v35, %v6911_v36 }
 0x147   :  { %v9897_v48 = vld [vmem:[#allocation8 + $0x464] sm:$0xf0] }
 0x148   :  { %v7485_v51 = vld [vmem:[#allocation8 + $0x648] sm:$0xf]  ;;  %v7230_v57 = vor.u32 %v9897_v48, %v7229_v47  ;;  %4149 = vmatpush.bf16.msrb.mxu3 %v7806_v50  ;;  %v10961_v50 = vld [vmem:[#allocation11] sm:$0xff] }
 0x149   :  { %v9961_v52 = vld [vmem:[#allocation8 + $0x664] sm:$0xf0] }
 0x14a   :  { %v7773_v55 = vld [vmem:[#allocation8 + $0x888] sm:$0xf]  ;;  %v7486_v62 = vor.u32 %v9961_v52, %v7485_v51  ;;  %4162 = vmatpush.bf16.msra.mxu0 %v8062_v53  ;;  %4125 = vmatpush.bf16.msrb.mxu1 %v7230_v57  ;;  %v9805_v51 = vld [vmem:[#allocation8 + $0x18c] sm:$0xf] }
 0x14b   :  { %v10033_v56 = vld [vmem:[#allocation8 + $0x8a4] sm:$0xf0]  ;;  %v6879_v52 = vld [vmem:[#allocation8 + $0x1a8] sm:$0xf0] }
 0x14c   :  { %v8029_v58 = vld [vmem:[#allocation8 + $0xa88] sm:$0xf]  ;;  %v7774_v3 = vor.u32 %v10033_v56, %v7773_v55  ;;  %4138 = vmatpush.bf16.msrb.mxu2 %v7486_v62  ;;  %v3868_v62 = vpop.f32.mrf.mxu1 }
 0x14d   :  { %v10097_v59 = vld [vmem:[#allocation8 + $0xaa4] sm:$0xf0] }
 0x14e   :  { %v7197_v61 = vld [vmem:[#allocation8 + $0x408] sm:$0xf]  ;;  %v8030_v34 = vor.u32 %v10097_v59, %v8029_v58  ;;  %4150 = vmatpush.bf16.msrb.mxu3 %v7774_v3 }
 0x14f   :  { %v9889_v63 = vld [vmem:[#allocation8 + $0x424] sm:$0xf0] }
 0x150   :  { %v7453_v0 = vld [vmem:[#allocation8 + $0x608] sm:$0xf]  ;;  %v7198_v10 = vor.u32 %v9889_v63, %v7197_v61  ;;  %4163 = vmatpush.bf16.msra.mxu0 %v8030_v34  ;;  %v963_v61 = vperm.slane %v10961_v50, 0  ;;  %v6882_v63 = vor.u32 %v9805_v51, %v6879_v52  ;;  %v3894_v51 = vpop.f32.mrf.mxu3 }
 0x151   :  { %v9953_v2 = vld [vmem:[#allocation8 + $0x624] sm:$0xf0] }
 0x152   :  { %v8445_v4 = vld [vmem:[#allocation8 + $0xdc8] sm:$0xf]  ;;  %v7454_v16 = vor.u32 %v9953_v2, %v7453_v0  ;;  %4126 = vmatpush.bf16.msrb.mxu1 %v7198_v10 }
 0x153   :  { %v10201_v5 = vld [vmem:[#allocation8 + $0xde4] sm:$0xf0] }
 0x154   :  { %v8701_v6 = vld [vmem:[#allocation8 + $0xfc8] sm:$0xf]  ;;  %v8446_v17 = vor.u32 %v10201_v5, %v8445_v4  ;;  %4139 = vmatpush.bf16.msrb.mxu2 %v7454_v16  ;;  %v9797_v4 = vld [vmem:[#allocation8 + $0x14c] sm:$0xf] }
 0x155   :  { %v10265_v7 = vld [vmem:[#allocation8 + $0xfe4] sm:$0xf0]  ;;  %4127 = vmatmul.bf16.vlgmr.msrb.gmra.mxu1 %v10919_v15  ;;  %v6847_v5 = vld [vmem:[#allocation8 + $0x168] sm:$0xf0] }
 0x156   :  { %v7741_v8 = vld [vmem:[#allocation8 + $0x848] sm:$0xf]  ;;  %v8702_v19 = vor.u32 %v10265_v7, %v8701_v6  ;;  %4171 = vmatpush.bf16.msra.mxu1 %v8446_v17 }
 0x157   :  { %v10025_v9 = vld [vmem:[#allocation8 + $0x864] sm:$0xf0]  ;;  %4140 = vmatmul.bf16.vlgmr.msrb.gmra.mxu2 %v10922_v20 }
 0x158   :  { %v7997_v11 = vld [vmem:[#allocation8 + $0xa48] sm:$0xf]  ;;  %v7742_v21 = vor.u32 %v10025_v9, %v7741_v8  ;;  %4184 = vmatpush.bf16.msra.mxu2 %v8702_v19  ;;  %v9789_v19 = vld [vmem:[#allocation8 + $0x10c] sm:$0xf] }
 0x159   :  { %v10089_v13 = vld [vmem:[#allocation8 + $0xa64] sm:$0xf0] }
 0x15a   :  { %v8413_v18 = vld [vmem:[#allocation8 + $0xd88] sm:$0xf]  ;;  %v7998_v25 = vor.u32 %v10089_v13, %v7997_v11  ;;  %4151 = vmatpush.bf16.msrb.mxu3 %v7742_v21  ;;  %v3869_v11 = vadd.f32 %v3868_v62, %v963_v61  ;;  %v6850_v13 = vor.u32 %v9797_v4, %v6847_v5  ;;  %v6815_v21 = vld [vmem:[#allocation8 + $0x128] sm:$0xf0] }
 0x15b   :  { %v10193_v22 = vld [vmem:[#allocation8 + $0xda4] sm:$0xf0]  ;;  %v9941_v4 = vld [vmem:[#allocation8 + $0x5cc] sm:$0xf] }
 0x15c   :  { %v8669_v23 = vld [vmem:[#allocation8 + $0xf88] sm:$0xf]  ;;  %v8414_v33 = vor.u32 %v10193_v22, %v8413_v18  ;;  %4164 = vmatpush.bf16.msra.mxu0 %v7998_v25  ;;  %v3881_v25 = vpop.f32.mrf.mxu2 }
 0x15d   :  { %v10257_v24 = vld [vmem:[#allocation8 + $0xfa4] sm:$0xf0] }
 0x15e   :  { %v7709_v26 = vld [vmem:[#allocation8 + $0x808] sm:$0xf]  ;;  %v8670_v38 = vor.u32 %v10257_v24, %v8669_v23  ;;  %4172 = vmatpush.bf16.msra.mxu1 %v8414_v33  ;;  %v6818_v33 = vor.u32 %v9789_v19, %v6815_v21  ;;  %v9869_v21 = vld [vmem:[#allocation8 + $0x38c] sm:$0xf] }
 0x15f   :  { %v10017_v27 = vld [vmem:[#allocation8 + $0x824] sm:$0xf0] }
 0x160   :  { %v7965_v28 = vld [vmem:[#allocation8 + $0xa08] sm:$0xf]  ;;  %v7710_v39 = vor.u32 %v10017_v27, %v7709_v26  ;;  %4185 = vmatpush.bf16.msra.mxu2 %v8670_v38 }
 0x161   :  { %v10081_v29 = vld [vmem:[#allocation8 + $0xa24] sm:$0xf0] }
 0x162   :  { %v8957_v30 = vld [vmem:[#allocation8 + $0x11c8] sm:$0xf]  ;;  %v7966_v42 = vor.u32 %v10081_v29, %v7965_v28  ;;  %4152 = vmatpush.bf16.msrb.mxu3 %v7710_v39  ;;  %v3882_v29 = vadd.f32 %v3881_v25, %v3869_v11  ;;  %v9781_v39 = vld [vmem:[#allocation8 + $0xcc] sm:$0xf] }
 0x163   :  { %v10329_v32 = vld [vmem:[#allocation8 + $0x11e4] sm:$0xf0]  ;;  %v9933_v25 = vld [vmem:[#allocation8 + $0x58c] sm:$0xf] }
 0x164   :  { %v8381_v40 = vld [vmem:[#allocation8 + $0xd48] sm:$0xf]  ;;  %v8958_v43 = vor.u32 %v10329_v32, %v8957_v30  ;;  %4165 = vmatpush.bf16.msra.mxu0 %v7966_v42  ;;  %v3907_v30 = vpop.f32.mrf.mxu0  ;;  %v3870_v32 = vpop.f32.mrf.mxu1 }
 0x165   :  { %v10185_v41 = vld [vmem:[#allocation8 + $0xd64] sm:$0xf0]  ;;  %4153 = vmatmul.bf16.vlgmr.msrb.gmra.mxu3 %v10931_v60  ;;  %v3896_v32 = vpop.f32.mrf.mxu3 }
 0x166   :  { %v8637_v12 = vld [vmem:[#allocation8 + $0xf48] sm:$0xf]  ;;  %v8382_v48 = vor.u32 %v10185_v41, %v8381_v40  ;;  %4197 = vmatpush.bf16.msra.mxu3 %v8958_v43  ;;  %v6783_v40 = vld [vmem:[#allocation8 + $0xe8] sm:$0xf0] }
 0x167   :  { %v10249_v44 = vld [vmem:[#allocation8 + $0xf64] sm:$0xf0]  ;;  %4166 = vmatmul.bf16.vlgmr.msra.gmra.mxu0 %v10933_v1  ;;  %v10045_v32 = vld [vmem:[#allocation8 + $0x90c] sm:$0xf] }
 0x168   :  { %v8925_v46 = vld [vmem:[#allocation8 + $0x1188] sm:$0xf]  ;;  %v8638_v53 = vor.u32 %v10249_v44, %v8637_v12  ;;  %4210 = vmatpush.bf16.msrb.mxu0 %v6914_v45  ;;  %4173 = vmatpush.bf16.msra.mxu1 %v8382_v48 }
 0x169   :  { %v10321_v47 = vld [vmem:[#allocation8 + $0x11a4] sm:$0xf0] }
 0x16a   :  { %v8349_v55 = vld [vmem:[#allocation8 + $0xd08] sm:$0xf]  ;;  %v8926_v57 = vor.u32 %v10321_v47, %v8925_v46  ;;  %4186 = vmatpush.bf16.msra.mxu2 %v8638_v53  ;;  %v6786_v46 = vor.u32 %v9781_v39, %v6783_v40  ;;  %v9773_v53 = vld [vmem:[#allocation8 + $0x8c] sm:$0xf] }
 0x16b   :  { %v10177_v56 = vld [vmem:[#allocation8 + $0xd24] sm:$0xf0]  ;;  %v10069_v39 = vld [vmem:[#allocation8 + $0x9cc] sm:$0xf] }
 0x16c   :  { %v8605_v58 = vld [vmem:[#allocation8 + $0xf08] sm:$0xf]  ;;  %v8350_v3 = vor.u32 %v10177_v56, %v8349_v55  ;;  %4198 = vmatpush.bf16.msra.mxu3 %v8926_v57  ;;  %4211 = vmatpush.bf16.msrb.mxu0 %v6882_v63  ;;  %v6751_v55 = vld [vmem:[#allocation8 + $0xa8] sm:$0xf0]  ;;  %v3895_v57 = vadd.f32 %v3894_v51, %v3882_v29  ;;  %v3883_v63 = vpop.f32.mrf.mxu2  ;;  %v3909_v5 = vpop.f32.mrf.mxu0 }
 0x16d   :  { %v10241_v59 = vld [vmem:[#allocation8 + $0xf24] sm:$0xf0]  ;;  %v7935_v40 = vld [vmem:[#allocation8 + $0x9e8] sm:$0xf0]  ;;  %v3946_v5 = vpop.f32.mrf.mxu3 }
 0x16e   :  { %v8893_v0 = vld [vmem:[#allocation8 + $0x1148] sm:$0xf]  ;;  %v8606_v6 = vor.u32 %v10241_v59, %v8605_v58  ;;  %4174 = vmatpush.bf16.msra.mxu1 %v8350_v3  ;;  %v7167_v3 = vld [vmem:[#allocation8 + $0x3e8] sm:$0xf0] }
 0x16f   :  { %v10313_v2 = vld [vmem:[#allocation8 + $0x1164] sm:$0xf0]  ;;  %v9853_v63 = vld [vmem:[#allocation8 + $0x30c] sm:$0xf] }
 0x170   :  { %v8317_v34 = vld [vmem:[#allocation8 + $0xcc8] sm:$0xf]  ;;  %v8894_v8 = vor.u32 %v10313_v2, %v8893_v0  ;;  %4187 = vmatpush.bf16.msra.mxu2 %v8606_v6  ;;  %4212 = vmatpush.bf16.msrb.mxu0 %v6850_v13  ;;  %v9877_v2 = vld [vmem:[#allocation8 + $0x3cc] sm:$0xf]  ;;  %v3908_v6 = vadd.f32 %v3907_v30, %v3895_v57 }
 0x171   :  { %v10169_v7 = vld [vmem:[#allocation8 + $0xce4] sm:$0xf0]  ;;  %v9765_v13 = vld [vmem:[#allocation8 + $0x4c] sm:$0xf]  ;;  %v7170_v19 = vor.u32 %v9877_v2, %v7167_v3 }
 0x172   :  { %v8573_v9 = vld [vmem:[#allocation8 + $0xec8] sm:$0xf]  ;;  %v8318_v18 = vor.u32 %v10169_v7, %v8317_v34  ;;  %4199 = vmatpush.bf16.msra.mxu3 %v8894_v8  ;;  %v3920_v34 = vpop.f32.mrf.mxu1  ;;  %v6754_v7 = vor.u32 %v9773_v53, %v6751_v55  ;;  %v7423_v8 = vld [vmem:[#allocation8 + $0x5e8] sm:$0xf0]  ;;  %v7938_v55 = vor.u32 %v10069_v39, %v7935_v40 }
 0x173   :  { %v10233_v10 = vld [vmem:[#allocation8 + $0xee4] sm:$0xf0]  ;;  %v9757_v30 = vld [vmem:[#allocation8 + $0xc] sm:$0xf] }
 0x174   :  { %v8861_v16 = vld [vmem:[#allocation8 + $0x1108] sm:$0xf]  ;;  %v8574_v22 = vor.u32 %v10233_v10, %v8573_v9  ;;  %4175 = vmatpush.bf16.msra.mxu1 %v8318_v18  ;;  %4213 = vmatpush.bf16.msrb.mxu0 %v6818_v33  ;;  %v6687_v33 = vld [vmem:[#allocation8 + $0x28] sm:$0xf0] }
 0x175   :  { %v10305_v17 = vld [vmem:[#allocation8 + $0x1124] sm:$0xf0]  ;;  %v7359_v53 = vld [vmem:[#allocation8 + $0x568] sm:$0xf0] }
 0x176   :  { %v8285_v23 = vld [vmem:[#allocation8 + $0xc88] sm:$0xf]  ;;  %v8862_v26 = vor.u32 %v10305_v17, %v8861_v16  ;;  %4188 = vmatpush.bf16.msra.mxu2 %v8574_v22  ;;  %v6719_v16 = vld [vmem:[#allocation8 + $0x68] sm:$0xf0]  ;;  %v3921_v17 = vadd.f32 %v3920_v34, %v3908_v6  ;;  %v7426_v22 = vor.u32 %v9941_v4, %v7423_v8 }
 0x177   :  { %v10161_v24 = vld [vmem:[#allocation8 + $0xca4] sm:$0xf0]  ;;  %v7647_v57 = vld [vmem:[#allocation8 + $0x7a8] sm:$0xf0] }
 0x178   :  { %v8541_v27 = vld [vmem:[#allocation8 + $0xe88] sm:$0xf]  ;;  %v8286_v38 = vor.u32 %v10161_v24, %v8285_v23  ;;  %4200 = vmatpush.bf16.msra.mxu3 %v8862_v26  ;;  %4214 = vmatpush.bf16.msrb.mxu0 %v6786_v46  ;;  %v7135_v24 = vld [vmem:[#allocation8 + $0x3a8] sm:$0xf0]  ;;  %v3959_v46 = vpop.f32.mrf.mxu0 }
 0x179   :  { %v10225_v28 = vld [vmem:[#allocation8 + $0xea4] sm:$0xf0]  ;;  %v7391_v26 = vld [vmem:[#allocation8 + $0x5a8] sm:$0xf0] }
 0x17a   :  { %v8829_v35 = vld [vmem:[#allocation8 + $0x10c8] sm:$0xf]  ;;  %v8542_v41 = vor.u32 %v10225_v28, %v8541_v27  ;;  %4176 = vmatpush.bf16.msra.mxu1 %v8286_v38  ;;  %v6722_v27 = vor.u32 %v9765_v13, %v6719_v16  ;;  %v7138_v38 = vor.u32 %v9869_v21, %v7135_v24  ;;  %v9917_v3 = vld [vmem:[#allocation8 + $0x50c] sm:$0xf] }
 0x17b   :  { %v10297_v36 = vld [vmem:[#allocation8 + $0x10e4] sm:$0xf0]  ;;  %v7327_v4 = vld [vmem:[#allocation8 + $0x528] sm:$0xf0] }
 0x17c   :  { %v8253_v42 = vld [vmem:[#allocation8 + $0xc48] sm:$0xf]  ;;  %v8830_v12 = vor.u32 %v10297_v36, %v8829_v35  ;;  %4189 = vmatpush.bf16.msra.mxu2 %v8542_v41  ;;  %4215 = vmatpush.bf16.msrb.mxu0 %v6754_v7  ;;  %v10005_v35 = vld [vmem:[#allocation8 + $0x7cc] sm:$0xf]  ;;  %v3933_v41 = vpop.f32.mrf.mxu2  ;;  %v7330_v16 = vor.u32 %v9917_v3, %v7327_v4 }
 0x17d   :  { %v10153_v43 = vld [vmem:[#allocation8 + $0xc64] sm:$0xf0]  ;;  %v7679_v36 = vld [vmem:[#allocation8 + $0x7e8] sm:$0xf0] }
 0x17e   :  { %v8509_v44 = vld [vmem:[#allocation8 + $0xe48] sm:$0xf]  ;;  %v8254_v52 = vor.u32 %v10153_v43, %v8253_v42  ;;  %4201 = vmatpush.bf16.msra.mxu3 %v8830_v12  ;;  %v7394_v42 = vor.u32 %v9933_v25, %v7391_v26  ;;  %v9861_v12 = vld [vmem:[#allocation8 + $0x34c] sm:$0xf]  ;;  %v7682_v51 = vor.u32 %v10005_v35, %v7679_v36 }
 0x17f   :  { %v10217_v45 = vld [vmem:[#allocation8 + $0xe64] sm:$0xf0]  ;;  %v9989_v34 = vld [vmem:[#allocation8 + $0x74c] sm:$0xf] }
 0x180   :  { %v8797_v47 = vld [vmem:[#allocation8 + $0x1088] sm:$0xf]  ;;  %v8510_v58 = vor.u32 %v10217_v45, %v8509_v44  ;;  %4177 = vmatpush.bf16.msra.mxu1 %v8254_v52  ;;  %v7103_v44 = vld [vmem:[#allocation8 + $0x368] sm:$0xf0]  ;;  %4216 = vmatpush.bf16.msrb.mxu0 %v6722_v27  ;;  %v3934_v45 = vadd.f32 %v3933_v41, %v3921_v17 }
 0x181   :  { %v10289_v48 = vld [vmem:[#allocation8 + $0x10a4] sm:$0xf0]  ;;  %v9925_v52 = vld [vmem:[#allocation8 + $0x54c] sm:$0xf] }
 0x182   :  { %v8221_v56 = vld [vmem:[#allocation8 + $0xc08] sm:$0xf]  ;;  %v8798_v0 = vor.u32 %v10289_v48, %v8797_v47  ;;  %4190 = vmatpush.bf16.msra.mxu2 %v8510_v58  ;;  %v3922_v47 = vpop.f32.mrf.mxu1  ;;  %v6690_v48 = vor.u32 %v9757_v30, %v6687_v33  ;;  %v7106_v58 = vor.u32 %v9861_v12, %v7103_v44  ;;  %v7615_v7 = vld [vmem:[#allocation8 + $0x768] sm:$0xf0]  ;;  %v3947_v8 = vadd.f32 %v3946_v5, %v3934_v45 }
 0x183   :  { %v10145_v59 = vld [vmem:[#allocation8 + $0xc24] sm:$0xf0]  ;;  %v9845_v17 = vld [vmem:[#allocation8 + $0x2cc] sm:$0xf] }
 0x184   :  { %v8477_v61 = vld [vmem:[#allocation8 + $0xe08] sm:$0xf]  ;;  %v8222_v11 = vor.u32 %v10145_v59, %v8221_v56  ;;  %4202 = vmatpush.bf16.msra.mxu3 %v8798_v0  ;;  %v9997_v56 = vld [vmem:[#allocation8 + $0x78c] sm:$0xf]  ;;  %4217 = vmatpush.bf16.msrb.mxu0 %v6690_v48  ;;  %v3935_v13 = vpop.f32.mrf.mxu2  ;;  %v3960_v21 = vadd.f32 %v3959_v46, %v3947_v8 }
 0x185   :  { %v10209_v62 = vld [vmem:[#allocation8 + $0xe24] sm:$0xf0]  ;;  %v10061_v59 = vld [vmem:[#allocation8 + $0x98c] sm:$0xf]  ;;  %v7650_v2 = vor.u32 %v9997_v56, %v7647_v57 }
 0x186   :  { %v8765_v9 = vld [vmem:[#allocation8 + $0x1048] sm:$0xf]  ;;  %v8478_v18 = vor.u32 %v10209_v62, %v8477_v61  ;;  %4178 = vmatpush.bf16.msra.mxu1 %v8222_v11  ;;  %v7903_v61 = vld [vmem:[#allocation8 + $0x9a8] sm:$0xf0]  ;;  %v7362_v62 = vor.u32 %v9925_v52, %v7359_v53 }
 0x187   :  { %v10281_v10 = vld [vmem:[#allocation8 + $0x1064] sm:$0xf0]  ;;  %v7071_v0 = vld [vmem:[#allocation8 + $0x328] sm:$0xf0]  ;;  %v7906_v6 = vor.u32 %v10061_v59, %v7903_v61  ;;  %4218 = vmatmul.bf16.vlgmr.msrb.gmra.mxu0 %v10912_v49  ;;  %v964_v59 = vperm.slane %v10961_v50, 1 }
 0x188   :  { %v8766_v23 = vor.u32 %v10281_v10, %v8765_v9  ;;  %v8733_v28 = vld [vmem:[#allocation8 + $0x1008] sm:$0xf]  ;;  %4191 = vmatpush.bf16.msra.mxu2 %v8478_v18  ;;  %4262 = vmatpush.bf16.msra.mxu0 %v7938_v55  ;;  %v7074_v9 = vor.u32 %v9853_v63, %v7071_v0  ;;  %v10053_v10 = vld [vmem:[#allocation8 + $0x94c] sm:$0xf] }
 0x189   :  { %v10273_v29 = vld [vmem:[#allocation8 + $0x1024] sm:$0xf0]  ;;  %4179 = vmatmul.bf16.vlgmr.msra.gmra.mxu1 %v10939_v31  ;;  %v7871_v11 = vld [vmem:[#allocation8 + $0x968] sm:$0xf0] }
 0x18a   :  { %4223 = vmatpush.bf16.msrb.mxu1 %v7170_v19  ;;  %4203 = vmatpush.bf16.msra.mxu3 %v8766_v23  ;;  %v8734_v43 = vor.u32 %v10273_v29, %v8733_v28  ;;  %v7039_v18 = vld [vmem:[#allocation8 + $0x2e8] sm:$0xf0]  ;;  %v3961_v19 = vpop.f32.mrf.mxu0  ;;  %v3972_v25 = vpop.f32.mrf.mxu1  ;;  %v7874_v26 = vor.u32 %v10053_v10, %v7871_v11 }
 0x18b   :  { %4192 = vmatmul.bf16.vlgmr.msra.gmra.mxu2 %v10941_v37  ;;  %v9909_v23 = vld [vmem:[#allocation8 + $0x4cc] sm:$0xf]  ;;  %v10970_v29 = vadd.f32 %v3972_v25, %v3960_v21  ;;  %v7042_v30 = vor.u32 %v9845_v17, %v7039_v18 }
 0x18c   :  { %4236 = vmatpush.bf16.msrb.mxu2 %v7426_v22  ;;  %v7618_v22 = vor.u32 %v9989_v34, %v7615_v7  ;;  %v7295_v24 = vld [vmem:[#allocation8 + $0x4e8] sm:$0xf0]  ;;  %4263 = vmatpush.bf16.msra.mxu0 %v7906_v6  ;;  %v3985_v53 = vpop.f32.mrf.mxu2 }
 0x18d   :  { %v9981_v27 = vld [vmem:[#allocation8 + $0x70c] sm:$0xf]  ;;  %v7298_v35 = vor.u32 %v9909_v23, %v7295_v24  ;;  %v3986_v13 = vadd.f32 %v3985_v53, %v964_v59 }
 0x18e   :  { %4224 = vmatpush.bf16.msrb.mxu1 %v7138_v38  ;;  %4204 = vmatpush.bf16.msra.mxu3 %v8734_v43  ;;  %v7583_v28 = vld [vmem:[#allocation8 + $0x728] sm:$0xf0] }
 0x18f   :  { %v7839_v33 = vld [vmem:[#allocation8 + $0x928] sm:$0xf0]  ;;  %v7586_v39 = vor.u32 %v9981_v27, %v7583_v28 }
 0x190   :  { %4237 = vmatpush.bf16.msrb.mxu2 %v7394_v42  ;;  %v9837_v36 = vld [vmem:[#allocation8 + $0x28c] sm:$0xf]  ;;  %4264 = vmatpush.bf16.msra.mxu0 %v7874_v26  ;;  %v3948_v42 = vpop.f32.mrf.mxu3  ;;  %v7842_v43 = vor.u32 %v10045_v32, %v7839_v33 }
 0x191   :  { %4205 = vmatmul.bf16.vlgmr.msra.gmra.mxu3 %v10945_v14  ;;  %v7007_v38 = vld [vmem:[#allocation8 + $0x2a8] sm:$0xf0] }
 0x192   :  { %4249 = vmatpush.bf16.msrb.mxu3 %v7682_v51  ;;  %4225 = vmatpush.bf16.msrb.mxu1 %v7106_v58  ;;  %v9901_v40 = vld [vmem:[#allocation8 + $0x48c] sm:$0xf]  ;;  %v7010_v45 = vor.u32 %v9837_v36, %v7007_v38  ;;  %v4011_v55 = vpop.f32.mrf.mxu0  ;;  %v3974_v0 = vpop.f32.mrf.mxu1 }
 0x193   :  { %v7263_v41 = vld [vmem:[#allocation8 + $0x4a8] sm:$0xf0] }
 0x194   :  { %4238 = vmatpush.bf16.msrb.mxu2 %v7362_v62  ;;  %v9973_v12 = vld [vmem:[#allocation8 + $0x6cc] sm:$0xf]  ;;  %v7266_v48 = vor.u32 %v9901_v40, %v7263_v41  ;;  %4265 = vmatpush.bf16.msra.mxu0 %v7842_v43 }
 0x195   :  { %v7551_v44 = vld [vmem:[#allocation8 + $0x6e8] sm:$0xf0] }
 0x196   :  { %4250 = vmatpush.bf16.msrb.mxu3 %v7650_v2  ;;  %4226 = vmatpush.bf16.msrb.mxu1 %v7074_v9  ;;  %v10037_v46 = vld [vmem:[#allocation8 + $0x8cc] sm:$0xf]  ;;  %v7554_v56 = vor.u32 %v9973_v12, %v7551_v44 }
 0x197   :  { %v7807_v47 = vld [vmem:[#allocation8 + $0x8e8] sm:$0xf0] }
 0x198   :  { %4239 = vmatpush.bf16.msrb.mxu2 %v7330_v16  ;;  %v9829_v51 = vld [vmem:[#allocation8 + $0x24c] sm:$0xf]  ;;  %v7810_v61 = vor.u32 %v10037_v46, %v7807_v47  ;;  %v3998_v21 = vpop.f32.mrf.mxu3 }
 0x199   :  { %v6975_v52 = vld [vmem:[#allocation8 + $0x268] sm:$0xf0]  ;;  %v3999_v25 = vadd.f32 %v3998_v21, %v3986_v13 }
 0x19a   :  { %4251 = vmatpush.bf16.msrb.mxu3 %v7618_v22  ;;  %4227 = vmatpush.bf16.msrb.mxu1 %v7042_v30  ;;  %v9893_v57 = vld [vmem:[#allocation8 + $0x44c] sm:$0xf]  ;;  %v6978_v2 = vor.u32 %v9829_v51, %v6975_v52  ;;  %v3987_v30 = vpop.f32.mrf.mxu2  ;;  %v4013_v32 = vpop.f32.mrf.mxu0 }
 0x19b   :  { %v7231_v58 = vld [vmem:[#allocation8 + $0x468] sm:$0xf0]  ;;  %4266 = vmatpush.bf16.msra.mxu0 %v7810_v61  ;;  %v10973_v12 = vadd.f32 %v4011_v55, %v3999_v25 }
 0x19c   :  { %4240 = vmatpush.bf16.msrb.mxu2 %v7298_v35  ;;  %v9965_v62 = vld [vmem:[#allocation8 + $0x68c] sm:$0xf]  ;;  %v7234_v6 = vor.u32 %v9893_v57, %v7231_v58 }
 0x19d   :  { %v7519_v63 = vld [vmem:[#allocation8 + $0x6a8] sm:$0xf0] }
 0x19e   :  { %4252 = vmatpush.bf16.msrb.mxu3 %v7586_v39  ;;  %4228 = vmatpush.bf16.msrb.mxu1 %v7010_v45  ;;  %v10029_v3 = vld [vmem:[#allocation8 + $0x88c] sm:$0xf]  ;;  %v7522_v9 = vor.u32 %v9965_v62, %v7519_v63 }
 0x19f   :  { %v7775_v4 = vld [vmem:[#allocation8 + $0x8a8] sm:$0xf0] }
 0x1a0   :  { %v9821_v5 = vld [vmem:[#allocation8 + $0x20c] sm:$0xf]  ;;  %4241 = vmatpush.bf16.msrb.mxu2 %v7266_v48  ;;  %v7778_v16 = vor.u32 %v10029_v3, %v7775_v4  ;;  %v4000_v62 = vpop.f32.mrf.mxu3 }
 0x1a1   :  { %v6943_v34 = vld [vmem:[#allocation8 + $0x228] sm:$0xf0] }
 0x1a2   :  { %v9885_v7 = vld [vmem:[#allocation8 + $0x40c] sm:$0xf]  ;;  %4253 = vmatpush.bf16.msrb.mxu3 %v7554_v56  ;;  %4229 = vmatpush.bf16.msrb.mxu1 %v6978_v2  ;;  %v6946_v22 = vor.u32 %v9821_v5, %v6943_v34 }
 0x1a3   :  { %v7199_v8 = vld [vmem:[#allocation8 + $0x428] sm:$0xf0]  ;;  %4267 = vmatpush.bf16.msra.mxu0 %v7778_v16 }
 0x1a4   :  { %v10133_v10 = vld [vmem:[#allocation8 + $0xbcc] sm:$0xf]  ;;  %4242 = vmatpush.bf16.msrb.mxu2 %v7234_v6  ;;  %v7202_v26 = vor.u32 %v9885_v7, %v7199_v8 }
 0x1a5   :  { %v8191_v11 = vld [vmem:[#allocation8 + $0xbe8] sm:$0xf0] }
 0x1a6   :  { %v10197_v50 = vld [vmem:[#allocation8 + $0xdcc] sm:$0xf]  ;;  %v8194_v27 = vor.u32 %v10133_v10, %v8191_v11  ;;  %4254 = vmatpush.bf16.msrb.mxu3 %v7522_v9  ;;  %4230 = vmatpush.bf16.msrb.mxu1 %v6946_v22 }
 0x1a7   :  { %v8447_v17 = vld [vmem:[#allocation8 + $0xde8] sm:$0xf0] }
 0x1a8   :  { %v9957_v18 = vld [vmem:[#allocation8 + $0x64c] sm:$0xf]  ;;  %v8450_v33 = vor.u32 %v10197_v50, %v8447_v17  ;;  %4243 = vmatpush.bf16.msrb.mxu2 %v7202_v26  ;;  %v4024_v26 = vpop.f32.mrf.mxu1 }
 0x1a9   :  { %v7487_v19 = vld [vmem:[#allocation8 + $0x668] sm:$0xf0]  ;;  %4231 = vmatmul.bf16.vlgmr.msrb.gmra.mxu1 %v10915_v54  ;;  %v4025_v32 = vadd.f32 %v4024_v26, %v10973_v12 }
 0x1aa   :  { %v10021_v23 = vld [vmem:[#allocation8 + $0x84c] sm:$0xf]  ;;  %v7490_v35 = vor.u32 %v9957_v18, %v7487_v19  ;;  %4275 = vmatpush.bf16.msra.mxu1 %v8194_v27 }
 0x1ab   :  { %v7743_v24 = vld [vmem:[#allocation8 + $0x868] sm:$0xf0]  ;;  %4244 = vmatmul.bf16.vlgmr.msrb.gmra.mxu2 %v10919_v15 }
 0x1ac   :  { %v10125_v28 = vld [vmem:[#allocation8 + $0xb8c] sm:$0xf]  ;;  %v7746_v40 = vor.u32 %v10021_v23, %v7743_v24  ;;  %4288 = vmatpush.bf16.msra.mxu2 %v8450_v33  ;;  %4255 = vmatpush.bf16.msrb.mxu3 %v7490_v35 }
 0x1ad   :  { %v8159_v36 = vld [vmem:[#allocation8 + $0xba8] sm:$0xf0] }
 0x1ae   :  { %v10189_v38 = vld [vmem:[#allocation8 + $0xd8c] sm:$0xf]  ;;  %v8162_v47 = vor.u32 %v10125_v28, %v8159_v36  ;;  %4268 = vmatpush.bf16.msra.mxu0 %v7746_v40 }
 0x1af   :  { %v8415_v39 = vld [vmem:[#allocation8 + $0xda8] sm:$0xf0] }
 0x1b0   :  { %v9949_v41 = vld [vmem:[#allocation8 + $0x60c] sm:$0xf]  ;;  %v8418_v52 = vor.u32 %v10189_v38, %v8415_v39  ;;  %4276 = vmatpush.bf16.msra.mxu1 %v8162_v47  ;;  %v4026_v62 = vpop.f32.mrf.mxu1 }
 0x1b1   :  { %v7455_v42 = vld [vmem:[#allocation8 + $0x628] sm:$0xf0]  ;;  %v9866_v62 = vld [vmem:[#allocation8 + $0x36c] sm:$0xf0] }
 0x1b2   :  { %v10013_v43 = vld [vmem:[#allocation8 + $0x80c] sm:$0xf]  ;;  %v7458_v53 = vor.u32 %v9949_v41, %v7455_v42  ;;  %4289 = vmatpush.bf16.msra.mxu2 %v8418_v52 }
 0x1b3   :  { %v7711_v44 = vld [vmem:[#allocation8 + $0x828] sm:$0xf0] }
 0x1b4   :  { %v10261_v45 = vld [vmem:[#allocation8 + $0xfcc] sm:$0xf]  ;;  %v7714_v55 = vor.u32 %v10013_v43, %v7711_v44  ;;  %4256 = vmatpush.bf16.msrb.mxu3 %v7458_v53 }
 0x1b5   :  { %v8703_v46 = vld [vmem:[#allocation8 + $0xfe8] sm:$0xf0] }
 0x1b6   :  { %v10325_v48 = vld [vmem:[#allocation8 + $0x11cc] sm:$0xf]  ;;  %v8706_v58 = vor.u32 %v10261_v45, %v8703_v46  ;;  %4269 = vmatpush.bf16.msra.mxu0 %v7714_v55 }
 0x1b7   :  { %v8959_v51 = vld [vmem:[#allocation8 + $0x11e8] sm:$0xf0]  ;;  %4257 = vmatmul.bf16.vlgmr.msrb.gmra.mxu3 %v10922_v20 }
 0x1b8   :  { %v10117_v56 = vld [vmem:[#allocation8 + $0xb4c] sm:$0xf]  ;;  %v8962_v63 = vor.u32 %v10325_v48, %v8959_v51  ;;  %4301 = vmatpush.bf16.msra.mxu3 %v8706_v58 }
 0x1b9   :  { %v8127_v57 = vld [vmem:[#allocation8 + $0xb68] sm:$0xf0]  ;;  %4270 = vmatmul.bf16.vlgmr.msra.gmra.mxu0 %v10931_v60 }
 0x1ba   :  { %v10181_v59 = vld [vmem:[#allocation8 + $0xd4c] sm:$0xf]  ;;  %v8130_v3 = vor.u32 %v10117_v56, %v8127_v57  ;;  %4314 = vmatpush.bf16.msrb.mxu0 %v8962_v63  ;;  %v4037_v56 = vpop.f32.mrf.mxu2  ;;  %v4063_v57 = vpop.f32.mrf.mxu0 }
 0x1bb   :  { %v8383_v61 = vld [vmem:[#allocation8 + $0xd68] sm:$0xf0] }
 0x1bc   :  { %v10253_v0 = vld [vmem:[#allocation8 + $0xf8c] sm:$0xf]  ;;  %v8386_v6 = vor.u32 %v10181_v59, %v8383_v61  ;;  %4277 = vmatpush.bf16.msra.mxu1 %v8130_v3  ;;  %v4038_v61 = vadd.f32 %v4037_v56, %v4025_v32  ;;  %v6853_v56 = vld [vmem:[#allocation8 + $0x150] sm:$0xf] }
 0x1bd   :  { %v8671_v2 = vld [vmem:[#allocation8 + $0xfa8] sm:$0xf0] }
 0x1be   :  { %v10317_v4 = vld [vmem:[#allocation8 + $0x118c] sm:$0xf]  ;;  %v8674_v8 = vor.u32 %v10253_v0, %v8671_v2  ;;  %4290 = vmatpush.bf16.msra.mxu2 %v8386_v6 }
 0x1bf   :  { %v8927_v5 = vld [vmem:[#allocation8 + $0x11a8] sm:$0xf0] }
 0x1c0   :  { %v10109_v34 = vld [vmem:[#allocation8 + $0xb0c] sm:$0xf]  ;;  %v8930_v11 = vor.u32 %v10317_v4, %v8927_v5  ;;  %4302 = vmatpush.bf16.msra.mxu3 %v8674_v8 }
 0x1c1   :  { %v8095_v7 = vld [vmem:[#allocation8 + $0xb28] sm:$0xf0] }
 0x1c2   :  { %v10173_v9 = vld [vmem:[#allocation8 + $0xd0c] sm:$0xf]  ;;  %v8098_v16 = vor.u32 %v10109_v34, %v8095_v7  ;;  %4315 = vmatpush.bf16.msrb.mxu0 %v8930_v11  ;;  %v6917_v11 = vld [vmem:[#allocation8 + $0x1d0] sm:$0xf]  ;;  %v4065_v32 = vpop.f32.mrf.mxu0 }
 0x1c3   :  { %v8351_v10 = vld [vmem:[#allocation8 + $0xd28] sm:$0xf0] }
 0x1c4   :  { %v10245_v50 = vld [vmem:[#allocation8 + $0xf4c] sm:$0xf]  ;;  %v8354_v19 = vor.u32 %v10173_v9, %v8351_v10  ;;  %4278 = vmatpush.bf16.msra.mxu1 %v8098_v16  ;;  %v4050_v16 = vpop.f32.mrf.mxu3 }
 0x1c5   :  { %v8639_v13 = vld [vmem:[#allocation8 + $0xf68] sm:$0xf0] }
 0x1c6   :  { %v10309_v17 = vld [vmem:[#allocation8 + $0x114c] sm:$0xf]  ;;  %v8642_v23 = vor.u32 %v10245_v50, %v8639_v13  ;;  %4291 = vmatpush.bf16.msra.mxu2 %v8354_v19  ;;  %v9818_v50 = vld [vmem:[#allocation8 + $0x1ec] sm:$0xf0] }
 0x1c7   :  { %v8895_v18 = vld [vmem:[#allocation8 + $0x1168] sm:$0xf0]  ;;  %v7173_v13 = vld [vmem:[#allocation8 + $0x3d0] sm:$0xf] }
 0x1c8   :  { %v10101_v21 = vld [vmem:[#allocation8 + $0xacc] sm:$0xf]  ;;  %v8898_v27 = vor.u32 %v10309_v17, %v8895_v18  ;;  %4303 = vmatpush.bf16.msra.mxu3 %v8642_v23  ;;  %v9882_v18 = vld [vmem:[#allocation8 + $0x3ec] sm:$0xf0] }
 0x1c9   :  { %v8063_v22 = vld [vmem:[#allocation8 + $0xae8] sm:$0xf0] }
 0x1ca   :  { %v10165_v24 = vld [vmem:[#allocation8 + $0xccc] sm:$0xf]  ;;  %v8066_v33 = vor.u32 %v10101_v21, %v8063_v22  ;;  %4316 = vmatpush.bf16.msrb.mxu0 %v8898_v27  ;;  %v4051_v22 = vadd.f32 %v4050_v16, %v4038_v61  ;;  %v6918_v27 = vor.u32 %v9818_v50, %v6917_v11  ;;  %v7109_v61 = vld [vmem:[#allocation8 + $0x350] sm:$0xf] }
 0x1cb   :  { %v8319_v25 = vld [vmem:[#allocation8 + $0xce8] sm:$0xf0]  ;;  %v7365_v50 = vld [vmem:[#allocation8 + $0x550] sm:$0xf] }
 0x1cc   :  { %v10237_v28 = vld [vmem:[#allocation8 + $0xf0c] sm:$0xf]  ;;  %v8322_v38 = vor.u32 %v10165_v24, %v8319_v25  ;;  %4279 = vmatpush.bf16.msra.mxu1 %v8066_v33  ;;  %v7174_v33 = vor.u32 %v9882_v18, %v7173_v13  ;;  %v9930_v13 = vld [vmem:[#allocation8 + $0x56c] sm:$0xf0] }
 0x1cd   :  { %v8607_v30 = vld [vmem:[#allocation8 + $0xf28] sm:$0xf0]  ;;  %v9994_v18 = vld [vmem:[#allocation8 + $0x76c] sm:$0xf0] }
 0x1ce   :  { %v10301_v35 = vld [vmem:[#allocation8 + $0x110c] sm:$0xf]  ;;  %v8610_v41 = vor.u32 %v10237_v28, %v8607_v30  ;;  %4292 = vmatpush.bf16.msra.mxu2 %v8322_v38  ;;  %v6885_v28 = vld [vmem:[#allocation8 + $0x190] sm:$0xf]  ;;  %v4039_v30 = vpop.f32.mrf.mxu2 }
 0x1cf   :  { %v8863_v36 = vld [vmem:[#allocation8 + $0x1128] sm:$0xf0]  ;;  %v7141_v38 = vld [vmem:[#allocation8 + $0x390] sm:$0xf] }
 0x1d0   :  { %v10093_v39 = vld [vmem:[#allocation8 + $0xa8c] sm:$0xf]  ;;  %v8866_v44 = vor.u32 %v10301_v35, %v8863_v36  ;;  %4304 = vmatpush.bf16.msra.mxu3 %v8610_v41  ;;  %v9810_v36 = vld [vmem:[#allocation8 + $0x1ac] sm:$0xf0] }
 0x1d1   :  { %v8031_v40 = vld [vmem:[#allocation8 + $0xaa8] sm:$0xf0]  ;;  %v9922_v30 = vld [vmem:[#allocation8 + $0x52c] sm:$0xf0] }
 0x1d2   :  { %v10157_v42 = vld [vmem:[#allocation8 + $0xc8c] sm:$0xf]  ;;  %v8034_v47 = vor.u32 %v10093_v39, %v8031_v40  ;;  %4317 = vmatpush.bf16.msrb.mxu0 %v8866_v44  ;;  %v9874_v39 = vld [vmem:[#allocation8 + $0x3ac] sm:$0xf0]  ;;  %v10980_v40 = vadd.f32 %v4063_v57, %v4051_v22 }
 0x1d3   :  { %v8287_v43 = vld [vmem:[#allocation8 + $0xca8] sm:$0xf0]  ;;  %v9802_v57 = vld [vmem:[#allocation8 + $0x16c] sm:$0xf0] }
 0x1d4   :  { %v10229_v45 = vld [vmem:[#allocation8 + $0xecc] sm:$0xf]  ;;  %v8290_v51 = vor.u32 %v10157_v42, %v8287_v43  ;;  %4280 = vmatpush.bf16.msra.mxu1 %v8034_v47  ;;  %v9946_v47 = vld [vmem:[#allocation8 + $0x5ec] sm:$0xf0] }
 0x1d5   :  { %v8575_v46 = vld [vmem:[#allocation8 + $0xee8] sm:$0xf0]  ;;  %v9786_v22 = vld [vmem:[#allocation8 + $0xec] sm:$0xf0] }
 0x1d6   :  { %v10293_v48 = vld [vmem:[#allocation8 + $0x10cc] sm:$0xf]  ;;  %v8578_v55 = vor.u32 %v10229_v45, %v8575_v46  ;;  %4293 = vmatpush.bf16.msra.mxu2 %v8290_v51  ;;  %v7429_v46 = vld [vmem:[#allocation8 + $0x5d0] sm:$0xf] }
 0x1d7   :  { %v8831_v12 = vld [vmem:[#allocation8 + $0x10e8] sm:$0xf0]  ;;  %v10010_v51 = vld [vmem:[#allocation8 + $0x7ec] sm:$0xf0] }
 0x1d8   :  { %v10085_v52 = vld [vmem:[#allocation8 + $0xa4c] sm:$0xf]  ;;  %v8834_v63 = vor.u32 %v10293_v48, %v8831_v12  ;;  %4305 = vmatpush.bf16.msra.mxu3 %v8578_v55  ;;  %v6886_v48 = vor.u32 %v9810_v36, %v6885_v28  ;;  %v7685_v12 = vld [vmem:[#allocation8 + $0x7d0] sm:$0xf]  ;;  %v4052_v55 = vpop.f32.mrf.mxu3 }
 0x1d9   :  { %v7999_v53 = vld [vmem:[#allocation8 + $0xa68] sm:$0xf0]  ;;  %v7333_v28 = vld [vmem:[#allocation8 + $0x510] sm:$0xf] }
 0x1da   :  { %v10149_v58 = vld [vmem:[#allocation8 + $0xc4c] sm:$0xf]  ;;  %v8002_v3 = vor.u32 %v10085_v52, %v7999_v53  ;;  %4318 = vmatpush.bf16.msrb.mxu0 %v8834_v63  ;;  %v7142_v52 = vor.u32 %v9874_v39, %v7141_v38  ;;  %v7686_v63 = vor.u32 %v10010_v51, %v7685_v12  ;;  %v9986_v36 = vld [vmem:[#allocation8 + $0x72c] sm:$0xf0] }
 0x1db   :  { %v8255_v59 = vld [vmem:[#allocation8 + $0xc68] sm:$0xf0]  ;;  %v6757_v39 = vld [vmem:[#allocation8 + $0x90] sm:$0xf] }
 0x1dc   :  { %v10221_v0 = vld [vmem:[#allocation8 + $0xe8c] sm:$0xf]  ;;  %v8258_v34 = vor.u32 %v10149_v58, %v8255_v59  ;;  %4281 = vmatpush.bf16.msra.mxu1 %v8002_v3  ;;  %v7430_v59 = vor.u32 %v9946_v47, %v7429_v46  ;;  %v6854_v3 = vor.u32 %v9802_v57, %v6853_v56  ;;  %v7301_v46 = vld [vmem:[#allocation8 + $0x4d0] sm:$0xf]  ;;  %v4089_v56 = vpop.f32.mrf.mxu2  ;;  %v4115_v57 = vpop.f32.mrf.mxu0 }
 0x1dd   :  { %v8543_v2 = vld [vmem:[#allocation8 + $0xea8] sm:$0xf0]  ;;  %v9914_v47 = vld [vmem:[#allocation8 + $0x4ec] sm:$0xf0] }
 0x1de   :  { %v10285_v4 = vld [vmem:[#allocation8 + $0x108c] sm:$0xf]  ;;  %v8546_v10 = vor.u32 %v10221_v0, %v8543_v2  ;;  %4294 = vmatpush.bf16.msra.mxu2 %v8258_v34  ;;  %v7397_v0 = vld [vmem:[#allocation8 + $0x590] sm:$0xf]  ;;  %v7302_v55 = vor.u32 %v9914_v47, %v7301_v46 }
 0x1df   :  { %v8799_v5 = vld [vmem:[#allocation8 + $0x10a8] sm:$0xf0]  ;;  %v9938_v2 = vld [vmem:[#allocation8 + $0x5ac] sm:$0xf0] }
 0x1e0   :  { %v10077_v6 = vld [vmem:[#allocation8 + $0xa0c] sm:$0xf]  ;;  %v8802_v17 = vor.u32 %v10285_v4, %v8799_v5  ;;  %4306 = vmatpush.bf16.msra.mxu3 %v8546_v10  ;;  %v7653_v4 = vld [vmem:[#allocation8 + $0x790] sm:$0xf] }
 0x1e1   :  { %v7967_v7 = vld [vmem:[#allocation8 + $0xa28] sm:$0xf0]  ;;  %v10002_v5 = vld [vmem:[#allocation8 + $0x7ac] sm:$0xf0] }
 0x1e2   :  { %v10141_v8 = vld [vmem:[#allocation8 + $0xc0c] sm:$0xf]  ;;  %v7970_v23 = vor.u32 %v10077_v6, %v7967_v7  ;;  %4319 = vmatpush.bf16.msrb.mxu0 %v8802_v17  ;;  %v7110_v6 = vor.u32 %v9866_v62, %v7109_v61  ;;  %v6821_v34 = vld [vmem:[#allocation8 + $0x110] sm:$0xf]  ;;  %v7654_v11 = vor.u32 %v10002_v5, %v7653_v4 }
 0x1e3   :  { %v8223_v9 = vld [vmem:[#allocation8 + $0xc28] sm:$0xf0]  ;;  %v9794_v7 = vld [vmem:[#allocation8 + $0x12c] sm:$0xf0] }
 0x1e4   :  { %v10213_v19 = vld [vmem:[#allocation8 + $0xe4c] sm:$0xf]  ;;  %v8226_v26 = vor.u32 %v10141_v8, %v8223_v9  ;;  %4282 = vmatpush.bf16.msra.mxu1 %v7970_v23  ;;  %v7398_v8 = vor.u32 %v9938_v2, %v7397_v0  ;;  %v7077_v9 = vld [vmem:[#allocation8 + $0x310] sm:$0xf]  ;;  %v6822_v16 = vor.u32 %v9794_v7, %v6821_v34  ;;  %v7366_v23 = vor.u32 %v9930_v13, %v7365_v50  ;;  %v10989_v0 = vld [vmem:[#allocation11] sm:$0xff] }
 0x1e5   :  { %v8511_v21 = vld [vmem:[#allocation8 + $0xe68] sm:$0xf0]  ;;  %v9858_v10 = vld [vmem:[#allocation8 + $0x32c] sm:$0xf0]  ;;  %v965_v2 = vperm.slane %v10989_v0, 2 }
 0x1e6   :  { %v10277_v24 = vld [vmem:[#allocation8 + $0x104c] sm:$0xf]  ;;  %v8514_v35 = vor.u32 %v10213_v19, %v8511_v21  ;;  %4295 = vmatpush.bf16.msra.mxu2 %v8226_v26  ;;  %v7621_v17 = vld [vmem:[#allocation8 + $0x750] sm:$0xf]  ;;  %v7078_v19 = vor.u32 %v9858_v10, %v7077_v9  ;;  %v4076_v26 = vpop.f32.mrf.mxu1 }
 0x1e7   :  { %v8767_v25 = vld [vmem:[#allocation8 + $0x1068] sm:$0xf0]  ;;  %4283 = vmatmul.bf16.vlgmr.msra.gmra.mxu1 %v10933_v1  ;;  %v6789_v21 = vld [vmem:[#allocation8 + $0xd0] sm:$0xf]  ;;  %v4077_v32 = vadd.f32 %v4076_v26, %v10980_v40 }
 0x1e8   :  { %v8770_v41 = vor.u32 %v10277_v24, %v8767_v25  ;;  %v10205_v42 = vld [vmem:[#allocation8 + $0xe0c] sm:$0xf]  ;;  %4327 = vmatpush.bf16.msrb.mxu1 %v6918_v27  ;;  %4307 = vmatpush.bf16.msra.mxu3 %v8514_v35  ;;  %v7045_v24 = vld [vmem:[#allocation8 + $0x2d0] sm:$0xf]  ;;  %v7622_v27 = vor.u32 %v9994_v18, %v7621_v17  ;;  %v4102_v18 = vpop.f32.mrf.mxu3 }
 0x1e9   :  { %v8479_v43 = vld [vmem:[#allocation8 + $0xe28] sm:$0xf0]  ;;  %4296 = vmatmul.bf16.vlgmr.msra.gmra.mxu2 %v10939_v31  ;;  %v9850_v25 = vld [vmem:[#allocation8 + $0x2ec] sm:$0xf0]  ;;  %v10987_v61 = vadd.f32 %v4089_v56, %v4077_v32 }
 0x1ea   :  { %v10269_v44 = vld [vmem:[#allocation8 + $0x100c] sm:$0xf]  ;;  %4340 = vmatpush.bf16.msrb.mxu2 %v7174_v33  ;;  %v8482_v53 = vor.u32 %v10205_v42, %v8479_v43  ;;  %4320 = vmatpush.bf16.msrb.mxu0 %v8770_v41  ;;  %v6790_v33 = vor.u32 %v9786_v22, %v6789_v21  ;;  %v7589_v35 = vld [vmem:[#allocation8 + $0x710] sm:$0xf]  ;;  %v7046_v38 = vor.u32 %v9850_v25, %v7045_v24 }
 0x1eb   :  { %v8735_v45 = vld [vmem:[#allocation8 + $0x1028] sm:$0xf0]  ;;  %v9778_v41 = vld [vmem:[#allocation8 + $0xac] sm:$0xf0]  ;;  %v7334_v42 = vor.u32 %v9922_v30, %v7333_v28  ;;  %v4103_v24 = vadd.f32 %v4102_v18, %v965_v2 }
 0x1ec   :  { %v8738_v58 = vor.u32 %v10269_v44, %v8735_v45  ;;  %4328 = vmatpush.bf16.msrb.mxu1 %v6886_v48  ;;  %4308 = vmatpush.bf16.msra.mxu3 %v8482_v53  ;;  %v7013_v43 = vld [vmem:[#allocation8 + $0x290] sm:$0xf]  ;;  %v7590_v45 = vor.u32 %v9986_v36, %v7589_v35  ;;  %v6758_v48 = vor.u32 %v9778_v41, %v6757_v39  ;;  %v4117_v35 = vpop.f32.mrf.mxu0 }
 0x1ed   :  { %v9842_v44 = vld [vmem:[#allocation8 + $0x2ac] sm:$0xf0] }
 0x1ee   :  { %4341 = vmatpush.bf16.msrb.mxu2 %v7142_v52  ;;  %4321 = vmatpush.bf16.msrb.mxu0 %v8738_v58  ;;  %v7557_v12 = vld [vmem:[#allocation8 + $0x6d0] sm:$0xf]  ;;  %v7014_v51 = vor.u32 %v9842_v44, %v7013_v43  ;;  %v4078_v62 = vpop.f32.mrf.mxu1  ;;  %v10992_v43 = vadd.f32 %v4115_v57, %v4103_v24 }
 0x1ef   :  { %4309 = vmatmul.bf16.vlgmr.msra.gmra.mxu3 %v10941_v37  ;;  %v9978_v40 = vld [vmem:[#allocation8 + $0x6ec] sm:$0xf0] }
 0x1f0   :  { %4353 = vmatpush.bf16.msrb.mxu3 %v7430_v59  ;;  %4329 = vmatpush.bf16.msrb.mxu1 %v6854_v3  ;;  %v6725_v52 = vld [vmem:[#allocation8 + $0x50] sm:$0xf] }
 0x1f1   :  { %4322 = vmatmul.bf16.vlgmr.msrb.gmra.mxu0 %v10945_v14  ;;  %v9770_v53 = vld [vmem:[#allocation8 + $0x6c] sm:$0xf0] }
 0x1f2   :  { %4366 = vmatpush.bf16.msra.mxu0 %v7686_v63  ;;  %4342 = vmatpush.bf16.msrb.mxu2 %v7110_v6  ;;  %v6981_v58 = vld [vmem:[#allocation8 + $0x250] sm:$0xf]  ;;  %v7558_v63 = vor.u32 %v9978_v40, %v7557_v12  ;;  %v6726_v5 = vor.u32 %v9770_v53, %v6725_v52 }
 0x1f3   :  { %v9834_v59 = vld [vmem:[#allocation8 + $0x26c] sm:$0xf0] }
 0x1f4   :  { %4354 = vmatpush.bf16.msrb.mxu3 %v7398_v8  ;;  %4330 = vmatpush.bf16.msrb.mxu1 %v6822_v16  ;;  %v7269_v3 = vld [vmem:[#allocation8 + $0x490] sm:$0xf]  ;;  %v6982_v8 = vor.u32 %v9834_v59, %v6981_v58  ;;  %v4104_v59 = vpop.f32.mrf.mxu3 }
 0x1f5   :  { %v9906_v4 = vld [vmem:[#allocation8 + $0x4ac] sm:$0xf0] }
 0x1f6   :  { %4367 = vmatpush.bf16.msra.mxu0 %v7654_v11  ;;  %4343 = vmatpush.bf16.msrb.mxu2 %v7078_v19  ;;  %v7525_v6 = vld [vmem:[#allocation8 + $0x690] sm:$0xf]  ;;  %v7270_v50 = vor.u32 %v9906_v4, %v7269_v3 }
 0x1f7   :  { %v9970_v34 = vld [vmem:[#allocation8 + $0x6ac] sm:$0xf0] }
 0x1f8   :  { %4355 = vmatpush.bf16.msrb.mxu3 %v7366_v23  ;;  %4331 = vmatpush.bf16.msrb.mxu1 %v6790_v33  ;;  %v6693_v7 = vld [vmem:[#allocation8 + $0x10] sm:$0xf]  ;;  %v7526_v19 = vor.u32 %v9970_v34, %v7525_v6  ;;  %v4091_v33 = vpop.f32.mrf.mxu2 }
 0x1f9   :  { %v9762_v9 = vld [vmem:[#allocation8 + $0x2c] sm:$0xf0] }
 0x1fa   :  { %4368 = vmatpush.bf16.msra.mxu0 %v7622_v27  ;;  %4344 = vmatpush.bf16.msrb.mxu2 %v7046_v38  ;;  %v6949_v10 = vld [vmem:[#allocation8 + $0x210] sm:$0xf]  ;;  %v6694_v25 = vor.u32 %v9762_v9, %v6693_v7 }
 0x1fb   :  { %v9826_v11 = vld [vmem:[#allocation8 + $0x22c] sm:$0xf0] }
 0x1fc   :  { %4356 = vmatpush.bf16.msrb.mxu3 %v7334_v42  ;;  %4332 = vmatpush.bf16.msrb.mxu1 %v6758_v48  ;;  %v7941_v13 = vld [vmem:[#allocation8 + $0x9d0] sm:$0xf]  ;;  %v6950_v28 = vor.u32 %v9826_v11, %v6949_v10 }
 0x1fd   :  { %v10074_v16 = vld [vmem:[#allocation8 + $0x9ec] sm:$0xf0] }
 0x1fe   :  { %4369 = vmatpush.bf16.msra.mxu0 %v7590_v45  ;;  %4345 = vmatpush.bf16.msrb.mxu2 %v7014_v51  ;;  %v8197_v17 = vld [vmem:[#allocation8 + $0xbd0] sm:$0xf]  ;;  %v7942_v30 = vor.u32 %v10074_v16, %v7941_v13 }
 0x1ff   :  { %v10138_v21 = vld [vmem:[#allocation8 + $0xbec] sm:$0xf0] }
 0x200   :  { %4357 = vmatpush.bf16.msrb.mxu3 %v7302_v55  ;;  %v7237_v22 = vld [vmem:[#allocation8 + $0x450] sm:$0xf]  ;;  %4333 = vmatpush.bf16.msrb.mxu1 %v6726_v5  ;;  %v8198_v36 = vor.u32 %v10138_v21, %v8197_v17  ;;  %v4141_v59 = vpop.f32.mrf.mxu2 }
 0x201   :  { %v9898_v23 = vld [vmem:[#allocation8 + $0x46c] sm:$0xf0] }
 0x202   :  { %4370 = vmatpush.bf16.msra.mxu0 %v7558_v63  ;;  %v7493_v26 = vld [vmem:[#allocation8 + $0x650] sm:$0xf]  ;;  %4346 = vmatpush.bf16.msrb.mxu2 %v6982_v8  ;;  %v7238_v38 = vor.u32 %v9898_v23, %v7237_v22 }
 0x203   :  { %v9962_v27 = vld [vmem:[#allocation8 + $0x66c] sm:$0xf0] }
 0x204   :  { %v7909_v32 = vld [vmem:[#allocation8 + $0x990] sm:$0xf]  ;;  %4358 = vmatpush.bf16.msrb.mxu3 %v7270_v50  ;;  %v7494_v44 = vor.u32 %v9962_v27, %v7493_v26  ;;  %4334 = vmatpush.bf16.msrb.mxu1 %v6694_v25 }
 0x205   :  { %v10066_v39 = vld [vmem:[#allocation8 + $0x9ac] sm:$0xf0] }
 0x206   :  { %v8165_v41 = vld [vmem:[#allocation8 + $0xb90] sm:$0xf]  ;;  %4371 = vmatpush.bf16.msra.mxu0 %v7526_v19  ;;  %4347 = vmatpush.bf16.msrb.mxu2 %v6950_v28  ;;  %v7910_v51 = vor.u32 %v10066_v39, %v7909_v32  ;;  %v4128_v32 = vpop.f32.mrf.mxu1 }
 0x207   :  { %v10130_v42 = vld [vmem:[#allocation8 + $0xbac] sm:$0xf0]  ;;  %4335 = vmatmul.bf16.vlgmr.msrb.gmra.mxu1 %v10912_v49 }
 0x208   :  { %v7205_v45 = vld [vmem:[#allocation8 + $0x410] sm:$0xf]  ;;  %4379 = vmatpush.bf16.msra.mxu1 %v7942_v30  ;;  %4359 = vmatpush.bf16.msrb.mxu3 %v7238_v38  ;;  %v8166_v56 = vor.u32 %v10130_v42, %v8165_v41  ;;  %v4129_v38 = vadd.f32 %v4128_v32, %v10992_v43 }
 0x209   :  { %v9890_v46 = vld [vmem:[#allocation8 + $0x42c] sm:$0xf0]  ;;  %4348 = vmatmul.bf16.vlgmr.msrb.gmra.mxu2 %v10915_v54 }
 0x20a   :  { %v7461_v47 = vld [vmem:[#allocation8 + $0x610] sm:$0xf]  ;;  %4392 = vmatpush.bf16.msra.mxu2 %v8198_v36  ;;  %v7206_v55 = vor.u32 %v9890_v46, %v7205_v45  ;;  %4372 = vmatpush.bf16.msra.mxu0 %v7494_v44 }
 0x20b   :  { %v9954_v48 = vld [vmem:[#allocation8 + $0x62c] sm:$0xf0] }
 0x20c   :  { %v8453_v12 = vld [vmem:[#allocation8 + $0xdd0] sm:$0xf]  ;;  %v7462_v62 = vor.u32 %v9954_v48, %v7461_v47  ;;  %4380 = vmatpush.bf16.msra.mxu1 %v7910_v51  ;;  %4360 = vmatpush.bf16.msrb.mxu3 %v7206_v55 }
 0x20d   :  { %v10202_v40 = vld [vmem:[#allocation8 + $0xdec] sm:$0xf0] }
 0x20e   :  { %v8709_v52 = vld [vmem:[#allocation8 + $0xfd0] sm:$0xf]  ;;  %v8454_v63 = vor.u32 %v10202_v40, %v8453_v12  ;;  %4393 = vmatpush.bf16.msra.mxu2 %v8166_v56  ;;  %4373 = vmatpush.bf16.msra.mxu0 %v7462_v62  ;;  %v4167_v62 = vpop.f32.mrf.mxu0 }
 0x20f   :  { %v10266_v53 = vld [vmem:[#allocation8 + $0xfec] sm:$0xf0]  ;;  %4361 = vmatmul.bf16.vlgmr.msrb.gmra.mxu3 %v10919_v15 }
 0x210   :  { %v7877_v57 = vld [vmem:[#allocation8 + $0x950] sm:$0xf]  ;;  %v8710_v4 = vor.u32 %v10266_v53, %v8709_v52  ;;  %4405 = vmatpush.bf16.msra.mxu3 %v8454_v63 }
 0x211   :  { %v10058_v58 = vld [vmem:[#allocation8 + $0x96c] sm:$0xf0]  ;;  %4374 = vmatmul.bf16.vlgmr.msra.gmra.mxu0 %v10922_v20 }
 0x212   :  { %v8133_v2 = vld [vmem:[#allocation8 + $0xb50] sm:$0xf]  ;;  %v7878_v34 = vor.u32 %v10058_v58, %v7877_v57  ;;  %4418 = vmatpush.bf16.msrb.mxu0 %v8710_v4  ;;  %v4142_v4 = vadd.f32 %v4141_v59, %v4129_v38 }
 0x213   :  { %v10122_v3 = vld [vmem:[#allocation8 + $0xb6c] sm:$0xf0] }
 0x214   :  { %v8421_v5 = vld [vmem:[#allocation8 + $0xd90] sm:$0xf]  ;;  %v8134_v9 = vor.u32 %v10122_v3, %v8133_v2  ;;  %4381 = vmatpush.bf16.msra.mxu1 %v7878_v34 }
 0x215   :  { %v10194_v6 = vld [vmem:[#allocation8 + $0xdac] sm:$0xf0] }
 0x216   :  { %v8677_v7 = vld [vmem:[#allocation8 + $0xf90] sm:$0xf]  ;;  %v8422_v50 = vor.u32 %v10194_v6, %v8421_v5  ;;  %4394 = vmatpush.bf16.msra.mxu2 %v8134_v9  ;;  %v4130_v5 = vpop.f32.mrf.mxu1 }
 0x217   :  { %v10258_v8 = vld [vmem:[#allocation8 + $0xfac] sm:$0xf0] }
 0x218   :  { %v7845_v10 = vld [vmem:[#allocation8 + $0x910] sm:$0xf]  ;;  %v8678_v17 = vor.u32 %v10258_v8, %v8677_v7  ;;  %4406 = vmatpush.bf16.msra.mxu3 %v8422_v50 }
 0x219   :  { %v10050_v11 = vld [vmem:[#allocation8 + $0x92c] sm:$0xf0] }
 0x21a   :  { %v8101_v13 = vld [vmem:[#allocation8 + $0xb10] sm:$0xf]  ;;  %v7846_v21 = vor.u32 %v10050_v11, %v7845_v10  ;;  %4419 = vmatpush.bf16.msrb.mxu0 %v8678_v17 }
 0x21b   :  { %v10114_v16 = vld [vmem:[#allocation8 + $0xb2c] sm:$0xf0] }
 0x21c   :  { %v8389_v18 = vld [vmem:[#allocation8 + $0xd50] sm:$0xf]  ;;  %v8102_v24 = vor.u32 %v10114_v16, %v8101_v13  ;;  %4382 = vmatpush.bf16.msra.mxu1 %v7846_v21 }
 0x21d   :  { %v10186_v19 = vld [vmem:[#allocation8 + $0xd6c] sm:$0xf0] }
 0x21e   :  { %v8645_v22 = vld [vmem:[#allocation8 + $0xf50] sm:$0xf]  ;;  %v8390_v27 = vor.u32 %v10186_v19, %v8389_v18  ;;  %4395 = vmatpush.bf16.msra.mxu2 %v8102_v24 }
 0x21f   :  { %v10250_v23 = vld [vmem:[#allocation8 + $0xf6c] sm:$0xf0] }
 0x220   :  { %v7813_v25 = vld [vmem:[#allocation8 + $0x8d0] sm:$0xf]  ;;  %v8646_v33 = vor.u32 %v10250_v23, %v8645_v22  ;;  %4407 = vmatpush.bf16.msra.mxu3 %v8390_v27  ;;  %v9814_v22 = vld [vmem:[#allocation8 + $0x1d4] sm:$0xf]  ;;  %v4154_v23 = vpop.f32.mrf.mxu3 }
 0x221   :  { %v10042_v26 = vld [vmem:[#allocation8 + $0x8ec] sm:$0xf0] }
 0x222   :  { %v8069_v28 = vld [vmem:[#allocation8 + $0xad0] sm:$0xf]  ;;  %v7814_v39 = vor.u32 %v10042_v26, %v7813_v25  ;;  %4420 = vmatpush.bf16.msrb.mxu0 %v8646_v33  ;;  %v6919_v25 = vld [vmem:[#allocation8 + $0x1f0] sm:$0xf0] }
 0x223   :  { %v10106_v30 = vld [vmem:[#allocation8 + $0xaec] sm:$0xf0] }
 0x224   :  { %v8357_v35 = vld [vmem:[#allocation8 + $0xd10] sm:$0xf]  ;;  %v8070_v44 = vor.u32 %v10106_v30, %v8069_v28  ;;  %4383 = vmatpush.bf16.msra.mxu1 %v7814_v39  ;;  %v4155_v28 = vadd.f32 %v4154_v23, %v4142_v4  ;;  %v4143_v39 = vpop.f32.mrf.mxu2  ;;  %v9862_v23 = vld [vmem:[#allocation8 + $0x354] sm:$0xf] }
 0x225   :  { %v10178_v36 = vld [vmem:[#allocation8 + $0xd2c] sm:$0xf0] }
 0x226   :  { %v8613_v41 = vld [vmem:[#allocation8 + $0xf10] sm:$0xf]  ;;  %v8358_v47 = vor.u32 %v10178_v36, %v8357_v35  ;;  %4396 = vmatpush.bf16.msra.mxu2 %v8070_v44 }
 0x227   :  { %v10242_v42 = vld [vmem:[#allocation8 + $0xf2c] sm:$0xf0] }
 0x228   :  { %v7781_v45 = vld [vmem:[#allocation8 + $0x890] sm:$0xf]  ;;  %v8614_v40 = vor.u32 %v10242_v42, %v8613_v41  ;;  %4408 = vmatpush.bf16.msra.mxu3 %v8358_v47  ;;  %v4169_v41 = vpop.f32.mrf.mxu0  ;;  %v6922_v42 = vor.u32 %v9814_v22, %v6919_v25  ;;  %v6887_v47 = vld [vmem:[#allocation8 + $0x1b0] sm:$0xf0] }
 0x229   :  { %v10034_v46 = vld [vmem:[#allocation8 + $0x8ac] sm:$0xf0]  ;;  %v9854_v41 = vld [vmem:[#allocation8 + $0x314] sm:$0xf] }
 0x22a   :  { %v8037_v48 = vld [vmem:[#allocation8 + $0xa90] sm:$0xf]  ;;  %v7782_v53 = vor.u32 %v10034_v46, %v7781_v45  ;;  %4421 = vmatpush.bf16.msrb.mxu0 %v8614_v40  ;;  %v9806_v46 = vld [vmem:[#allocation8 + $0x194] sm:$0xf] }
 0x22b   :  { %v10098_v12 = vld [vmem:[#allocation8 + $0xaac] sm:$0xf0]  ;;  %v6890_v59 = vor.u32 %v9806_v46, %v6887_v47  ;;  %v9918_v46 = vld [vmem:[#allocation8 + $0x514] sm:$0xf] }
 0x22c   :  { %v8325_v51 = vld [vmem:[#allocation8 + $0xcd0] sm:$0xf]  ;;  %v8038_v55 = vor.u32 %v10098_v12, %v8037_v48  ;;  %4384 = vmatpush.bf16.msra.mxu1 %v7782_v53  ;;  %v10999_v48 = vadd.f32 %v4167_v62, %v4155_v28  ;;  %v7335_v47 = vld [vmem:[#allocation8 + $0x530] sm:$0xf0] }
 0x22d   :  { %v10170_v52 = vld [vmem:[#allocation8 + $0xcec] sm:$0xf0] }
 0x22e   :  { %v8581_v56 = vld [vmem:[#allocation8 + $0xed0] sm:$0xf]  ;;  %v8326_v63 = vor.u32 %v10170_v52, %v8325_v51  ;;  %4397 = vmatpush.bf16.msra.mxu2 %v8038_v55 }
 0x22f   :  { %v10234_v43 = vld [vmem:[#allocation8 + $0xeec] sm:$0xf0] }
 0x230   :  { %v7749_v57 = vld [vmem:[#allocation8 + $0x850] sm:$0xf]  ;;  %v8582_v6 = vor.u32 %v10234_v43, %v8581_v56  ;;  %4409 = vmatpush.bf16.msra.mxu3 %v8326_v63  ;;  %v9878_v56 = vld [vmem:[#allocation8 + $0x3d4] sm:$0xf] }
 0x231   :  { %v10026_v58 = vld [vmem:[#allocation8 + $0x86c] sm:$0xf0]  ;;  %v7175_v43 = vld [vmem:[#allocation8 + $0x3f0] sm:$0xf0] }
 0x232   :  { %v8005_v2 = vld [vmem:[#allocation8 + $0xa50] sm:$0xf]  ;;  %v7750_v8 = vor.u32 %v10026_v58, %v7749_v57  ;;  %4422 = vmatpush.bf16.msrb.mxu0 %v8582_v6  ;;  %v9942_v57 = vld [vmem:[#allocation8 + $0x5d4] sm:$0xf]  ;;  %v7178_v5 = vor.u32 %v9878_v56, %v7175_v43  ;;  %v7338_v43 = vor.u32 %v9918_v46, %v7335_v47 }
 0x233   :  { %v10090_v3 = vld [vmem:[#allocation8 + $0xa6c] sm:$0xf0]  ;;  %v7431_v58 = vld [vmem:[#allocation8 + $0x5f0] sm:$0xf0] }
 0x234   :  { %v8293_v34 = vld [vmem:[#allocation8 + $0xc90] sm:$0xf]  ;;  %v8006_v50 = vor.u32 %v10090_v3, %v8005_v2  ;;  %4385 = vmatpush.bf16.msra.mxu1 %v7750_v8  ;;  %v4156_v3 = vpop.f32.mrf.mxu3  ;;  %v9798_v6 = vld [vmem:[#allocation8 + $0x154] sm:$0xf] }
 0x235   :  { %v10162_v7 = vld [vmem:[#allocation8 + $0xcac] sm:$0xf0]  ;;  %v9870_v8 = vld [vmem:[#allocation8 + $0x394] sm:$0xf]  ;;  %v4193_v3 = vpop.f32.mrf.mxu2 }
 0x236   :  { %v8549_v9 = vld [vmem:[#allocation8 + $0xe90] sm:$0xf]  ;;  %v8294_v18 = vor.u32 %v10162_v7, %v8293_v34  ;;  %4398 = vmatpush.bf16.msra.mxu2 %v8006_v50  ;;  %v6855_v34 = vld [vmem:[#allocation8 + $0x170] sm:$0xf0]  ;;  %v7434_v7 = vor.u32 %v9942_v57, %v7431_v58 }
 0x237   :  { %v10226_v10 = vld [vmem:[#allocation8 + $0xeac] sm:$0xf0]  ;;  %v7399_v50 = vld [vmem:[#allocation8 + $0x5b0] sm:$0xf0] }
 0x238   :  { %v7717_v11 = vld [vmem:[#allocation8 + $0x810] sm:$0xf]  ;;  %v8550_v24 = vor.u32 %v10226_v10, %v8549_v9  ;;  %4410 = vmatpush.bf16.msra.mxu3 %v8294_v18  ;;  %v7143_v9 = vld [vmem:[#allocation8 + $0x3b0] sm:$0xf0] }
 0x239   :  { %v10018_v13 = vld [vmem:[#allocation8 + $0x82c] sm:$0xf0]  ;;  %v7146_v18 = vor.u32 %v9870_v8, %v7143_v9  ;;  %v6759_v56 = vld [vmem:[#allocation8 + $0xb0] sm:$0xf0] }
 0x23a   :  { %v7973_v16 = vld [vmem:[#allocation8 + $0xa10] sm:$0xf]  ;;  %v7718_v30 = vor.u32 %v10018_v13, %v7717_v11  ;;  %4423 = vmatpush.bf16.msrb.mxu0 %v8550_v24  ;;  %v9934_v11 = vld [vmem:[#allocation8 + $0x594] sm:$0xf]  ;;  %v6858_v13 = vor.u32 %v9798_v6, %v6855_v34 }
 0x23b   :  { %v10082_v17 = vld [vmem:[#allocation8 + $0xa2c] sm:$0xf0]  ;;  %v7402_v22 = vor.u32 %v9934_v11, %v7399_v50  ;;  %v7111_v24 = vld [vmem:[#allocation8 + $0x370] sm:$0xf0] }
 0x23c   :  { %v8965_v19 = vld [vmem:[#allocation8 + $0x11d0] sm:$0xf]  ;;  %v7974_v35 = vor.u32 %v10082_v17, %v7973_v16  ;;  %4386 = vmatpush.bf16.msra.mxu1 %v7718_v30  ;;  %v7047_v57 = vld [vmem:[#allocation8 + $0x2f0] sm:$0xf0] }
 0x23d   :  { %v10330_v21 = vld [vmem:[#allocation8 + $0x11ec] sm:$0xf0]  ;;  %v9766_v6 = vld [vmem:[#allocation8 + $0x54] sm:$0xf] }
 0x23e   :  { %v8261_v26 = vld [vmem:[#allocation8 + $0xc50] sm:$0xf]  ;;  %v8966_v36 = vor.u32 %v10330_v21, %v8965_v19  ;;  %4399 = vmatpush.bf16.msra.mxu2 %v7974_v35  ;;  %v9790_v19 = vld [vmem:[#allocation8 + $0x114] sm:$0xf] }
 0x23f   :  { %v10154_v27 = vld [vmem:[#allocation8 + $0xc6c] sm:$0xf0]  ;;  %4387 = vmatmul.bf16.vlgmr.msra.gmra.mxu1 %v10931_v60  ;;  %v6823_v21 = vld [vmem:[#allocation8 + $0x130] sm:$0xf0] }
 0x240   :  { %v8517_v32 = vld [vmem:[#allocation8 + $0xe50] sm:$0xf]  ;;  %v8262_v44 = vor.u32 %v10154_v27, %v8261_v26  ;;  %4431 = vmatpush.bf16.msrb.mxu1 %v8966_v36  ;;  %v9926_v26 = vld [vmem:[#allocation8 + $0x554] sm:$0xf]  ;;  %v6826_v28 = vor.u32 %v9790_v19, %v6823_v21 }
 0x241   :  { %v10218_v33 = vld [vmem:[#allocation8 + $0xe6c] sm:$0xf0]  ;;  %4400 = vmatmul.bf16.vlgmr.msra.gmra.mxu2 %v10933_v1  ;;  %v7367_v27 = vld [vmem:[#allocation8 + $0x570] sm:$0xf0] }
 0x242   :  { %v8933_v38 = vld [vmem:[#allocation8 + $0x1190] sm:$0xf]  ;;  %v8518_v12 = vor.u32 %v10218_v33, %v8517_v32  ;;  %4444 = vmatpush.bf16.msrb.mxu2 %v6922_v42  ;;  %4411 = vmatpush.bf16.msra.mxu3 %v8262_v44  ;;  %v7114_v33 = vor.u32 %v9862_v23, %v7111_v24  ;;  %v9782_v35 = vld [vmem:[#allocation8 + $0xd4] sm:$0xf]  ;;  %v7370_v39 = vor.u32 %v9926_v26, %v7367_v27  ;;  %v4206_v27 = vpop.f32.mrf.mxu3 }
 0x243   :  { %v10322_v45 = vld [vmem:[#allocation8 + $0x11ac] sm:$0xf0]  ;;  %v6791_v36 = vld [vmem:[#allocation8 + $0xf0] sm:$0xf0] }
 0x244   :  { %v8229_v40 = vld [vmem:[#allocation8 + $0xc10] sm:$0xf]  ;;  %v8934_v55 = vor.u32 %v10322_v45, %v8933_v38  ;;  %4424 = vmatpush.bf16.msrb.mxu0 %v8518_v12  ;;  %v4180_v38 = vpop.f32.mrf.mxu1  ;;  %v7079_v42 = vld [vmem:[#allocation8 + $0x330] sm:$0xf0]  ;;  %v6794_v12 = vor.u32 %v9782_v35, %v6791_v36 }
 0x245   :  { %v10146_v51 = vld [vmem:[#allocation8 + $0xc2c] sm:$0xf0]  ;;  %v4181_v44 = vadd.f32 %v4180_v38, %v10999_v48  ;;  %v7303_v48 = vld [vmem:[#allocation8 + $0x4f0] sm:$0xf0] }
 0x246   :  { %v8485_v52 = vld [vmem:[#allocation8 + $0xe10] sm:$0xf]  ;;  %v8230_v63 = vor.u32 %v10146_v51, %v8229_v40  ;;  %4432 = vmatpush.bf16.msrb.mxu1 %v8934_v55  ;;  %4445 = vmatpush.bf16.msrb.mxu2 %v6890_v59  ;;  %v9846_v55 = vld [vmem:[#allocation8 + $0x2d4] sm:$0xf] }
 0x247   :  { %v10210_v53 = vld [vmem:[#allocation8 + $0xe2c] sm:$0xf0]  ;;  %v9910_v59 = vld [vmem:[#allocation8 + $0x4d4] sm:$0xf] }
 0x248   :  { %v8901_v62 = vld [vmem:[#allocation8 + $0x1150] sm:$0xf]  ;;  %v8486_v4 = vor.u32 %v10210_v53, %v8485_v52  ;;  %4412 = vmatpush.bf16.msra.mxu3 %v8230_v63  ;;  %v7082_v52 = vor.u32 %v9854_v41, %v7079_v42  ;;  %v9774_v53 = vld [vmem:[#allocation8 + $0x94] sm:$0xf]  ;;  %v7306_v9 = vor.u32 %v9910_v59, %v7303_v48 }
 0x249   :  { %v10314_v2 = vld [vmem:[#allocation8 + $0x116c] sm:$0xf0]  ;;  %v6762_v63 = vor.u32 %v9774_v53, %v6759_v56  ;;  %v6727_v34 = vld [vmem:[#allocation8 + $0x70] sm:$0xf0] }
 0x24a   :  { %v8902_v10 = vor.u32 %v10314_v2, %v8901_v62  ;;  %v8869_v16 = vld [vmem:[#allocation8 + $0x1110] sm:$0xf]  ;;  %4425 = vmatpush.bf16.msrb.mxu0 %v8486_v4  ;;  %4446 = vmatpush.bf16.msrb.mxu2 %v6858_v13  ;;  %v11006_v4 = vpop.f32.mrf.mxu0  ;;  %v7015_v11 = vld [vmem:[#allocation8 + $0x2b0] sm:$0xf0] }
 0x24b   :  { %v10306_v17 = vld [vmem:[#allocation8 + $0x112c] sm:$0xf0]  ;;  %4413 = vmatmul.bf16.vlgmr.msra.gmra.mxu3 %v10939_v31  ;;  %v9902_v13 = vld [vmem:[#allocation8 + $0x494] sm:$0xf] }
 0x24c   :  { %4457 = vmatpush.bf16.msrb.mxu3 %v7178_v5  ;;  %4433 = vmatpush.bf16.msrb.mxu1 %v8902_v10  ;;  %v8870_v25 = vor.u32 %v10306_v17, %v8869_v16  ;;  %v8837_v30 = vld [vmem:[#allocation8 + $0x10d0] sm:$0xf]  ;;  %v7050_v5 = vor.u32 %v9846_v55, %v7047_v57  ;;  %v4182_v8 = vpop.f32.mrf.mxu1  ;;  %v9838_v10 = vld [vmem:[#allocation8 + $0x294] sm:$0xf] }
 0x24d   :  { %4426 = vmatmul.bf16.vlgmr.msrb.gmra.mxu0 %v10941_v37  ;;  %v10298_v32 = vld [vmem:[#allocation8 + $0x10ec] sm:$0xf0]  ;;  %v7271_v16 = vld [vmem:[#allocation8 + $0x4b0] sm:$0xf0]  ;;  %v7018_v23 = vor.u32 %v9838_v10, %v7015_v11 }
 0x24e   :  { %4470 = vmatpush.bf16.msra.mxu0 %v7434_v7  ;;  %v8838_v45 = vor.u32 %v10298_v32, %v8837_v30  ;;  %4447 = vmatpush.bf16.msrb.mxu2 %v6826_v28  ;;  %v8805_v40 = vld [vmem:[#allocation8 + $0x1090] sm:$0xf]  ;;  %v4194_v7 = vadd.f32 %v4193_v3, %v4181_v44  ;;  %v9758_v21 = vld [vmem:[#allocation8 + $0x14] sm:$0xf]  ;;  %v7274_v28 = vor.u32 %v9902_v13, %v7271_v16 }
 0x24f   :  { %v10290_v51 = vld [vmem:[#allocation8 + $0x10ac] sm:$0xf0]  ;;  %v10006_v24 = vld [vmem:[#allocation8 + $0x7d4] sm:$0xf] }
 0x250   :  { %4458 = vmatpush.bf16.msrb.mxu3 %v7146_v18  ;;  %4434 = vmatpush.bf16.msrb.mxu1 %v8870_v25  ;;  %v8806_v58 = vor.u32 %v10290_v51, %v8805_v40  ;;  %v8773_v62 = vld [vmem:[#allocation8 + $0x1050] sm:$0xf]  ;;  %v6730_v18 = vor.u32 %v9766_v6, %v6727_v34  ;;  %v7687_v25 = vld [vmem:[#allocation8 + $0x7f0] sm:$0xf0]  ;;  %v11008_v35 = vadd.f32 %v4206_v27, %v4194_v7  ;;  %v4208_v34 = vpop.f32.mrf.mxu3 }
 0x251   :  { %v10282_v2 = vld [vmem:[#allocation8 + $0x106c] sm:$0xf0]  ;;  %v10070_v26 = vld [vmem:[#allocation8 + $0x9d4] sm:$0xf]  ;;  %v7690_v42 = vor.u32 %v10006_v24, %v7687_v25 }
 0x252   :  { %4471 = vmatpush.bf16.msra.mxu0 %v7402_v22  ;;  %4448 = vmatpush.bf16.msrb.mxu2 %v6794_v12  ;;  %v8774_v50 = vor.u32 %v10282_v2, %v8773_v62  ;;  %v8741_v17 = vld [vmem:[#allocation8 + $0x1010] sm:$0xf]  ;;  %v6695_v22 = vld [vmem:[#allocation8 + $0x30] sm:$0xf0]  ;;  %v4221_v46 = vpop.f32.mrf.mxu0 }
 0x253   :  { %v10274_v19 = vld [vmem:[#allocation8 + $0x102c] sm:$0xf0]  ;;  %v7943_v30 = vld [vmem:[#allocation8 + $0x9f0] sm:$0xf0]  ;;  %v6698_v41 = vor.u32 %v9758_v21, %v6695_v22 }
 0x254   :  { %4459 = vmatpush.bf16.msrb.mxu3 %v7114_v33  ;;  %4435 = vmatpush.bf16.msrb.mxu1 %v8838_v45  ;;  %v9830_v32 = vld [vmem:[#allocation8 + $0x254] sm:$0xf]  ;;  %v8742_v36 = vor.u32 %v10274_v19, %v8741_v17  ;;  %v4195_v45 = vpop.f32.mrf.mxu2  ;;  %v7946_v47 = vor.u32 %v10070_v26, %v7943_v30  ;;  %v4232_v46 = vpop.f32.mrf.mxu1 }
 0x255   :  { %v6983_v33 = vld [vmem:[#allocation8 + $0x270] sm:$0xf0] }
 0x256   :  { %4472 = vmatpush.bf16.msra.mxu0 %v7370_v39  ;;  %4449 = vmatpush.bf16.msrb.mxu2 %v6762_v63  ;;  %v9894_v38 = vld [vmem:[#allocation8 + $0x454] sm:$0xf]  ;;  %v6986_v12 = vor.u32 %v9830_v32, %v6983_v33 }
 0x257   :  { %v7239_v39 = vld [vmem:[#allocation8 + $0x470] sm:$0xf0] }
 0x258   :  { %4460 = vmatpush.bf16.msrb.mxu3 %v7082_v52  ;;  %4436 = vmatpush.bf16.msrb.mxu1 %v8806_v58  ;;  %v9998_v44 = vld [vmem:[#allocation8 + $0x794] sm:$0xf]  ;;  %v7242_v53 = vor.u32 %v9894_v38, %v7239_v39 }
 0x259   :  { %v7655_v40 = vld [vmem:[#allocation8 + $0x7b0] sm:$0xf0] }
 0x25a   :  { %4473 = vmatpush.bf16.msra.mxu0 %v7338_v43  ;;  %4450 = vmatpush.bf16.msrb.mxu2 %v6730_v18  ;;  %v10062_v51 = vld [vmem:[#allocation8 + $0x994] sm:$0xf]  ;;  %v7658_v48 = vor.u32 %v9998_v44, %v7655_v40 }
 0x25b   :  { %v7911_v52 = vld [vmem:[#allocation8 + $0x9b0] sm:$0xf0] }
 0x25c   :  { %4461 = vmatpush.bf16.msrb.mxu3 %v7050_v5  ;;  %4437 = vmatpush.bf16.msrb.mxu1 %v8774_v50  ;;  %v9822_v56 = vld [vmem:[#allocation8 + $0x214] sm:$0xf]  ;;  %v7914_v2 = vor.u32 %v10062_v51, %v7911_v52 }
 0x25d   :  { %v6951_v43 = vld [vmem:[#allocation8 + $0x230] sm:$0xf0] }
 0x25e   :  { %4474 = vmatpush.bf16.msra.mxu0 %v7306_v9  ;;  %v9886_v55 = vld [vmem:[#allocation8 + $0x414] sm:$0xf]  ;;  %4451 = vmatpush.bf16.msrb.mxu2 %v6698_v41  ;;  %v6954_v3 = vor.u32 %v9822_v56, %v6951_v43 }
 0x25f   :  { %v7207_v57 = vld [vmem:[#allocation8 + $0x430] sm:$0xf0] }
 0x260   :  { %4462 = vmatpush.bf16.msrb.mxu3 %v7018_v23  ;;  %4438 = vmatpush.bf16.msrb.mxu1 %v8742_v36  ;;  %v10134_v58 = vld [vmem:[#allocation8 + $0xbd4] sm:$0xf]  ;;  %v7210_v7 = vor.u32 %v9886_v55, %v7207_v57  ;;  %v966_v23 = vperm.slane %v10989_v0, 3 }
 0x261   :  { %v8199_v59 = vld [vmem:[#allocation8 + $0xbf0] sm:$0xf0]  ;;  %4452 = vmatmul.bf16.vlgmr.msrb.gmra.mxu2 %v10912_v49 }
 0x262   :  { %4475 = vmatpush.bf16.msra.mxu0 %v7274_v28  ;;  %v10198_v63 = vld [vmem:[#allocation8 + $0xdd4] sm:$0xf]  ;;  %4496 = vmatpush.bf16.msra.mxu2 %v7946_v47  ;;  %v8202_v8 = vor.u32 %v10134_v58, %v8199_v59  ;;  %v4220_v41 = vadd.f32 %v11006_v4, %v966_v23 }
 0x263   :  { %v8455_v62 = vld [vmem:[#allocation8 + $0xdf0] sm:$0xf0]  ;;  %4439 = vmatmul.bf16.vlgmr.msrb.gmra.mxu1 %v10945_v14 }
 0x264   :  { %4483 = vmatpush.bf16.msra.mxu1 %v7690_v42  ;;  %4463 = vmatpush.bf16.msrb.mxu3 %v6986_v12  ;;  %v9990_v5 = vld [vmem:[#allocation8 + $0x754] sm:$0xf]  ;;  %v8458_v11 = vor.u32 %v10198_v63, %v8455_v62  ;;  %v4233_v51 = vadd.f32 %v4232_v46, %v4220_v41 }
 0x265   :  { %v7623_v6 = vld [vmem:[#allocation8 + $0x770] sm:$0xf0] }
 0x266   :  { %4476 = vmatpush.bf16.msra.mxu0 %v7242_v53  ;;  %v10054_v9 = vld [vmem:[#allocation8 + $0x954] sm:$0xf]  ;;  %v7626_v16 = vor.u32 %v9990_v5, %v7623_v6  ;;  %4497 = vmatpush.bf16.msra.mxu2 %v7914_v2 }
 0x267   :  { %v7879_v10 = vld [vmem:[#allocation8 + $0x970] sm:$0xf0] }
 0x268   :  { %v10126_v50 = vld [vmem:[#allocation8 + $0xb94] sm:$0xf]  ;;  %4484 = vmatpush.bf16.msra.mxu1 %v7658_v48  ;;  %4464 = vmatpush.bf16.msrb.mxu3 %v6954_v3  ;;  %v7882_v19 = vor.u32 %v10054_v9, %v7879_v10  ;;  %v4271_v9 = vpop.f32.mrf.mxu0 }
 0x269   :  { %v8167_v13 = vld [vmem:[#allocation8 + $0xbb0] sm:$0xf0] }
 0x26a   :  { %v10190_v17 = vld [vmem:[#allocation8 + $0xd94] sm:$0xf]  ;;  %4477 = vmatpush.bf16.msra.mxu0 %v7210_v7  ;;  %v8170_v24 = vor.u32 %v10126_v50, %v8167_v13  ;;  %4498 = vmatpush.bf16.msra.mxu2 %v7882_v19 }
 0x26b   :  { %v8423_v18 = vld [vmem:[#allocation8 + $0xdb0] sm:$0xf0]  ;;  %4465 = vmatmul.bf16.vlgmr.msrb.gmra.mxu3 %v10915_v54 }
 0x26c   :  { %v9982_v21 = vld [vmem:[#allocation8 + $0x714] sm:$0xf]  ;;  %4509 = vmatpush.bf16.msra.mxu3 %v8202_v8  ;;  %v8426_v27 = vor.u32 %v10190_v17, %v8423_v18  ;;  %4485 = vmatpush.bf16.msra.mxu1 %v7626_v16  ;;  %v4245_v8 = vpop.f32.mrf.mxu2  ;;  %v4234_v16 = vpop.f32.mrf.mxu1 }
 0x26d   :  { %v7591_v22 = vld [vmem:[#allocation8 + $0x730] sm:$0xf0]  ;;  %4478 = vmatmul.bf16.vlgmr.msra.gmra.mxu0 %v10919_v15  ;;  %v4246_v13 = vadd.f32 %v4245_v8, %v4233_v51 }
 0x26e   :  { %v10046_v25 = vld [vmem:[#allocation8 + $0x914] sm:$0xf]  ;;  %4522 = vmatpush.bf16.msrb.mxu0 %v8458_v11  ;;  %v7594_v32 = vor.u32 %v9982_v21, %v7591_v22 }
 0x26f   :  { %v7847_v26 = vld [vmem:[#allocation8 + $0x930] sm:$0xf0] }
 0x270   :  { %v10118_v28 = vld [vmem:[#allocation8 + $0xb54] sm:$0xf]  ;;  %v7850_v38 = vor.u32 %v10046_v25, %v7847_v26  ;;  %4510 = vmatpush.bf16.msra.mxu3 %v8170_v24  ;;  %4486 = vmatpush.bf16.msra.mxu1 %v7594_v32 }
 0x271   :  { %v8135_v30 = vld [vmem:[#allocation8 + $0xb70] sm:$0xf0] }
 0x272   :  { %v10182_v33 = vld [vmem:[#allocation8 + $0xd54] sm:$0xf]  ;;  %v8138_v42 = vor.u32 %v10118_v28, %v8135_v30  ;;  %4523 = vmatpush.bf16.msrb.mxu0 %v8426_v27  ;;  %4499 = vmatpush.bf16.msra.mxu2 %v7850_v38  ;;  %v4258_v38 = vpop.f32.mrf.mxu3 }
 0x273   :  { %v8391_v36 = vld [vmem:[#allocation8 + $0xd70] sm:$0xf0] }
 0x274   :  { %v9974_v0 = vld [vmem:[#allocation8 + $0x6d4] sm:$0xf]  ;;  %v8394_v47 = vor.u32 %v10182_v33, %v8391_v36  ;;  %4511 = vmatpush.bf16.msra.mxu3 %v8138_v42 }
 0x275   :  { %v7559_v39 = vld [vmem:[#allocation8 + $0x6f0] sm:$0xf0] }
 0x276   :  { %v10038_v44 = vld [vmem:[#allocation8 + $0x8d4] sm:$0xf]  ;;  %v7562_v52 = vor.u32 %v9974_v0, %v7559_v39  ;;  %4524 = vmatpush.bf16.msrb.mxu0 %v8394_v47 }
 0x277   :  { %v7815_v45 = vld [vmem:[#allocation8 + $0x8f0] sm:$0xf0] }
 0x278   :  { %v10110_v12 = vld [vmem:[#allocation8 + $0xb14] sm:$0xf]  ;;  %v7818_v43 = vor.u32 %v10038_v44, %v7815_v45  ;;  %4487 = vmatpush.bf16.msra.mxu1 %v7562_v52  ;;  %v4259_v44 = vadd.f32 %v4258_v38, %v4246_v13  ;;  %v4247_v52 = vpop.f32.mrf.mxu2  ;;  %v6861_v38 = vld [vmem:[#allocation8 + $0x158] sm:$0xf] }
 0x279   :  { %v8103_v40 = vld [vmem:[#allocation8 + $0xb30] sm:$0xf0] }
 0x27a   :  { %v10174_v53 = vld [vmem:[#allocation8 + $0xd14] sm:$0xf]  ;;  %v8106_v4 = vor.u32 %v10110_v12, %v8103_v40  ;;  %4500 = vmatpush.bf16.msra.mxu2 %v7818_v43 }
 0x27b   :  { %v8359_v56 = vld [vmem:[#allocation8 + $0xd30] sm:$0xf0] }
 0x27c   :  { %v9966_v55 = vld [vmem:[#allocation8 + $0x694] sm:$0xf]  ;;  %v8362_v48 = vor.u32 %v10174_v53, %v8359_v56  ;;  %4512 = vmatpush.bf16.msra.mxu3 %v8106_v4  ;;  %v4273_v53 = vpop.f32.mrf.mxu0 }
 0x27d   :  { %v7527_v57 = vld [vmem:[#allocation8 + $0x6b0] sm:$0xf0]  ;;  %v6829_v53 = vld [vmem:[#allocation8 + $0x118] sm:$0xf] }
 0x27e   :  { %v10030_v58 = vld [vmem:[#allocation8 + $0x894] sm:$0xf]  ;;  %v7530_v2 = vor.u32 %v9966_v55, %v7527_v57  ;;  %4525 = vmatpush.bf16.msrb.mxu0 %v8362_v48 }
 0x27f   :  { %v7783_v59 = vld [vmem:[#allocation8 + $0x8b0] sm:$0xf0] }
 0x280   :  { %v10102_v63 = vld [vmem:[#allocation8 + $0xad4] sm:$0xf]  ;;  %v7786_v6 = vor.u32 %v10030_v58, %v7783_v59  ;;  %4488 = vmatpush.bf16.msra.mxu1 %v7530_v2  ;;  %v11016_v58 = vadd.f32 %v4271_v9, %v4259_v44 }
 0x281   :  { %v8071_v62 = vld [vmem:[#allocation8 + $0xaf0] sm:$0xf0] }
 0x282   :  { %v10166_v3 = vld [vmem:[#allocation8 + $0xcd4] sm:$0xf]  ;;  %v8074_v10 = vor.u32 %v10102_v63, %v8071_v62  ;;  %4501 = vmatpush.bf16.msra.mxu2 %v7786_v6 }
 0x283   :  { %v8327_v5 = vld [vmem:[#allocation8 + $0xcf0] sm:$0xf0] }
 0x284   :  { %v9958_v34 = vld [vmem:[#allocation8 + $0x654] sm:$0xf]  ;;  %v8330_v17 = vor.u32 %v10166_v3, %v8327_v5  ;;  %4513 = vmatpush.bf16.msra.mxu3 %v8074_v10  ;;  %v6925_v3 = vld [vmem:[#allocation8 + $0x1d8] sm:$0xf] }
 0x285   :  { %v7495_v7 = vld [vmem:[#allocation8 + $0x670] sm:$0xf0]  ;;  %v9819_v5 = vld [vmem:[#allocation8 + $0x1f4] sm:$0xf0] }
 0x286   :  { %v10022_v11 = vld [vmem:[#allocation8 + $0x854] sm:$0xf]  ;;  %v7498_v21 = vor.u32 %v9958_v34, %v7495_v7  ;;  %4526 = vmatpush.bf16.msrb.mxu0 %v8330_v17  ;;  %v7181_v34 = vld [vmem:[#allocation8 + $0x3d8] sm:$0xf]  ;;  %v6926_v16 = vor.u32 %v9819_v5, %v6925_v3 }
 0x287   :  { %v7751_v50 = vld [vmem:[#allocation8 + $0x870] sm:$0xf0]  ;;  %v9883_v7 = vld [vmem:[#allocation8 + $0x3f4] sm:$0xf0] }
 0x288   :  { %v10094_v18 = vld [vmem:[#allocation8 + $0xa94] sm:$0xf]  ;;  %v7754_v25 = vor.u32 %v10022_v11, %v7751_v50  ;;  %4489 = vmatpush.bf16.msra.mxu1 %v7498_v21  ;;  %v4260_v50 = vpop.f32.mrf.mxu3  ;;  %v6893_v21 = vld [vmem:[#allocation8 + $0x198] sm:$0xf] }
 0x289   :  { %v8039_v19 = vld [vmem:[#allocation8 + $0xab0] sm:$0xf0]  ;;  %v4297_v50 = vpop.f32.mrf.mxu2 }
 0x28a   :  { %v10158_v22 = vld [vmem:[#allocation8 + $0xc94] sm:$0xf]  ;;  %v8042_v30 = vor.u32 %v10094_v18, %v8039_v19  ;;  %4502 = vmatpush.bf16.msra.mxu2 %v7754_v25  ;;  %v7182_v19 = vor.u32 %v9883_v7, %v7181_v34  ;;  %v9875_v25 = vld [vmem:[#allocation8 + $0x3b4] sm:$0xf0] }
 0x28b   :  { %v8295_v23 = vld [vmem:[#allocation8 + $0xcb0] sm:$0xf0]  ;;  %v9787_v34 = vld [vmem:[#allocation8 + $0xf4] sm:$0xf0] }
 0x28c   :  { %v9950_v24 = vld [vmem:[#allocation8 + $0x614] sm:$0xf]  ;;  %v8298_v0 = vor.u32 %v10158_v22, %v8295_v23  ;;  %4514 = vmatpush.bf16.msra.mxu3 %v8042_v30  ;;  %v9811_v22 = vld [vmem:[#allocation8 + $0x1b4] sm:$0xf0] }
 0x28d   :  { %v7463_v26 = vld [vmem:[#allocation8 + $0x630] sm:$0xf0]  ;;  %v6894_v30 = vor.u32 %v9811_v22, %v6893_v21 }
 0x28e   :  { %v10014_v27 = vld [vmem:[#allocation8 + $0x814] sm:$0xf]  ;;  %v7466_v45 = vor.u32 %v9950_v24, %v7463_v26  ;;  %4527 = vmatpush.bf16.msrb.mxu0 %v8298_v0  ;;  %v7149_v24 = vld [vmem:[#allocation8 + $0x398] sm:$0xf] }
 0x28f   :  { %v7719_v28 = vld [vmem:[#allocation8 + $0x830] sm:$0xf0]  ;;  %v9803_v0 = vld [vmem:[#allocation8 + $0x174] sm:$0xf0] }
 0x290   :  { %v10262_v32 = vld [vmem:[#allocation8 + $0xfd4] sm:$0xf]  ;;  %v7722_v12 = vor.u32 %v10014_v27, %v7719_v28  ;;  %4490 = vmatpush.bf16.msra.mxu1 %v7466_v45 }
 0x291   :  { %v8711_v33 = vld [vmem:[#allocation8 + $0xff0] sm:$0xf0] }
 0x292   :  { %v10326_v36 = vld [vmem:[#allocation8 + $0x11d4] sm:$0xf]  ;;  %v8714_v40 = vor.u32 %v10262_v32, %v8711_v33  ;;  %4503 = vmatpush.bf16.msra.mxu2 %v7722_v12 }
 0x293   :  { %v8967_v39 = vld [vmem:[#allocation8 + $0x11f0] sm:$0xf0]  ;;  %4491 = vmatmul.bf16.vlgmr.msra.gmra.mxu1 %v10922_v20 }
 0x294   :  { %v10086_v41 = vld [vmem:[#allocation8 + $0xa54] sm:$0xf]  ;;  %v8970_v56 = vor.u32 %v10326_v36, %v8967_v39  ;;  %4535 = vmatpush.bf16.msrb.mxu1 %v8714_v40  ;;  %v7150_v36 = vor.u32 %v9875_v25, %v7149_v24  ;;  %v9779_v24 = vld [vmem:[#allocation8 + $0xb4] sm:$0xf0] }
 0x295   :  { %v8007_v42 = vld [vmem:[#allocation8 + $0xa70] sm:$0xf0]  ;;  %4504 = vmatmul.bf16.vlgmr.msra.gmra.mxu2 %v10931_v60 }
 0x296   :  { %v10150_v46 = vld [vmem:[#allocation8 + $0xc54] sm:$0xf]  ;;  %v8010_v43 = vor.u32 %v10086_v41, %v8007_v42  ;;  %4548 = vmatpush.bf16.msrb.mxu2 %v8970_v56  ;;  %v7117_v41 = vld [vmem:[#allocation8 + $0x358] sm:$0xf] }
 0x297   :  { %v8263_v47 = vld [vmem:[#allocation8 + $0xc70] sm:$0xf0]  ;;  %v9867_v42 = vld [vmem:[#allocation8 + $0x374] sm:$0xf0] }
 0x298   :  { %v10254_v51 = vld [vmem:[#allocation8 + $0xf94] sm:$0xf]  ;;  %v8266_v59 = vor.u32 %v10150_v46, %v8263_v47  ;;  %4515 = vmatpush.bf16.msra.mxu3 %v8010_v43  ;;  %v6862_v47 = vor.u32 %v9803_v0, %v6861_v38  ;;  %v7118_v52 = vor.u32 %v9867_v42, %v7117_v41  ;;  %v9795_v56 = vld [vmem:[#allocation8 + $0x134] sm:$0xf0]  ;;  %v4310_v42 = vpop.f32.mrf.mxu3 }
 0x299   :  { %v8679_v55 = vld [vmem:[#allocation8 + $0xfb0] sm:$0xf0]  ;;  %v7437_v0 = vld [vmem:[#allocation8 + $0x5d8] sm:$0xf] }
 0x29a   :  { %v10318_v57 = vld [vmem:[#allocation8 + $0x1194] sm:$0xf]  ;;  %v8682_v6 = vor.u32 %v10254_v51, %v8679_v55  ;;  %4528 = vmatpush.bf16.msrb.mxu0 %v8266_v59  ;;  %v4284_v51 = vpop.f32.mrf.mxu1  ;;  %v7693_v41 = vld [vmem:[#allocation8 + $0x7d8] sm:$0xf] }
 0x29b   :  { %v8935_v4 = vld [vmem:[#allocation8 + $0x11b0] sm:$0xf0]  ;;  %v4285_v43 = vadd.f32 %v4284_v51, %v11016_v58  ;;  %v9851_v58 = vld [vmem:[#allocation8 + $0x2f4] sm:$0xf0] }
 0x29c   :  { %v10078_v48 = vld [vmem:[#allocation8 + $0xa14] sm:$0xf]  ;;  %v8938_v8 = vor.u32 %v10318_v57, %v8935_v4  ;;  %4536 = vmatpush.bf16.msrb.mxu1 %v8682_v6  ;;  %v7085_v57 = vld [vmem:[#allocation8 + $0x318] sm:$0xf] }
 0x29d   :  { %v7975_v63 = vld [vmem:[#allocation8 + $0xa30] sm:$0xf0]  ;;  %v9859_v4 = vld [vmem:[#allocation8 + $0x334] sm:$0xf0] }
 0x29e   :  { %v10142_v62 = vld [vmem:[#allocation8 + $0xc14] sm:$0xf]  ;;  %v7978_v10 = vor.u32 %v10078_v48, %v7975_v63  ;;  %4549 = vmatpush.bf16.msrb.mxu2 %v8938_v8  ;;  %v7086_v5 = vor.u32 %v9859_v4, %v7085_v57  ;;  %v6797_v6 = vld [vmem:[#allocation8 + $0xd8] sm:$0xf]  ;;  %v4299_v57 = vpop.f32.mrf.mxu2 }
 0x29f   :  { %v8231_v2 = vld [vmem:[#allocation8 + $0xc30] sm:$0xf0]  ;;  %v7053_v8 = vld [vmem:[#allocation8 + $0x2d8] sm:$0xf] }
 0x2a0   :  { %v10246_v9 = vld [vmem:[#allocation8 + $0xf54] sm:$0xf]  ;;  %v8234_v13 = vor.u32 %v10142_v62, %v8231_v2  ;;  %4516 = vmatpush.bf16.msra.mxu3 %v7978_v10  ;;  %v6830_v62 = vor.u32 %v9795_v56, %v6829_v53  ;;  %v7054_v22 = vor.u32 %v9851_v58, %v7053_v8  ;;  %v6989_v51 = vld [vmem:[#allocation8 + $0x258] sm:$0xf] }
 0x2a1   :  { %v8647_v11 = vld [vmem:[#allocation8 + $0xf70] sm:$0xf0]  ;;  %v7949_v8 = vld [vmem:[#allocation8 + $0x9d8] sm:$0xf] }
 0x2a2   :  { %v10310_v17 = vld [vmem:[#allocation8 + $0x1154] sm:$0xf]  ;;  %v8650_v23 = vor.u32 %v10246_v9, %v8647_v11  ;;  %4529 = vmatpush.bf16.msrb.mxu0 %v8234_v13  ;;  %v4323_v13 = vpop.f32.mrf.mxu0  ;;  %v4286_v21 = vpop.f32.mrf.mxu1  ;;  %v10075_v58 = vld [vmem:[#allocation8 + $0x9f4] sm:$0xf0] }
 0x2a3   :  { %v8903_v18 = vld [vmem:[#allocation8 + $0x1170] sm:$0xf0]  ;;  %4517 = vmatmul.bf16.vlgmr.msra.gmra.mxu3 %v10933_v1  ;;  %v7950_v21 = vor.u32 %v10075_v58, %v7949_v8  ;;  %v7533_v8 = vld [vmem:[#allocation8 + $0x698] sm:$0xf] }
 0x2a4   :  { %v8906_v26 = vor.u32 %v10310_v17, %v8903_v18  ;;  %v10238_v27 = vld [vmem:[#allocation8 + $0xf14] sm:$0xf]  ;;  %4561 = vmatpush.bf16.msrb.mxu3 %v6926_v16  ;;  %4537 = vmatpush.bf16.msrb.mxu1 %v8650_v23  ;;  %v6798_v16 = vor.u32 %v9787_v34, %v6797_v6  ;;  %v6765_v23 = vld [vmem:[#allocation8 + $0x98] sm:$0xf] }
 0x2a5   :  { %v8615_v28 = vld [vmem:[#allocation8 + $0xf30] sm:$0xf0]  ;;  %4530 = vmatmul.bf16.vlgmr.msrb.gmra.mxu0 %v10939_v31  ;;  %v6766_v38 = vor.u32 %v9779_v24, %v6765_v23  ;;  %v9763_v6 = vld [vmem:[#allocation8 + $0x34] sm:$0xf0] }
 0x2a6   :  { %v10302_v32 = vld [vmem:[#allocation8 + $0x1114] sm:$0xf]  ;;  %4574 = vmatpush.bf16.msra.mxu0 %v7182_v19  ;;  %v8618_v39 = vor.u32 %v10238_v27, %v8615_v28  ;;  %4550 = vmatpush.bf16.msrb.mxu2 %v8906_v26  ;;  %v4298_v19 = vadd.f32 %v4297_v50, %v4285_v43  ;;  %v7021_v26 = vld [vmem:[#allocation8 + $0x298] sm:$0xf] }
 0x2a7   :  { %v8871_v33 = vld [vmem:[#allocation8 + $0x1130] sm:$0xf0]  ;;  %v9843_v27 = vld [vmem:[#allocation8 + $0x2b4] sm:$0xf0] }
 0x2a8   :  { %v8874_v44 = vor.u32 %v10302_v32, %v8871_v33  ;;  %v10230_v45 = vld [vmem:[#allocation8 + $0xed4] sm:$0xf]  ;;  %4562 = vmatpush.bf16.msrb.mxu3 %v6894_v30  ;;  %4538 = vmatpush.bf16.msrb.mxu1 %v8618_v39  ;;  %v9947_v39 = vld [vmem:[#allocation8 + $0x5f4] sm:$0xf0] }
 0x2a9   :  { %v8583_v46 = vld [vmem:[#allocation8 + $0xef0] sm:$0xf0]  ;;  %v7438_v56 = vor.u32 %v9947_v39, %v7437_v0  ;;  %v7405_v43 = vld [vmem:[#allocation8 + $0x598] sm:$0xf] }
 0x2aa   :  { %v10294_v12 = vld [vmem:[#allocation8 + $0x10d4] sm:$0xf]  ;;  %4575 = vmatpush.bf16.msra.mxu0 %v7150_v36  ;;  %v8586_v55 = vor.u32 %v10230_v45, %v8583_v46  ;;  %4551 = vmatpush.bf16.msrb.mxu2 %v8874_v44  ;;  %v7022_v44 = vor.u32 %v9843_v27, %v7021_v26  ;;  %v10011_v45 = vld [vmem:[#allocation8 + $0x7f4] sm:$0xf0]  ;;  %v4325_v4 = vpop.f32.mrf.mxu0 }
 0x2ab   :  { %v8839_v40 = vld [vmem:[#allocation8 + $0x10f0] sm:$0xf0]  ;;  %v6733_v46 = vld [vmem:[#allocation8 + $0x58] sm:$0xf] }
 0x2ac   :  { %v8842_v59 = vor.u32 %v10294_v12, %v8839_v40  ;;  %v10222_v48 = vld [vmem:[#allocation8 + $0xe94] sm:$0xf]  ;;  %4563 = vmatpush.bf16.msrb.mxu3 %v6862_v47  ;;  %4539 = vmatpush.bf16.msrb.mxu1 %v8586_v55  ;;  %v9771_v47 = vld [vmem:[#allocation8 + $0x74] sm:$0xf0]  ;;  %v4311_v12 = vadd.f32 %v4310_v42, %v4298_v19 }
 0x2ad   :  { %v8551_v63 = vld [vmem:[#allocation8 + $0xeb0] sm:$0xf0]  ;;  %v6957_v34 = vld [vmem:[#allocation8 + $0x218] sm:$0xf] }
 0x2ae   :  { %v10286_v2 = vld [vmem:[#allocation8 + $0x1094] sm:$0xf]  ;;  %4576 = vmatpush.bf16.msra.mxu0 %v7118_v52  ;;  %v8554_v7 = vor.u32 %v10222_v48, %v8551_v63  ;;  %4552 = vmatpush.bf16.msrb.mxu2 %v8842_v59  ;;  %v9835_v52 = vld [vmem:[#allocation8 + $0x274] sm:$0xf0]  ;;  %v11023_v55 = vadd.f32 %v4323_v13, %v4311_v12  ;;  %v7694_v59 = vor.u32 %v10011_v45, %v7693_v41 }
 0x2af   :  { %v8807_v3 = vld [vmem:[#allocation8 + $0x10b0] sm:$0xf0]  ;;  %v6734_v48 = vor.u32 %v9771_v47, %v6733_v46  ;;  %v9939_v63 = vld [vmem:[#allocation8 + $0x5b4] sm:$0xf0] }
 0x2b0   :  { %v8810_v10 = vor.u32 %v10286_v2, %v8807_v3  ;;  %v10214_v9 = vld [vmem:[#allocation8 + $0xe54] sm:$0xf]  ;;  %4564 = vmatpush.bf16.msrb.mxu3 %v6830_v62  ;;  %4540 = vmatpush.bf16.msrb.mxu1 %v8554_v7  ;;  %v7661_v62 = vld [vmem:[#allocation8 + $0x798] sm:$0xf]  ;;  %v6990_v3 = vor.u32 %v9835_v52, %v6989_v51 }
 0x2b1   :  { %v8519_v11 = vld [vmem:[#allocation8 + $0xe70] sm:$0xf0]  ;;  %v10003_v2 = vld [vmem:[#allocation8 + $0x7b4] sm:$0xf0] }
 0x2b2   :  { %v10278_v17 = vld [vmem:[#allocation8 + $0x1054] sm:$0xf]  ;;  %4577 = vmatpush.bf16.msra.mxu0 %v7086_v5  ;;  %v8522_v25 = vor.u32 %v10214_v9, %v8519_v11  ;;  %4553 = vmatpush.bf16.msrb.mxu2 %v8810_v10  ;;  %v6701_v5 = vld [vmem:[#allocation8 + $0x18] sm:$0xf]  ;;  %v7406_v10 = vor.u32 %v9939_v63, %v7405_v43  ;;  %v7662_v50 = vor.u32 %v10003_v2, %v7661_v62  ;;  %v4336_v43 = vpop.f32.mrf.mxu1  ;;  %v11029_v2 = vld [vmem:[#allocation11] sm:$0xff] }
 0x2b3   :  { %v8775_v18 = vld [vmem:[#allocation8 + $0x1070] sm:$0xf0]  ;;  %v9827_v7 = vld [vmem:[#allocation8 + $0x234] sm:$0xf0]  ;;  %v6702_v13 = vor.u32 %v9763_v6, %v6701_v5 }
 0x2b4   :  { %v10206_v28 = vld [vmem:[#allocation8 + $0xe14] sm:$0xf]  ;;  %v8778_v30 = vor.u32 %v10278_v17, %v8775_v18  ;;  %4565 = vmatpush.bf16.msrb.mxu3 %v6798_v16  ;;  %4541 = vmatpush.bf16.msrb.mxu1 %v8522_v25  ;;  %v8205_v9 = vld [vmem:[#allocation8 + $0xbd8] sm:$0xf]  ;;  %v4312_v18 = vpop.f32.mrf.mxu3  ;;  %v6958_v19 = vor.u32 %v9827_v7, %v6957_v34 }
 0x2b5   :  { %v8487_v32 = vld [vmem:[#allocation8 + $0xe30] sm:$0xf0]  ;;  %v10139_v11 = vld [vmem:[#allocation8 + $0xbf4] sm:$0xf0] }
 0x2b6   :  { %v10270_v33 = vld [vmem:[#allocation8 + $0x1014] sm:$0xf]  ;;  %4578 = vmatpush.bf16.msra.mxu0 %v7054_v22  ;;  %v8490_v40 = vor.u32 %v10206_v28, %v8487_v32  ;;  %4554 = vmatpush.bf16.msrb.mxu2 %v8778_v30  ;;  %v7373_v16 = vld [vmem:[#allocation8 + $0x558] sm:$0xf]  ;;  %v8206_v24 = vor.u32 %v10139_v11, %v8205_v9 }
 0x2b7   :  { %v8743_v36 = vld [vmem:[#allocation8 + $0x1030] sm:$0xf0]  ;;  %v9931_v17 = vld [vmem:[#allocation8 + $0x574] sm:$0xf0] }
 0x2b8   :  { %v8746_v53 = vor.u32 %v10270_v33, %v8743_v36  ;;  %4566 = vmatpush.bf16.msrb.mxu3 %v6766_v38  ;;  %4542 = vmatpush.bf16.msrb.mxu1 %v8490_v40  ;;  %v7629_v22 = vld [vmem:[#allocation8 + $0x758] sm:$0xf]  ;;  %v7374_v27 = vor.u32 %v9931_v17, %v7373_v16 }
 0x2b9   :  { %v9995_v23 = vld [vmem:[#allocation8 + $0x774] sm:$0xf0] }
 0x2ba   :  { %4579 = vmatpush.bf16.msra.mxu0 %v7022_v44  ;;  %4555 = vmatpush.bf16.msrb.mxu2 %v8746_v53  ;;  %v7917_v25 = vld [vmem:[#allocation8 + $0x998] sm:$0xf]  ;;  %v7630_v32 = vor.u32 %v9995_v23, %v7629_v22  ;;  %v4349_v22 = vpop.f32.mrf.mxu2  ;;  %v4375_v23 = vpop.f32.mrf.mxu0 }
 0x2bb   :  { %4543 = vmatmul.bf16.vlgmr.msrb.gmra.mxu1 %v10941_v37  ;;  %v10067_v26 = vld [vmem:[#allocation8 + $0x9b4] sm:$0xf0] }
 0x2bc   :  { %4587 = vmatpush.bf16.msra.mxu1 %v7438_v56  ;;  %4567 = vmatpush.bf16.msrb.mxu3 %v6734_v48  ;;  %v8173_v28 = vld [vmem:[#allocation8 + $0xb98] sm:$0xf]  ;;  %v7918_v38 = vor.u32 %v10067_v26, %v7917_v25 }
 0x2bd   :  { %4556 = vmatmul.bf16.vlgmr.msrb.gmra.mxu2 %v10945_v14  ;;  %v10131_v30 = vld [vmem:[#allocation8 + $0xbb4] sm:$0xf0] }
 0x2be   :  { %4600 = vmatpush.bf16.msra.mxu2 %v7694_v59  ;;  %4580 = vmatpush.bf16.msra.mxu0 %v6990_v3  ;;  %v7341_v33 = vld [vmem:[#allocation8 + $0x518] sm:$0xf]  ;;  %v8174_v41 = vor.u32 %v10131_v30, %v8173_v28  ;;  %v967_v3 = vperm.slane %v11029_v2, 4  ;;  %v4338_v28 = vpop.f32.mrf.mxu1 }
 0x2bf   :  { %v9923_v36 = vld [vmem:[#allocation8 + $0x534] sm:$0xf0] }
 0x2c0   :  { %4588 = vmatpush.bf16.msra.mxu1 %v7406_v10  ;;  %4568 = vmatpush.bf16.msrb.mxu3 %v6702_v13  ;;  %v7597_v0 = vld [vmem:[#allocation8 + $0x718] sm:$0xf]  ;;  %v7342_v45 = vor.u32 %v9923_v36, %v7341_v33  ;;  %v4337_v17 = vadd.f32 %v4336_v43, %v967_v3 }
 0x2c1   :  { %v9987_v39 = vld [vmem:[#allocation8 + $0x734] sm:$0xf0] }
 0x2c2   :  { %4601 = vmatpush.bf16.msra.mxu2 %v7662_v50  ;;  %4581 = vmatpush.bf16.msra.mxu0 %v6958_v19  ;;  %v7885_v42 = vld [vmem:[#allocation8 + $0x958] sm:$0xf]  ;;  %v7598_v12 = vor.u32 %v9987_v39, %v7597_v0 }
 0x2c3   :  { %v10059_v44 = vld [vmem:[#allocation8 + $0x974] sm:$0xf0]  ;;  %4569 = vmatmul.bf16.vlgmr.msrb.gmra.mxu3 %v10912_v49 }
 0x2c4   :  { %4613 = vmatpush.bf16.msra.mxu3 %v7950_v21  ;;  %4589 = vmatpush.bf16.msra.mxu1 %v7374_v27  ;;  %v8141_v46 = vld [vmem:[#allocation8 + $0xb58] sm:$0xf]  ;;  %v7886_v52 = vor.u32 %v10059_v44, %v7885_v42  ;;  %v4350_v27 = vadd.f32 %v4349_v22, %v4337_v17  ;;  %v9815_v22 = vld [vmem:[#allocation8 + $0x1dc] sm:$0xf] }
 0x2c5   :  { %v10123_v47 = vld [vmem:[#allocation8 + $0xb74] sm:$0xf0]  ;;  %4582 = vmatmul.bf16.vlgmr.msra.gmra.mxu0 %v10915_v54 }
 0x2c6   :  { %4626 = vmatpush.bf16.msrb.mxu0 %v8206_v24  ;;  %4602 = vmatpush.bf16.msra.mxu2 %v7630_v32  ;;  %v7309_v40 = vld [vmem:[#allocation8 + $0x4d8] sm:$0xf]  ;;  %v8142_v57 = vor.u32 %v10123_v47, %v8141_v46 }
 0x2c7   :  { %v9915_v51 = vld [vmem:[#allocation8 + $0x4f4] sm:$0xf0] }
 0x2c8   :  { %4614 = vmatpush.bf16.msra.mxu3 %v7918_v38  ;;  %v7565_v53 = vld [vmem:[#allocation8 + $0x6d8] sm:$0xf]  ;;  %4590 = vmatpush.bf16.msra.mxu1 %v7342_v45  ;;  %v7310_v48 = vor.u32 %v9915_v51, %v7309_v40  ;;  %v4362_v51 = vpop.f32.mrf.mxu3 }
 0x2c9   :  { %v9979_v56 = vld [vmem:[#allocation8 + $0x6f4] sm:$0xf0] }
 0x2ca   :  { %4627 = vmatpush.bf16.msrb.mxu0 %v8174_v41  ;;  %v7853_v4 = vld [vmem:[#allocation8 + $0x918] sm:$0xf]  ;;  %4603 = vmatpush.bf16.msra.mxu2 %v7598_v12  ;;  %v7566_v5 = vor.u32 %v9979_v56, %v7565_v53 }
 0x2cb   :  { %v10051_v59 = vld [vmem:[#allocation8 + $0x934] sm:$0xf0] }
 0x2cc   :  { %v8109_v63 = vld [vmem:[#allocation8 + $0xb18] sm:$0xf]  ;;  %4615 = vmatpush.bf16.msra.mxu3 %v7886_v52  ;;  %v7854_v7 = vor.u32 %v10051_v59, %v7853_v4  ;;  %4591 = vmatpush.bf16.msra.mxu1 %v7310_v48 }
 0x2cd   :  { %v10115_v62 = vld [vmem:[#allocation8 + $0xb34] sm:$0xf0] }
 0x2ce   :  { %v7277_v6 = vld [vmem:[#allocation8 + $0x498] sm:$0xf]  ;;  %4628 = vmatpush.bf16.msrb.mxu0 %v8142_v57  ;;  %v8110_v10 = vor.u32 %v10115_v62, %v8109_v63  ;;  %4604 = vmatpush.bf16.msra.mxu2 %v7566_v5  ;;  %v4363_v57 = vadd.f32 %v4362_v51, %v4350_v27  ;;  %v4351_v5 = vpop.f32.mrf.mxu2 }
 0x2cf   :  { %v9907_v34 = vld [vmem:[#allocation8 + $0x4b4] sm:$0xf0] }
 0x2d0   :  { %v9971_v58 = vld [vmem:[#allocation8 + $0x6b4] sm:$0xf0]  ;;  %v7278_v50 = vor.u32 %v9907_v34, %v7277_v6  ;;  %4616 = vmatpush.bf16.msra.mxu3 %v7854_v7  ;;  %v4377_v6 = vpop.f32.mrf.mxu0  ;;  %v4364_v28 = vpop.f32.mrf.mxu3 }
 0x2d1   :  { %v7821_v9 = vld [vmem:[#allocation8 + $0x8d8] sm:$0xf]  ;;  %v7534_v18 = vor.u32 %v9971_v58, %v7533_v8  ;;  %v4388_v6 = vpop.f32.mrf.mxu1 }
 0x2d2   :  { %v10043_v11 = vld [vmem:[#allocation8 + $0x8f4] sm:$0xf0]  ;;  %4629 = vmatpush.bf16.msrb.mxu0 %v8110_v10  ;;  %4592 = vmatpush.bf16.msra.mxu1 %v7278_v50 }
 0x2d3   :  { %v8077_v13 = vld [vmem:[#allocation8 + $0xad8] sm:$0xf]  ;;  %v7822_v24 = vor.u32 %v10043_v11, %v7821_v9  ;;  %4605 = vmatpush.bf16.msra.mxu2 %v7534_v18  ;;  %v11032_v9 = vadd.f32 %v4375_v23, %v4363_v57  ;;  %v9799_v57 = vld [vmem:[#allocation8 + $0x15c] sm:$0xf] }
 0x2d4   :  { %v10107_v16 = vld [vmem:[#allocation8 + $0xaf4] sm:$0xf0] }
 0x2d5   :  { %v7245_v19 = vld [vmem:[#allocation8 + $0x458] sm:$0xf]  ;;  %v8078_v30 = vor.u32 %v10107_v16, %v8077_v13  ;;  %4617 = vmatpush.bf16.msra.mxu3 %v7822_v24  ;;  %v6927_v24 = vld [vmem:[#allocation8 + $0x1f8] sm:$0xf0] }
 0x2d6   :  { %v9899_v21 = vld [vmem:[#allocation8 + $0x474] sm:$0xf0] }
 0x2d7   :  { %v7501_v25 = vld [vmem:[#allocation8 + $0x658] sm:$0xf]  ;;  %v7246_v36 = vor.u32 %v9899_v21, %v7245_v19  ;;  %4630 = vmatpush.bf16.msrb.mxu0 %v8078_v30 }
 0x2d8   :  { %v9963_v26 = vld [vmem:[#allocation8 + $0x674] sm:$0xf0] }
 0x2d9   :  { %v7789_v32 = vld [vmem:[#allocation8 + $0x898] sm:$0xf]  ;;  %v7502_v41 = vor.u32 %v9963_v26, %v7501_v25  ;;  %4593 = vmatpush.bf16.msra.mxu1 %v7246_v36 }
 0x2da   :  { %v10035_v33 = vld [vmem:[#allocation8 + $0x8b4] sm:$0xf0] }
 0x2db   :  { %v8045_v38 = vld [vmem:[#allocation8 + $0xa98] sm:$0xf]  ;;  %v7790_v46 = vor.u32 %v10035_v33, %v7789_v32  ;;  %4606 = vmatpush.bf16.msra.mxu2 %v7502_v41 }
 0x2dc   :  { %v10099_v0 = vld [vmem:[#allocation8 + $0xab4] sm:$0xf0] }
 0x2dd   :  { %v7213_v39 = vld [vmem:[#allocation8 + $0x418] sm:$0xf]  ;;  %v8046_v52 = vor.u32 %v10099_v0, %v8045_v38  ;;  %4618 = vmatpush.bf16.msra.mxu3 %v7790_v46  ;;  %v6930_v38 = vor.u32 %v9815_v22, %v6927_v24 }
 0x2de   :  { %v9891_v42 = vld [vmem:[#allocation8 + $0x434] sm:$0xf0] }
 0x2df   :  { %v7469_v44 = vld [vmem:[#allocation8 + $0x618] sm:$0xf]  ;;  %v7214_v4 = vor.u32 %v9891_v42, %v7213_v39  ;;  %4631 = vmatpush.bf16.msrb.mxu0 %v8046_v52  ;;  %v9807_v42 = vld [vmem:[#allocation8 + $0x19c] sm:$0xf] }
 0x2e0   :  { %v9955_v45 = vld [vmem:[#allocation8 + $0x634] sm:$0xf0] }
 0x2e1   :  { %v8461_v47 = vld [vmem:[#allocation8 + $0xdd8] sm:$0xf]  ;;  %v7470_v63 = vor.u32 %v9955_v45, %v7469_v44  ;;  %4594 = vmatpush.bf16.msra.mxu1 %v7214_v4  ;;  %v6895_v44 = vld [vmem:[#allocation8 + $0x1b8] sm:$0xf0] }
 0x2e2   :  { %v10203_v12 = vld [vmem:[#allocation8 + $0xdf4] sm:$0xf0]  ;;  %v6898_v52 = vor.u32 %v9807_v42, %v6895_v44  ;;  %v6863_v4 = vld [vmem:[#allocation8 + $0x178] sm:$0xf0] }
 0x2e3   :  { %v8717_v40 = vld [vmem:[#allocation8 + $0xfd8] sm:$0xf]  ;;  %v8462_v62 = vor.u32 %v10203_v12, %v8461_v47  ;;  %4607 = vmatpush.bf16.msra.mxu2 %v7470_v63 }
 0x2e4   :  { %v10267_v53 = vld [vmem:[#allocation8 + $0xff4] sm:$0xf0]  ;;  %4595 = vmatmul.bf16.vlgmr.msra.gmra.mxu1 %v10919_v15 }
 0x2e5   :  { %v7757_v56 = vld [vmem:[#allocation8 + $0x858] sm:$0xf]  ;;  %v8718_v34 = vor.u32 %v10267_v53, %v8717_v40  ;;  %4639 = vmatpush.bf16.msrb.mxu1 %v8462_v62 }
 0x2e6   :  { %v10027_v43 = vld [vmem:[#allocation8 + $0x874] sm:$0xf0]  ;;  %4608 = vmatmul.bf16.vlgmr.msra.gmra.mxu2 %v10922_v20 }
 0x2e7   :  { %v8013_v59 = vld [vmem:[#allocation8 + $0xa58] sm:$0xf]  ;;  %v7758_v7 = vor.u32 %v10027_v43, %v7757_v56  ;;  %4652 = vmatpush.bf16.msrb.mxu2 %v8718_v34  ;;  %v6866_v34 = vor.u32 %v9799_v57, %v6863_v4  ;;  %v9879_v57 = vld [vmem:[#allocation8 + $0x3dc] sm:$0xf] }
 0x2e8   :  { %v10091_v48 = vld [vmem:[#allocation8 + $0xa74] sm:$0xf0]  ;;  %v7183_v4 = vld [vmem:[#allocation8 + $0x3f8] sm:$0xf0] }
 0x2e9   :  { %v8429_v3 = vld [vmem:[#allocation8 + $0xd98] sm:$0xf]  ;;  %v8014_v11 = vor.u32 %v10091_v48, %v8013_v59  ;;  %4619 = vmatpush.bf16.msra.mxu3 %v7758_v7 }
 0x2ea   :  { %v10195_v8 = vld [vmem:[#allocation8 + $0xdb4] sm:$0xf0] }
 0x2eb   :  { %v8685_v58 = vld [vmem:[#allocation8 + $0xf98] sm:$0xf]  ;;  %v8430_v21 = vor.u32 %v10195_v8, %v8429_v3  ;;  %4632 = vmatpush.bf16.msrb.mxu0 %v8014_v11  ;;  %v9791_v11 = vld [vmem:[#allocation8 + $0x11c] sm:$0xf] }
 0x2ec   :  { %v10259_v10 = vld [vmem:[#allocation8 + $0xfb4] sm:$0xf0] }
 0x2ed   :  { %v7725_v50 = vld [vmem:[#allocation8 + $0x818] sm:$0xf]  ;;  %v8686_v25 = vor.u32 %v10259_v10, %v8685_v58  ;;  %4640 = vmatpush.bf16.msrb.mxu1 %v8430_v21  ;;  %v4389_v58 = vadd.f32 %v4388_v6, %v11032_v9  ;;  %v6799_v9 = vld [vmem:[#allocation8 + $0xf8] sm:$0xf0] }
 0x2ee   :  { %v10019_v13 = vld [vmem:[#allocation8 + $0x834] sm:$0xf0] }
 0x2ef   :  { %v7981_v16 = vld [vmem:[#allocation8 + $0xa18] sm:$0xf]  ;;  %v7726_v26 = vor.u32 %v10019_v13, %v7725_v50  ;;  %4653 = vmatpush.bf16.msrb.mxu2 %v8686_v25  ;;  %v6831_v50 = vld [vmem:[#allocation8 + $0x138] sm:$0xf0] }
 0x2f0   :  { %v10083_v17 = vld [vmem:[#allocation8 + $0xa34] sm:$0xf0]  ;;  %v6834_v22 = vor.u32 %v9791_v11, %v6831_v50  ;;  %v9871_v11 = vld [vmem:[#allocation8 + $0x39c] sm:$0xf] }
 0x2f1   :  { %v8973_v18 = vld [vmem:[#allocation8 + $0x11d8] sm:$0xf]  ;;  %v7982_v30 = vor.u32 %v10083_v17, %v7981_v16  ;;  %4620 = vmatpush.bf16.msra.mxu3 %v7726_v26 }
 0x2f2   :  { %v10331_v19 = vld [vmem:[#allocation8 + $0x11f4] sm:$0xf0] }
 0x2f3   :  { %v8397_v23 = vld [vmem:[#allocation8 + $0xd58] sm:$0xf]  ;;  %v8974_v32 = vor.u32 %v10331_v19, %v8973_v18  ;;  %4633 = vmatpush.bf16.msrb.mxu0 %v7982_v30 }
 0x2f4   :  { %v10187_v27 = vld [vmem:[#allocation8 + $0xd74] sm:$0xf0]  ;;  %4621 = vmatmul.bf16.vlgmr.msra.gmra.mxu3 %v10931_v60 }
 0x2f5   :  { %v8653_v33 = vld [vmem:[#allocation8 + $0xf58] sm:$0xf]  ;;  %v8398_v41 = vor.u32 %v10187_v27, %v8397_v23  ;;  %4665 = vmatpush.bf16.msrb.mxu3 %v8974_v32  ;;  %v9783_v23 = vld [vmem:[#allocation8 + $0xdc] sm:$0xf]  ;;  %v4401_v32 = vpop.f32.mrf.mxu2 }
 0x2f6   :  { %v10251_v36 = vld [vmem:[#allocation8 + $0xf74] sm:$0xf0]  ;;  %4634 = vmatmul.bf16.vlgmr.msrb.gmra.mxu0 %v10933_v1  ;;  %v6802_v42 = vor.u32 %v9783_v23, %v6799_v9  ;;  %v9759_v23 = vld [vmem:[#allocation8 + $0x1c] sm:$0xf] }
 0x2f7   :  { %v8941_v0 = vld [vmem:[#allocation8 + $0x1198] sm:$0xf]  ;;  %v8654_v45 = vor.u32 %v10251_v36, %v8653_v33  ;;  %4678 = vmatpush.bf16.msra.mxu0 %v6930_v38  ;;  %4641 = vmatpush.bf16.msrb.mxu1 %v8398_v41  ;;  %v4427_v33 = vpop.f32.mrf.mxu0  ;;  %v4390_v41 = vpop.f32.mrf.mxu1  ;;  %v6703_v9 = vld [vmem:[#allocation8 + $0x38] sm:$0xf0] }
 0x2f8   :  { %v10323_v39 = vld [vmem:[#allocation8 + $0x11b4] sm:$0xf0] }
 0x2f9   :  { %v8365_v46 = vld [vmem:[#allocation8 + $0xd18] sm:$0xf]  ;;  %v8942_v12 = vor.u32 %v10323_v39, %v8941_v0  ;;  %4654 = vmatpush.bf16.msrb.mxu2 %v8654_v45  ;;  %v4402_v39 = vadd.f32 %v4401_v32, %v4389_v58  ;;  %v10071_v32 = vld [vmem:[#allocation8 + $0x9dc] sm:$0xf] }
 0x2fa   :  { %v10179_v47 = vld [vmem:[#allocation8 + $0xd34] sm:$0xf0] }
 0x2fb   :  { %v8621_v40 = vld [vmem:[#allocation8 + $0xf18] sm:$0xf]  ;;  %v8366_v43 = vor.u32 %v10179_v47, %v8365_v46  ;;  %4666 = vmatpush.bf16.msrb.mxu3 %v8942_v12  ;;  %4679 = vmatpush.bf16.msra.mxu0 %v6898_v52  ;;  %v9775_v47 = vld [vmem:[#allocation8 + $0x9c] sm:$0xf] }
 0x2fc   :  { %v10243_v51 = vld [vmem:[#allocation8 + $0xf34] sm:$0xf0]  ;;  %v6767_v12 = vld [vmem:[#allocation8 + $0xb8] sm:$0xf0] }
 0x2fd   :  { %v8909_v53 = vld [vmem:[#allocation8 + $0x1158] sm:$0xf]  ;;  %v8622_v59 = vor.u32 %v10243_v51, %v8621_v40  ;;  %4642 = vmatpush.bf16.msrb.mxu1 %v8366_v43  ;;  %v4403_v50 = vpop.f32.mrf.mxu2 }
 0x2fe   :  { %v10315_v56 = vld [vmem:[#allocation8 + $0x1174] sm:$0xf0]  ;;  %v7311_v50 = vld [vmem:[#allocation8 + $0x4f8] sm:$0xf0] }
 0x2ff   :  { %v8333_v48 = vld [vmem:[#allocation8 + $0xcd8] sm:$0xf]  ;;  %v8910_v62 = vor.u32 %v10315_v56, %v8909_v53  ;;  %4655 = vmatpush.bf16.msrb.mxu2 %v8622_v59  ;;  %4680 = vmatpush.bf16.msra.mxu0 %v6866_v34  ;;  %v9943_v59 = vld [vmem:[#allocation8 + $0x5dc] sm:$0xf] }
 0x300   :  { %v10171_v63 = vld [vmem:[#allocation8 + $0xcf4] sm:$0xf0] }
 0x301   :  { %v8589_v3 = vld [vmem:[#allocation8 + $0xed8] sm:$0xf]  ;;  %v8334_v10 = vor.u32 %v10171_v63, %v8333_v48  ;;  %4667 = vmatpush.bf16.msrb.mxu3 %v8910_v62  ;;  %v4414_v48 = vpop.f32.mrf.mxu3  ;;  %v6770_v63 = vor.u32 %v9775_v47, %v6767_v12  ;;  %v7439_v62 = vld [vmem:[#allocation8 + $0x5f8] sm:$0xf0] }
 0x302   :  { %v10235_v5 = vld [vmem:[#allocation8 + $0xef4] sm:$0xf0]  ;;  %v4415_v6 = vadd.f32 %v4414_v48, %v4402_v39  ;;  %v7119_v39 = vld [vmem:[#allocation8 + $0x378] sm:$0xf0] }
 0x303   :  { %v8877_v7 = vld [vmem:[#allocation8 + $0x1118] sm:$0xf]  ;;  %v8590_v13 = vor.u32 %v10235_v5, %v8589_v3  ;;  %4643 = vmatpush.bf16.msrb.mxu1 %v8334_v10  ;;  %4681 = vmatpush.bf16.msra.mxu0 %v6834_v22  ;;  %v7186_v10 = vor.u32 %v9879_v57, %v7183_v4  ;;  %v9999_v12 = vld [vmem:[#allocation8 + $0x79c] sm:$0xf] }
 0x304   :  { %v10307_v8 = vld [vmem:[#allocation8 + $0x1134] sm:$0xf0]  ;;  %v11039_v22 = vadd.f32 %v4427_v33, %v4415_v6  ;;  %v9863_v33 = vld [vmem:[#allocation8 + $0x35c] sm:$0xf] }
 0x305   :  { %v8301_v16 = vld [vmem:[#allocation8 + $0xc98] sm:$0xf]  ;;  %v8878_v18 = vor.u32 %v10307_v8, %v8877_v7  ;;  %4656 = vmatpush.bf16.msrb.mxu2 %v8590_v13  ;;  %v9767_v7 = vld [vmem:[#allocation8 + $0x5c] sm:$0xf]  ;;  %v4429_v13 = vpop.f32.mrf.mxu0 }
 0x306   :  { %v10163_v17 = vld [vmem:[#allocation8 + $0xcb4] sm:$0xf0]  ;;  %v6735_v8 = vld [vmem:[#allocation8 + $0x78] sm:$0xf0]  ;;  %v4440_v13 = vpop.f32.mrf.mxu1 }
 0x307   :  { %v8557_v19 = vld [vmem:[#allocation8 + $0xe98] sm:$0xf]  ;;  %v8302_v26 = vor.u32 %v10163_v17, %v8301_v16  ;;  %4668 = vmatpush.bf16.msrb.mxu3 %v8878_v18  ;;  %4682 = vmatpush.bf16.msra.mxu0 %v6802_v42  ;;  %v7442_v16 = vor.u32 %v9943_v59, %v7439_v62  ;;  %v7151_v18 = vld [vmem:[#allocation8 + $0x3b8] sm:$0xf0]  ;;  %v6706_v42 = vor.u32 %v9759_v23, %v6703_v9 }
 0x308   :  { %v10227_v21 = vld [vmem:[#allocation8 + $0xeb4] sm:$0xf0]  ;;  %v7087_v57 = vld [vmem:[#allocation8 + $0x338] sm:$0xf0] }
 0x309   :  { %v8845_v24 = vld [vmem:[#allocation8 + $0x10d8] sm:$0xf]  ;;  %v8558_v27 = vor.u32 %v10227_v21, %v8557_v19  ;;  %4644 = vmatpush.bf16.msrb.mxu1 %v8302_v26  ;;  %v9935_v19 = vld [vmem:[#allocation8 + $0x59c] sm:$0xf]  ;;  %v4416_v41 = vpop.f32.mrf.mxu3 }
 0x30a   :  { %v10299_v25 = vld [vmem:[#allocation8 + $0x10f4] sm:$0xf0]  ;;  %v7407_v21 = vld [vmem:[#allocation8 + $0x5b8] sm:$0xf0] }
 0x30b   :  { %v8269_v28 = vld [vmem:[#allocation8 + $0xc58] sm:$0xf]  ;;  %v8846_v36 = vor.u32 %v10299_v25, %v8845_v24  ;;  %4657 = vmatpush.bf16.msrb.mxu2 %v8558_v27  ;;  %4683 = vmatpush.bf16.msra.mxu0 %v6770_v63  ;;  %v6738_v24 = vor.u32 %v9767_v7, %v6735_v8  ;;  %v10007_v27 = vld [vmem:[#allocation8 + $0x7dc] sm:$0xf] }
 0x30c   :  { %v10155_v30 = vld [vmem:[#allocation8 + $0xc74] sm:$0xf0]  ;;  %v9919_v59 = vld [vmem:[#allocation8 + $0x51c] sm:$0xf] }
 0x30d   :  { %v8525_v38 = vld [vmem:[#allocation8 + $0xe58] sm:$0xf]  ;;  %v8270_v46 = vor.u32 %v10155_v30, %v8269_v28  ;;  %4669 = vmatpush.bf16.msrb.mxu3 %v8846_v36  ;;  %v7695_v28 = vld [vmem:[#allocation8 + $0x7f8] sm:$0xf0]  ;;  %v7154_v30 = vor.u32 %v9871_v11, %v7151_v18 }
 0x30e   :  { %v10219_v0 = vld [vmem:[#allocation8 + $0xe74] sm:$0xf0]  ;;  %v7951_v36 = vld [vmem:[#allocation8 + $0x9f8] sm:$0xf0] }
 0x30f   :  { %v8813_v44 = vld [vmem:[#allocation8 + $0x1098] sm:$0xf]  ;;  %v8526_v51 = vor.u32 %v10219_v0, %v8525_v38  ;;  %4645 = vmatpush.bf16.msrb.mxu1 %v8270_v46  ;;  %v7410_v38 = vor.u32 %v9935_v19, %v7407_v21  ;;  %4684 = vmatpush.bf16.msra.mxu0 %v6738_v24  ;;  %v7375_v46 = vld [vmem:[#allocation8 + $0x578] sm:$0xf0]  ;;  %v7954_v47 = vor.u32 %v10071_v32, %v7951_v36 }
 0x310   :  { %v10291_v45 = vld [vmem:[#allocation8 + $0x10b4] sm:$0xf0]  ;;  %v7343_v48 = vld [vmem:[#allocation8 + $0x538] sm:$0xf0]  ;;  %v11046_v19 = vadd.f32 %v4440_v13, %v11039_v22 }
 0x311   :  { %v8237_v40 = vld [vmem:[#allocation8 + $0xc18] sm:$0xf]  ;;  %v8814_v43 = vor.u32 %v10291_v45, %v8813_v44  ;;  %4658 = vmatpush.bf16.msrb.mxu2 %v8526_v51  ;;  %v7698_v44 = vor.u32 %v10007_v27, %v7695_v28  ;;  %v9927_v45 = vld [vmem:[#allocation8 + $0x55c] sm:$0xf]  ;;  %v7122_v51 = vor.u32 %v9863_v33, %v7119_v39  ;;  %v7346_v7 = vor.u32 %v9919_v59, %v7343_v48 }
 0x312   :  { %v10147_v52 = vld [vmem:[#allocation8 + $0xc34] sm:$0xf0]  ;;  %v9991_v62 = vld [vmem:[#allocation8 + $0x75c] sm:$0xf] }
 0x313   :  { %v8493_v53 = vld [vmem:[#allocation8 + $0xe18] sm:$0xf]  ;;  %v8238_v34 = vor.u32 %v10147_v52, %v8237_v40  ;;  %4670 = vmatpush.bf16.msrb.mxu3 %v8814_v43  ;;  %v7663_v40 = vld [vmem:[#allocation8 + $0x7b8] sm:$0xf0]  ;;  %4685 = vmatpush.bf16.msra.mxu0 %v6706_v42  ;;  %v968_v42 = vperm.slane %v11029_v2, 5 }
 0x314   :  { %v10211_v56 = vld [vmem:[#allocation8 + $0xe34] sm:$0xf0]  ;;  %v10063_v52 = vld [vmem:[#allocation8 + $0x99c] sm:$0xf]  ;;  %v7666_v4 = vor.u32 %v9999_v12, %v7663_v40  ;;  %v4442_v40 = vpop.f32.mrf.mxu1 }
 0x315   :  { %v8781_v3 = vld [vmem:[#allocation8 + $0x1058] sm:$0xf]  ;;  %v8494_v58 = vor.u32 %v10211_v56, %v8493_v53  ;;  %4646 = vmatpush.bf16.msrb.mxu1 %v8238_v34  ;;  %v7919_v53 = vld [vmem:[#allocation8 + $0x9b8] sm:$0xf0]  ;;  %v7378_v56 = vor.u32 %v9927_v45, %v7375_v46  ;;  %v4479_v45 = vpop.f32.mrf.mxu0 }
 0x316   :  { %v10283_v5 = vld [vmem:[#allocation8 + $0x1074] sm:$0xf0]  ;;  %v9855_v43 = vld [vmem:[#allocation8 + $0x31c] sm:$0xf]  ;;  %v7922_v63 = vor.u32 %v10063_v52, %v7919_v53  ;;  %4686 = vmatmul.bf16.vlgmr.msra.gmra.mxu0 %v10912_v49 }
 0x317   :  { %v8782_v17 = vor.u32 %v10283_v5, %v8781_v3  ;;  %v8749_v25 = vld [vmem:[#allocation8 + $0x1018] sm:$0xf]  ;;  %4659 = vmatpush.bf16.msrb.mxu2 %v8494_v58  ;;  %4730 = vmatpush.bf16.msrb.mxu0 %v7954_v47  ;;  %v7631_v3 = vld [vmem:[#allocation8 + $0x778] sm:$0xf0]  ;;  %v7090_v5 = vor.u32 %v9855_v43, %v7087_v57 }
 0x318   :  { %v10275_v26 = vld [vmem:[#allocation8 + $0x1034] sm:$0xf0]  ;;  %4647 = vmatmul.bf16.vlgmr.msrb.gmra.mxu1 %v10939_v31  ;;  %v10055_v6 = vld [vmem:[#allocation8 + $0x95c] sm:$0xf] }
 0x319   :  { %4691 = vmatpush.bf16.msra.mxu1 %v7186_v10  ;;  %4671 = vmatpush.bf16.msrb.mxu3 %v8782_v17  ;;  %v8750_v0 = vor.u32 %v10275_v26, %v8749_v25  ;;  %v7887_v34 = vld [vmem:[#allocation8 + $0x978] sm:$0xf0]  ;;  %v7634_v10 = vor.u32 %v9991_v62, %v7631_v3 }
 0x31a   :  { %4660 = vmatmul.bf16.vlgmr.msrb.gmra.mxu2 %v10941_v37  ;;  %v9847_v8 = vld [vmem:[#allocation8 + $0x2dc] sm:$0xf] }
 0x31b   :  { %4704 = vmatpush.bf16.msra.mxu2 %v7442_v16  ;;  %v7055_v58 = vld [vmem:[#allocation8 + $0x2f8] sm:$0xf0]  ;;  %4731 = vmatpush.bf16.msrb.mxu0 %v7922_v63  ;;  %v7890_v16 = vor.u32 %v10055_v6, %v7887_v34 }
 0x31c   :  { %v9911_v11 = vld [vmem:[#allocation8 + $0x4dc] sm:$0xf]  ;;  %v7058_v21 = vor.u32 %v9847_v8, %v7055_v58 }
 0x31d   :  { %4692 = vmatpush.bf16.msra.mxu1 %v7154_v30  ;;  %4672 = vmatpush.bf16.msrb.mxu3 %v8750_v0  ;;  %v9983_v17 = vld [vmem:[#allocation8 + $0x71c] sm:$0xf]  ;;  %v7314_v25 = vor.u32 %v9911_v11, %v7311_v50 }
 0x31e   :  { %v7599_v18 = vld [vmem:[#allocation8 + $0x738] sm:$0xf0] }
 0x31f   :  { %4705 = vmatpush.bf16.msra.mxu2 %v7410_v38  ;;  %v10047_v24 = vld [vmem:[#allocation8 + $0x91c] sm:$0xf]  ;;  %v7602_v9 = vor.u32 %v9983_v17, %v7599_v18  ;;  %4732 = vmatpush.bf16.msrb.mxu0 %v7890_v16 }
 0x320   :  { %4673 = vmatmul.bf16.vlgmr.msrb.gmra.mxu3 %v10945_v14  ;;  %v7855_v49 = vld [vmem:[#allocation8 + $0x938] sm:$0xf0] }
 0x321   :  { %4717 = vmatpush.bf16.msra.mxu3 %v7698_v44  ;;  %4693 = vmatpush.bf16.msra.mxu1 %v7122_v51  ;;  %v9839_v26 = vld [vmem:[#allocation8 + $0x29c] sm:$0xf]  ;;  %v7858_v30 = vor.u32 %v10047_v24, %v7855_v49  ;;  %v4453_v44 = vpop.f32.mrf.mxu2 }
 0x322   :  { %v7023_v23 = vld [vmem:[#allocation8 + $0x2b8] sm:$0xf0]  ;;  %v4454_v62 = vadd.f32 %v4453_v44, %v968_v42 }
 0x323   :  { %4706 = vmatpush.bf16.msra.mxu2 %v7378_v56  ;;  %v9903_v27 = vld [vmem:[#allocation8 + $0x49c] sm:$0xf]  ;;  %v7026_v38 = vor.u32 %v9839_v26, %v7023_v23  ;;  %4733 = vmatpush.bf16.msrb.mxu0 %v7858_v30 }
 0x324   :  { %v7279_v28 = vld [vmem:[#allocation8 + $0x4b8] sm:$0xf0] }
 0x325   :  { %4718 = vmatpush.bf16.msra.mxu3 %v7666_v4  ;;  %4694 = vmatpush.bf16.msra.mxu1 %v7090_v5  ;;  %v9975_v32 = vld [vmem:[#allocation8 + $0x6dc] sm:$0xf]  ;;  %v7282_v33 = vor.u32 %v9903_v27, %v7279_v28 }
 0x326   :  { %v7567_v36 = vld [vmem:[#allocation8 + $0x6f8] sm:$0xf0] }
 0x327   :  { %4707 = vmatpush.bf16.msra.mxu2 %v7346_v7  ;;  %v10039_v22 = vld [vmem:[#allocation8 + $0x8dc] sm:$0xf]  ;;  %v7570_v46 = vor.u32 %v9975_v32, %v7567_v36  ;;  %v4466_v7 = vpop.f32.mrf.mxu3 }
 0x328   :  { %v7823_v0 = vld [vmem:[#allocation8 + $0x8f8] sm:$0xf0]  ;;  %v4467_v50 = vadd.f32 %v4466_v7, %v4454_v62 }
 0x329   :  { %4719 = vmatpush.bf16.msra.mxu3 %v7634_v10  ;;  %4695 = vmatpush.bf16.msra.mxu1 %v7058_v21  ;;  %v9831_v39 = vld [vmem:[#allocation8 + $0x25c] sm:$0xf]  ;;  %v7826_v51 = vor.u32 %v10039_v22, %v7823_v0  ;;  %v4455_v49 = vpop.f32.mrf.mxu2 }
 0x32a   :  { %v6991_v41 = vld [vmem:[#allocation8 + $0x278] sm:$0xf0]  ;;  %v11049_v30 = vadd.f32 %v4479_v45, %v4467_v50 }
 0x32b   :  { %4708 = vmatpush.bf16.msra.mxu2 %v7314_v25  ;;  %v9895_v47 = vld [vmem:[#allocation8 + $0x45c] sm:$0xf]  ;;  %v6994_v56 = vor.u32 %v9831_v39, %v6991_v41  ;;  %4734 = vmatpush.bf16.msrb.mxu0 %v7826_v51  ;;  %v4481_v25 = vpop.f32.mrf.mxu0 }
 0x32c   :  { %v7247_v12 = vld [vmem:[#allocation8 + $0x478] sm:$0xf0] }
 0x32d   :  { %4720 = vmatpush.bf16.msra.mxu3 %v7602_v9  ;;  %v9967_v52 = vld [vmem:[#allocation8 + $0x69c] sm:$0xf]  ;;  %4696 = vmatpush.bf16.msra.mxu1 %v7026_v38  ;;  %v7250_v59 = vor.u32 %v9895_v47, %v7247_v12 }
 0x32e   :  { %v7535_v53 = vld [vmem:[#allocation8 + $0x6b8] sm:$0xf0] }
 0x32f   :  { %v10031_v43 = vld [vmem:[#allocation8 + $0x89c] sm:$0xf]  ;;  %4709 = vmatpush.bf16.msra.mxu2 %v7282_v33  ;;  %v7538_v3 = vor.u32 %v9967_v52, %v7535_v53  ;;  %v4468_v40 = vpop.f32.mrf.mxu3 }
 0x330   :  { %v7791_v57 = vld [vmem:[#allocation8 + $0x8b8] sm:$0xf0] }
 0x331   :  { %v9823_v4 = vld [vmem:[#allocation8 + $0x21c] sm:$0xf]  ;;  %4721 = vmatpush.bf16.msra.mxu3 %v7570_v46  ;;  %v7794_v8 = vor.u32 %v10031_v43, %v7791_v57  ;;  %4697 = vmatpush.bf16.msra.mxu1 %v6994_v56 }
 0x332   :  { %v6959_v48 = vld [vmem:[#allocation8 + $0x238] sm:$0xf0] }
 0x333   :  { %v9887_v2 = vld [vmem:[#allocation8 + $0x41c] sm:$0xf]  ;;  %v6962_v13 = vor.u32 %v9823_v4, %v6959_v48  ;;  %4710 = vmatpush.bf16.msra.mxu2 %v7250_v59  ;;  %4735 = vmatpush.bf16.msrb.mxu0 %v7794_v8 }
 0x334   :  { %v7215_v63 = vld [vmem:[#allocation8 + $0x438] sm:$0xf0] }
 0x335   :  { %v10135_v5 = vld [vmem:[#allocation8 + $0xbdc] sm:$0xf]  ;;  %v7218_v18 = vor.u32 %v9887_v2, %v7215_v63  ;;  %4722 = vmatpush.bf16.msra.mxu3 %v7538_v3  ;;  %4698 = vmatpush.bf16.msra.mxu1 %v6962_v13 }
 0x336   :  { %v8207_v6 = vld [vmem:[#allocation8 + $0xbf8] sm:$0xf0] }
 0x337   :  { %v10199_v34 = vld [vmem:[#allocation8 + $0xddc] sm:$0xf]  ;;  %v8210_v21 = vor.u32 %v10135_v5, %v8207_v6  ;;  %4711 = vmatpush.bf16.msra.mxu2 %v7218_v18 }
 0x338   :  { %v8463_v58 = vld [vmem:[#allocation8 + $0xdf8] sm:$0xf0]  ;;  %4699 = vmatmul.bf16.vlgmr.msra.gmra.mxu1 %v10915_v54 }
 0x339   :  { %v9959_v10 = vld [vmem:[#allocation8 + $0x65c] sm:$0xf]  ;;  %v8466_v26 = vor.u32 %v10199_v34, %v8463_v58  ;;  %4743 = vmatpush.bf16.msrb.mxu1 %v8210_v21 }
 0x33a   :  { %v7503_v11 = vld [vmem:[#allocation8 + $0x678] sm:$0xf0]  ;;  %4712 = vmatmul.bf16.vlgmr.msra.gmra.mxu2 %v10919_v15 }
 0x33b   :  { %v10023_v16 = vld [vmem:[#allocation8 + $0x85c] sm:$0xf]  ;;  %v7506_v23 = vor.u32 %v9959_v10, %v7503_v11  ;;  %4756 = vmatpush.bf16.msrb.mxu2 %v8466_v26 }
 0x33c   :  { %v7759_v17 = vld [vmem:[#allocation8 + $0x878] sm:$0xf0] }
 0x33d   :  { %v10127_v24 = vld [vmem:[#allocation8 + $0xb9c] sm:$0xf]  ;;  %v7762_v32 = vor.u32 %v10023_v16, %v7759_v17  ;;  %4723 = vmatpush.bf16.msra.mxu3 %v7506_v23  ;;  %v11055_v16 = vld [vmem:[#allocation10] sm:$0xff] }
 0x33e   :  { %v8175_v9 = vld [vmem:[#allocation8 + $0xbb8] sm:$0xf0] }
 0x33f   :  { %v10191_v27 = vld [vmem:[#allocation8 + $0xd9c] sm:$0xf]  ;;  %v8178_v41 = vor.u32 %v10127_v24, %v8175_v9  ;;  %4736 = vmatpush.bf16.msrb.mxu0 %v7762_v32  ;;  %v11057_v24 = vpop.f32.mrf.mxu1  ;;  %v4808_v9 = vperm.slane %v11055_v16, 0 }
 0x340   :  { %v8431_v28 = vld [vmem:[#allocation8 + $0xdb8] sm:$0xf0] }
 0x341   :  { %v9951_v36 = vld [vmem:[#allocation8 + $0x61c] sm:$0xf]  ;;  %v8434_v46 = vor.u32 %v10191_v27, %v8431_v28  ;;  %4744 = vmatpush.bf16.msrb.mxu1 %v8178_v41 }
 0x342   :  { %v7471_v38 = vld [vmem:[#allocation8 + $0x638] sm:$0xf0] }
 0x343   :  { %v10015_v22 = vld [vmem:[#allocation8 + $0x81c] sm:$0xf]  ;;  %v7474_v47 = vor.u32 %v9951_v36, %v7471_v38  ;;  %4757 = vmatpush.bf16.msrb.mxu2 %v8434_v46  ;;  %v4852_v36 = vperm.slane %v11055_v16, 1 }
 0x344   :  { %v7727_v0 = vld [vmem:[#allocation8 + $0x838] sm:$0xf0] }
 0x345   :  { %v10263_v33 = vld [vmem:[#allocation8 + $0xfdc] sm:$0xf]  ;;  %v7730_v51 = vor.u32 %v10015_v22, %v7727_v0  ;;  %4724 = vmatpush.bf16.msra.mxu3 %v7474_v47 }
 0x346   :  { %v8719_v39 = vld [vmem:[#allocation8 + $0xff8] sm:$0xf0] }
 0x347   :  { %v10327_v42 = vld [vmem:[#allocation8 + $0x11dc] sm:$0xf]  ;;  %v8722_v52 = vor.u32 %v10263_v33, %v8719_v39  ;;  %4737 = vmatpush.bf16.msrb.mxu0 %v7730_v51  ;;  %v11061_v33 = vpop.permute.xlu0 %4801  ;;  %v4809_v39 = vperm.slane %v11055_v16, 4 }
 0x348   :  { %v8975_v44 = vld [vmem:[#allocation8 + $0x11f8] sm:$0xf0]  ;;  %4725 = vmatmul.bf16.vlgmr.msra.gmra.mxu3 %v10922_v20 }
 0x349   :  { %v10119_v45 = vld [vmem:[#allocation8 + $0xb5c] sm:$0xf]  ;;  %v8978_v43 = vor.u32 %v10327_v42, %v8975_v44  ;;  %4769 = vmatpush.bf16.msrb.mxu3 %v8722_v52 }
 0x34a   :  { %v8143_v12 = vld [vmem:[#allocation8 + $0xb78] sm:$0xf0]  ;;  %4738 = vmatmul.bf16.vlgmr.msrb.gmra.mxu0 %v10931_v60 }
 0x34b   :  { %v10183_v53 = vld [vmem:[#allocation8 + $0xd5c] sm:$0xf]  ;;  %v8146_v59 = vor.u32 %v10119_v45, %v8143_v12  ;;  %4782 = vmatpush.bf16.msra.mxu0 %v8978_v43  ;;  %v4824_v12 = vperm.slane %v4808_v9, 0  ;;  %v11068_v43 = vpop.f32.mrf.mxu0 }
 0x34c   :  { %v8399_v56 = vld [vmem:[#allocation8 + $0xd78] sm:$0xf0] }
 0x34d   :  { %v10255_v57 = vld [vmem:[#allocation8 + $0xf9c] sm:$0xf]  ;;  %v8402_v63 = vor.u32 %v10183_v53, %v8399_v56  ;;  %4745 = vmatpush.bf16.msrb.mxu1 %v8146_v59  ;;  %v11064_v53 = vperm.slane %v4852_v36, 1  ;;  %v11066_v56 = vpop.f32.mrf.mxu2 }
 0x34e   :  { %v8687_v4 = vld [vmem:[#allocation8 + $0xfb8] sm:$0xf0] }
 0x34f   :  { %v10319_v48 = vld [vmem:[#allocation8 + $0x119c] sm:$0xf]  ;;  %v8690_v54 = vor.u32 %v10255_v57, %v8687_v4  ;;  %4758 = vmatpush.bf16.msrb.mxu2 %v8402_v63  ;;  %v4853_v63 = vperm.slane %v11055_v16, 5 }
 0x350   :  { %v8943_v2 = vld [vmem:[#allocation8 + $0x11b8] sm:$0xf0] }
 0x351   :  { %v10111_v62 = vld [vmem:[#allocation8 + $0xb1c] sm:$0xf]  ;;  %v8946_v34 = vor.u32 %v10319_v48, %v8943_v2  ;;  %4770 = vmatpush.bf16.msrb.mxu3 %v8690_v54  ;;  %v4896_v48 = vperm.slane %v11055_v16, 2  ;;  %v4825_v2 = vperm.slane %v4809_v39, 0  ;;  %v4869_v9 = vperm.slane %v4853_v63, 1 }
 0x352   :  { %v8111_v3 = vld [vmem:[#allocation8 + $0xb38] sm:$0xf0] }
 0x353   :  { %v10175_v5 = vld [vmem:[#allocation8 + $0xd1c] sm:$0xf]  ;;  %v8114_v8 = vor.u32 %v10111_v62, %v8111_v3  ;;  %4783 = vmatpush.bf16.msra.mxu0 %v8946_v34  ;;  %v4494_v62 = vpop.f32.mrf.mxu1  ;;  %v11077_v36 = vperm.slane %v4896_v48, 2 }
 0x354   :  { %v8367_v6 = vld [vmem:[#allocation8 + $0xd38] sm:$0xf0] }
 0x355   :  { %v10247_v15 = vld [vmem:[#allocation8 + $0xf5c] sm:$0xf]  ;;  %v8370_v11 = vor.u32 %v10175_v5, %v8367_v6  ;;  %4746 = vmatpush.bf16.msrb.mxu1 %v8114_v8  ;;  %v11072_v6 = vld [vmem:[#allocation10 + $0x8] sm:$0xff] }
 0x356   :  { %v8655_v7 = vld [vmem:[#allocation8 + $0xf78] sm:$0xf0]  ;;  %v4810_v39 = vperm.slane %v11072_v6, 0 }
 0x357   :  { %v10311_v58 = vld [vmem:[#allocation8 + $0x115c] sm:$0xf]  ;;  %v8658_v17 = vor.u32 %v10247_v15, %v8655_v7  ;;  %4759 = vmatpush.bf16.msrb.mxu2 %v8370_v11 }
 0x358   :  { %v8911_v10 = vld [vmem:[#allocation8 + $0x1178] sm:$0xf0] }
 0x359   :  { %v10103_v50 = vld [vmem:[#allocation8 + $0xadc] sm:$0xf]  ;;  %v8914_v20 = vor.u32 %v10311_v58, %v8911_v10  ;;  %4771 = vmatpush.bf16.msrb.mxu3 %v8658_v17  ;;  %v9065_v17 = vld [vmem:[#allocation13 + $0xa8] sm:$0xf] }
 0x35a   :  { %v8079_v13 = vld [vmem:[#allocation8 + $0xaf8] sm:$0xf0] }
 0x35b   :  { %v10167_v18 = vld [vmem:[#allocation8 + $0xcdc] sm:$0xf]  ;;  %v8082_v26 = vor.u32 %v10103_v50, %v8079_v13  ;;  %4784 = vmatpush.bf16.msra.mxu0 %v8914_v20  ;;  %v11074_v20 = vpop.f32.mrf.mxu3 }
 0x35c   :  { %v8335_v21 = vld [vmem:[#allocation8 + $0xcf8] sm:$0xf0] }
 0x35d   :  { %v10239_v49 = vld [vmem:[#allocation8 + $0xf1c] sm:$0xf]  ;;  %v8338_v27 = vor.u32 %v10167_v18, %v8335_v21  ;;  %4747 = vmatpush.bf16.msrb.mxu1 %v8082_v26  ;;  %v9161_v21 = vld [vmem:[#allocation13 + $0x168] sm:$0xf] }
 0x35e   :  { %v8623_v25 = vld [vmem:[#allocation8 + $0xf38] sm:$0xf0] }
 0x35f   :  { %v10303_v23 = vld [vmem:[#allocation8 + $0x111c] sm:$0xf]  ;;  %v8626_v38 = vor.u32 %v10239_v49, %v8623_v25  ;;  %4760 = vmatpush.bf16.msrb.mxu2 %v8338_v27 }
 0x360   :  { %v8879_v60 = vld [vmem:[#allocation8 + $0x1138] sm:$0xf0] }
 0x361   :  { %v10095_v28 = vld [vmem:[#allocation8 + $0xa9c] sm:$0xf]  ;;  %v8882_v41 = vor.u32 %v10303_v23, %v8879_v60  ;;  %4772 = vmatpush.bf16.msrb.mxu3 %v8626_v38  ;;  %v4832_v60 = vmul.f32 %v4824_v12, %v11061_v33  ;;  %v11079_v38 = vpop.permute.xlu1 %4893 }
 0x362   :  { %v8047_v32 = vld [vmem:[#allocation8 + $0xab8] sm:$0xf0] }
 0x363   :  { %v10159_v22 = vld [vmem:[#allocation8 + $0xc9c] sm:$0xf]  ;;  %v8050_v46 = vor.u32 %v10095_v28, %v8047_v32  ;;  %4785 = vmatpush.bf16.msra.mxu0 %v8882_v41 }
 0x364   :  { %v8303_v0 = vld [vmem:[#allocation8 + $0xcb8] sm:$0xf0] }
 0x365   :  { %v10231_v42 = vld [vmem:[#allocation8 + $0xedc] sm:$0xf]  ;;  %v8306_v40 = vor.u32 %v10159_v22, %v8303_v0  ;;  %4748 = vmatpush.bf16.msrb.mxu1 %v8050_v46  ;;  %v11081_v22 = vpop.permute.xlu0 %4849  ;;  %v4897_v0 = vperm.slane %v11055_v16, 6  ;;  %v4507_v46 = vpop.f32.mrf.mxu2 }
 0x366   :  { %v8591_v44 = vld [vmem:[#allocation8 + $0xef8] sm:$0xf0] }
 0x367   :  { %v10295_v47 = vld [vmem:[#allocation8 + $0x10dc] sm:$0xf]  ;;  %v8594_v57 = vor.u32 %v10231_v42, %v8591_v44  ;;  %4761 = vmatpush.bf16.msrb.mxu2 %v8306_v40  ;;  %v9053_v44 = vld [vmem:[#allocation13 + $0x90] sm:$0xf]  ;;  %v10351_v40 = vld [vmem:[#allocation13 + $0x98] sm:$0xf0] }
 0x368   :  { %v8847_v45 = vld [vmem:[#allocation8 + $0x10f8] sm:$0xf0] }
 0x369   :  { %v10087_v51 = vld [vmem:[#allocation8 + $0xa5c] sm:$0xf]  ;;  %v8850_v3 = vor.u32 %v10295_v47, %v8847_v45  ;;  %4773 = vmatpush.bf16.msrb.mxu3 %v8594_v57  ;;  %v4533_v47 = vpop.f32.mrf.mxu0  ;;  %v4833_v57 = vmul.f32 %v4825_v2, %v11061_v33  ;;  %v4940_v2 = vperm.slane %v11055_v16, 3 }
 0x36a   :  { %v8015_v52 = vld [vmem:[#allocation8 + $0xa78] sm:$0xf0]  ;;  %v11100_v47 = vpop.permute.xlu1 %4937 }
 0x36b   :  { %v10151_v4 = vld [vmem:[#allocation8 + $0xc5c] sm:$0xf]  ;;  %v8018_v34 = vor.u32 %v10087_v51, %v8015_v52  ;;  %4786 = vmatpush.bf16.msra.mxu0 %v8850_v3  ;;  %v9149_v51 = vld [vmem:[#allocation13 + $0x150] sm:$0xf]  ;;  %v10375_v52 = vld [vmem:[#allocation13 + $0x158] sm:$0xf0] }
 0x36c   :  { %v8271_v59 = vld [vmem:[#allocation8 + $0xc78] sm:$0xf0]  ;;  %v9257_v3 = vld [vmem:[#allocation13 + $0x228] sm:$0xf]  ;;  %v4956_v46 = vperm.slane %v4940_v2, 3 }
 0x36d   :  { %v10223_v54 = vld [vmem:[#allocation8 + $0xe9c] sm:$0xf]  ;;  %v8274_v58 = vor.u32 %v10151_v4, %v8271_v59  ;;  %4749 = vmatpush.bf16.msrb.mxu1 %v8018_v34  ;;  %v4876_v34 = vmul.f32 %v11064_v53, %v11081_v22  ;;  %v4941_v53 = vperm.slane %v11055_v16, 7 }
 0x36e   :  { %v8559_v5 = vld [vmem:[#allocation8 + $0xeb8] sm:$0xf0] }
 0x36f   :  { %v10287_v15 = vld [vmem:[#allocation8 + $0x109c] sm:$0xf]  ;;  %v8562_v13 = vor.u32 %v10223_v54, %v8559_v5  ;;  %4762 = vmatpush.bf16.msrb.mxu2 %v8274_v58  ;;  %v4840_v5 = vadd.f32 %v4832_v60, %v10970_v29  ;;  %v4877_v58 = vmul.f32 %v4869_v9, %v11081_v22  ;;  %v4841_v29 = vadd.f32 %v4833_v57, %v10987_v61 }
 0x370   :  { %v8815_v7 = vld [vmem:[#allocation8 + $0x10b8] sm:$0xf0]  ;;  %v4854_v60 = vperm.slane %v11072_v6, 1  ;;  %v4811_v61 = vperm.slane %v11072_v6, 4 }
 0x371   :  { %v10079_v8 = vld [vmem:[#allocation8 + $0xa1c] sm:$0xf]  ;;  %v8818_v49 = vor.u32 %v10287_v15, %v8815_v7  ;;  %4774 = vmatpush.bf16.msrb.mxu3 %v8562_v13  ;;  %v9054_v15 = vor.u32 %v10351_v40, %v9053_v44  ;;  %v9353_v7 = vld [vmem:[#allocation13 + $0x2e8] sm:$0xf]  ;;  %v9041_v13 = vld [vmem:[#allocation13 + $0x78] sm:$0xf] }
 0x372   :  { %v7983_v10 = vld [vmem:[#allocation8 + $0xa38] sm:$0xf0]  ;;  %v10345_v44 = vld [vmem:[#allocation13 + $0x68] sm:$0xf0]  ;;  %v4898_v40 = vperm.slane %v11072_v6, 2 }
 0x373   :  { %v10143_v11 = vld [vmem:[#allocation8 + $0xc1c] sm:$0xf]  ;;  %v7986_v27 = vor.u32 %v10079_v8, %v7983_v10  ;;  %4787 = vmatpush.bf16.msra.mxu0 %v8818_v49  ;;  %v4913_v10 = vperm.slane %v4897_v0, 2  ;;  %v10423_v0 = vld [vmem:[#allocation13 + $0x2d8] sm:$0xf0] }
 0x374   :  { %v8239_v50 = vld [vmem:[#allocation8 + $0xc38] sm:$0xf0] }
 0x375   :  { %v10354_v18 = vld [vmem:[#allocation13 + $0xb0] sm:$0xf0]  ;;  %v8242_v41 = vor.u32 %v10143_v11, %v8239_v50  ;;  %4750 = vmatpush.bf16.msrb.mxu1 %v7986_v27  ;;  %v9150_v11 = vor.u32 %v10375_v52, %v9149_v51  ;;  %v9245_v27 = vld [vmem:[#allocation13 + $0x210] sm:$0xf]  ;;  %v9125_v52 = vld [vmem:[#allocation13 + $0x120] sm:$0xf] }
 0x376   :  { %v10378_v25 = vld [vmem:[#allocation13 + $0x170] sm:$0xf0]  ;;  %v9066_v42 = vor.u32 %v10354_v18, %v9065_v17  ;;  %v10348_v17 = vld [vmem:[#allocation13 + $0x80] sm:$0xf0]  ;;  %v4520_v18 = vpop.f32.mrf.mxu3 }
 0x377   :  { %v10215_v26 = vld [vmem:[#allocation8 + $0xe5c] sm:$0xf]  ;;  %v9162_v45 = vor.u32 %v10378_v25, %v9161_v21  ;;  %4763 = vmatpush.bf16.msrb.mxu2 %v8242_v41  ;;  %v9137_v25 = vld [vmem:[#allocation13 + $0x138] sm:$0xf]  ;;  %v9042_v16 = vor.u32 %v10348_v17, %v9041_v13  ;;  %v4921_v41 = vmul.f32 %v4913_v10, %v11079_v38  ;;  %v11112_v18 = vpop.f32.mrf.mxu1 }
 0x378   :  { %v8527_v23 = vld [vmem:[#allocation8 + $0xe78] sm:$0xf0]  ;;  %4751 = vmatmul.bf16.vlgmr.msrb.gmra.mxu1 %v10933_v1  ;;  %v4920_v1 = vmul.f32 %v11077_v36, %v11079_v38  ;;  %v10369_v36 = vld [vmem:[#allocation13 + $0x128] sm:$0xf0] }
 0x379   :  { %v10279_v28 = vld [vmem:[#allocation8 + $0x105c] sm:$0xf]  ;;  %v8530_v12 = vor.u32 %v10215_v26, %v8527_v23  ;;  %6284 = vmatpush.bf16.msra.mxu1 %v9066_v42  ;;  %v10372_v26 = vld [vmem:[#allocation13 + $0x140] sm:$0xf0]  ;;  %v4826_v23 = vperm.slane %v4810_v39, 0 }
 0x37a   :  { %v8783_v32 = vld [vmem:[#allocation8 + $0x1078] sm:$0xf0]  ;;  %4764 = vmatmul.bf16.vlgmr.msrb.gmra.mxu2 %v10939_v31  ;;  %v9138_v39 = vor.u32 %v10372_v26, %v9137_v25  ;;  %v9029_v42 = vld [vmem:[#allocation13 + $0x60] sm:$0xf]  ;;  %v4884_v31 = vadd.f32 %v4876_v34, %v4840_v5  ;;  %v9329_v5 = vld [vmem:[#allocation13 + $0x2b8] sm:$0xf] }
 0x37b   :  { %v8786_v4 = vor.u32 %v10279_v28, %v8783_v32  ;;  %v10207_v59 = vld [vmem:[#allocation8 + $0xe1c] sm:$0xf]  ;;  %6297 = vmatpush.bf16.msra.mxu2 %v9162_v45  ;;  %4775 = vmatpush.bf16.msrb.mxu3 %v8530_v12  ;;  %v10399_v28 = vld [vmem:[#allocation13 + $0x218] sm:$0xf0]  ;;  %v9341_v32 = vld [vmem:[#allocation13 + $0x2d0] sm:$0xf]  ;;  %v4885_v45 = vadd.f32 %v4877_v58, %v4841_v29  ;;  %v4834_v57 = vmul.f32 %v4826_v23, %v11061_v33 }
 0x37c   :  { %v8495_v48 = vld [vmem:[#allocation8 + $0xe38] sm:$0xf0]  ;;  %v4957_v12 = vperm.slane %v4941_v53, 3  ;;  %v9246_v51 = vor.u32 %v10399_v28, %v9245_v27  ;;  %v10420_v34 = vld [vmem:[#allocation13 + $0x2c0] sm:$0xf0]  ;;  %v4928_v2 = vadd.f32 %v4920_v1, %v4884_v31  ;;  %v4964_v58 = vmul.f32 %v4956_v46, %v11100_v47 }
 0x37d   :  { %v10271_v63 = vld [vmem:[#allocation8 + $0x101c] sm:$0xf]  ;;  %v8498_v50 = vor.u32 %v10207_v59, %v8495_v48  ;;  %4788 = vmatpush.bf16.msra.mxu0 %v8786_v4  ;;  %6285 = vmatpush.bf16.msra.mxu1 %v9054_v15  ;;  %v4870_v4 = vperm.slane %v4854_v60, 1  ;;  %v9342_v59 = vor.u32 %v10423_v0, %v9341_v32  ;;  %v9233_v48 = vld [vmem:[#allocation13 + $0x1f8] sm:$0xf]  ;;  %v9126_v15 = vor.u32 %v10369_v36, %v9125_v52 }
 0x37e   :  { %v8751_v62 = vld [vmem:[#allocation8 + $0x1038] sm:$0xf0]  ;;  %v4929_v10 = vadd.f32 %v4921_v41, %v4885_v45  ;;  %v4842_v29 = vadd.f32 %v4834_v57, %v11008_v35  ;;  %v10393_v25 = vld [vmem:[#allocation13 + $0x1e8] sm:$0xf0]  ;;  %v4899_v60 = vperm.slane %v11072_v6, 6  ;;  %v4943_v46 = vperm.slane %v11072_v6, 7 }
 0x37f   :  { %v10402_v54 = vld [vmem:[#allocation13 + $0x230] sm:$0xf0]  ;;  %v8754_v21 = vor.u32 %v10271_v63, %v8751_v62  ;;  %6298 = vmatpush.bf16.msra.mxu2 %v9150_v11  ;;  %4776 = vmatpush.bf16.msrb.mxu3 %v8498_v50  ;;  %v10396_v63 = vld [vmem:[#allocation13 + $0x200] sm:$0xf0]  ;;  %v4827_v62 = vperm.slane %v4811_v61, 0  ;;  %v4965_v11 = vmul.f32 %v4957_v12, %v11100_v47  ;;  %v4914_v50 = vperm.slane %v4898_v40, 2 }
 0x380   :  { %v10426_v8 = vld [vmem:[#allocation13 + $0x2f0] sm:$0xf0]  ;;  %v9258_v49 = vor.u32 %v10402_v54, %v9257_v3  ;;  %v4855_v3 = vperm.slane %v11072_v6, 5  ;;  %v9030_v54 = vor.u32 %v10345_v44, %v9029_v42  ;;  %v9234_v13 = vor.u32 %v10396_v63, %v9233_v48  ;;  %v9317_v27 = vld [vmem:[#allocation13 + $0x2a0] sm:$0xf] }
 0x381   :  { %v9354_v9 = vor.u32 %v10426_v8, %v9353_v7  ;;  %4789 = vmatpush.bf16.msra.mxu0 %v8754_v21  ;;  %6286 = vmatpush.bf16.msra.mxu1 %v9042_v16  ;;  %v9017_v7 = vld [vmem:[#allocation13 + $0x48] sm:$0xf]  ;;  %v10342_v8 = vld [vmem:[#allocation13 + $0x50] sm:$0xf0]  ;;  %v4878_v53 = vmul.f32 %v4870_v4, %v11081_v22  ;;  %v9330_v21 = vor.u32 %v10420_v34, %v9329_v5  ;;  %v10417_v28 = vld [vmem:[#allocation13 + $0x2a8] sm:$0xf0] }
 0x382   :  { %4777 = vmatmul.bf16.vlgmr.msrb.gmra.mxu3 %v10941_v37  ;;  %v9113_v37 = vld [vmem:[#allocation13 + $0x108] sm:$0xf]  ;;  %v10366_v17 = vld [vmem:[#allocation13 + $0x110] sm:$0xf0]  ;;  %v4835_v26 = vmul.f32 %v4827_v62, %v11061_v33  ;;  %v4871_v23 = vperm.slane %v4855_v3, 1  ;;  %v11116_v32 = vadd.f32 %v4965_v11, %v4929_v10  ;;  %v4922_v0 = vmul.f32 %v4914_v50, %v11079_v38  ;;  %v4546_v10 = vpop.f32.mrf.mxu1 }
 0x383   :  { %6310 = vmatpush.bf16.msra.mxu3 %v9258_v49  ;;  %6299 = vmatpush.bf16.msra.mxu2 %v9138_v39  ;;  %v9221_v49 = vld [vmem:[#allocation13 + $0x1e0] sm:$0xf]  ;;  %v9114_v35 = vor.u32 %v10366_v17, %v9113_v37  ;;  %v9005_v61 = vld [vmem:[#allocation13 + $0x30] sm:$0xf]  ;;  %v10339_v16 = vld [vmem:[#allocation13 + $0x38] sm:$0xf0]  ;;  %v11119_v42 = vadd.f32 %v4964_v58, %v4928_v2  ;;  %v4886_v44 = vadd.f32 %v4878_v53, %v4842_v29 }
 0x384   :  { %4790 = vmatmul.bf16.vlgmr.msra.gmra.mxu0 %v10945_v14  ;;  %v4942_v14 = vperm.slane %v11072_v6, 3  ;;  %v9222_v1 = vor.u32 %v10393_v25, %v9221_v49  ;;  %v9101_v41 = vld [vmem:[#allocation13 + $0xf0] sm:$0xf]  ;;  %v10363_v39 = vld [vmem:[#allocation13 + $0xf8] sm:$0xf0]  ;;  %v9318_v45 = vor.u32 %v10417_v28, %v9317_v27  ;;  %v4879_v52 = vmul.f32 %v4871_v23, %v11081_v22  ;;  %v11125_v6 = vpop.f32.mrf.mxu2  ;;  %v11131_v58 = vld [vmem:[#allocation10 + $0x10] sm:$0xff] }
 0x385   :  { %6323 = vmatpush.bf16.msrb.mxu0 %v9354_v9  ;;  %6287 = vmatpush.bf16.msra.mxu1 %v9030_v54  ;;  %v9018_v9 = vor.u32 %v10342_v8, %v9017_v7  ;;  %v9209_v12 = vld [vmem:[#allocation13 + $0x1c8] sm:$0xf]  ;;  %v10390_v40 = vld [vmem:[#allocation13 + $0x1d0] sm:$0xf0]  ;;  %v4915_v36 = vperm.slane %v4899_v60, 2  ;;  %v9006_v57 = vor.u32 %v10339_v16, %v9005_v61  ;;  %v9102_v48 = vor.u32 %v10363_v39, %v9101_v41  ;;  %v11127_v54 = vpop.f32.mrf.mxu0  ;;  %v11138_v16 = vpop.f32.mrf.mxu3 }
 0x386   :  { %v4958_v31 = vperm.slane %v4942_v14, 3  ;;  %v9305_v4 = vld [vmem:[#allocation13 + $0x288] sm:$0xf]  ;;  %v8993_v63 = vld [vmem:[#allocation13 + $0x18] sm:$0xf]  ;;  %v4981_v3 = vmax.f32 %v11116_v32, 0.0  ;;  %v9210_v5 = vor.u32 %v10390_v40, %v9209_v12  ;;  %v4930_v7 = vadd.f32 %v4922_v0, %v4886_v44 }
 0x387   :  { %6311 = vmatpush.bf16.msra.mxu3 %v9246_v51  ;;  %6300 = vmatpush.bf16.msra.mxu2 %v9126_v15  ;;  %v4843_v51 = vadd.f32 %v4835_v26, %v11023_v55  ;;  %v10336_v62 = vld [vmem:[#allocation13 + $0x20] sm:$0xf0]  ;;  %v9089_v55 = vld [vmem:[#allocation13 + $0xd8] sm:$0xf]  ;;  %v4980_v15 = vmax.f32 %v11119_v42, 0.0  ;;  %v4959_v2 = vperm.slane %v4943_v46, 3  ;;  %v4923_v17 = vmul.f32 %v4915_v36, %v11079_v38 }
 0x388   :  { %v10360_v34 = vld [vmem:[#allocation13 + $0xe0] sm:$0xf0]  ;;  %v4966_v8 = vmul.f32 %v4958_v31, %v11100_v47  ;;  %v9197_v50 = vld [vmem:[#allocation13 + $0x1b0] sm:$0xf]  ;;  %v8994_v29 = vor.u32 %v10336_v62, %v8993_v63  ;;  %v10411_v14 = vld [vmem:[#allocation13 + $0x278] sm:$0xf0]  ;;  %v4493_v61 = vadd.f32 %v11057_v24, %v11049_v30 }
 0x389   :  { %6324 = vmatpush.bf16.msrb.mxu0 %v9342_v59  ;;  %6288 = vmatpush.bf16.msra.mxu1 %v9018_v9  ;;  %v10414_v59 = vld [vmem:[#allocation13 + $0x290] sm:$0xf0]  ;;  %v4887_v37 = vadd.f32 %v4879_v52, %v4843_v51  ;;  %v9293_v53 = vld [vmem:[#allocation13 + $0x270] sm:$0xf]  ;;  %v9090_v49 = vor.u32 %v10360_v34, %v9089_v55  ;;  %v10333_v25 = vld [vmem:[#allocation13 + $0x8] sm:$0xf0]  ;;  %v4967_v31 = vmul.f32 %v4959_v2, %v11100_v47 }
 0x38a   :  { %v9306_v11 = vor.u32 %v10414_v59, %v9305_v4  ;;  %v9077_v26 = vld [vmem:[#allocation13 + $0xc0] sm:$0xf]  ;;  %v10357_v23 = vld [vmem:[#allocation13 + $0xc8] sm:$0xf0]  ;;  %v9449_v9 = vld [vmem:[#allocation13 + $0x3a8] sm:$0xf]  ;;  %v9294_v0 = vor.u32 %v10411_v14, %v9293_v53  ;;  %v4506_v51 = vadd.f32 %v11066_v56, %v4493_v61  ;;  %v11148_v10 = vpack.c.bf16 %v4980_v15, %v4980_v15 }
 0x38b   :  { %6312 = vmatpush.bf16.msra.mxu3 %v9234_v13  ;;  %6301 = vmatpush.bf16.msra.mxu2 %v9114_v35  ;;  %v10387_v13 = vld [vmem:[#allocation13 + $0x1b8] sm:$0xf0]  ;;  %v10450_v27 = vld [vmem:[#allocation13 + $0x3b0] sm:$0xf0]  ;;  %v9545_v28 = vld [vmem:[#allocation13 + $0x468] sm:$0xf]  ;;  %v11134_v35 = vadd.f32 %v4966_v8, %v4930_v7  ;;  %v4931_v44 = vadd.f32 %v4923_v17, %v4887_v37  ;;  %v9078_v24 = vor.u32 %v10357_v23, %v9077_v26 }
 0x38c   :  { %v9198_v60 = vor.u32 %v10387_v13, %v9197_v50  ;;  %v9185_v41 = vld [vmem:[#allocation13 + $0x198] sm:$0xf]  ;;  %v10384_v39 = vld [vmem:[#allocation13 + $0x1a0] sm:$0xf0]  ;;  %v4812_v46 = vperm.slane %v11131_v58, 0  ;;  %v4813_v30 = vperm.slane %v11131_v58, 4  ;;  %v9450_v52 = vor.u32 %v10450_v27, %v9449_v9 }
 0x38d   :  { %6325 = vmatpush.bf16.msrb.mxu0 %v9330_v21  ;;  %6289 = vmatpush.bf16.msra.mxu1 %v9006_v57  ;;  %v8981_v21 = vld [vmem:[#allocation13] sm:$0xf]  ;;  %v9281_v12 = vld [vmem:[#allocation13 + $0x258] sm:$0xf]  ;;  %v10408_v40 = vld [vmem:[#allocation13 + $0x260] sm:$0xf0]  ;;  %v4559_v57 = vpop.f32.mrf.mxu2  ;;  %v4585_v4 = vpop.f32.mrf.mxu0  ;;  %v4519_v55 = vadd.f32 %v11074_v20, %v4506_v51  ;;  %v4975_v2 = vadd.f32 %v4967_v31, %v4931_v44  ;;  %v11153_v37 = vpack.c.bf16 %v4981_v3, %v4981_v3 }
 0x38e   :  { %v9437_v36 = vld [vmem:[#allocation13 + $0x390] sm:$0xf]  ;;  %v10447_v63 = vld [vmem:[#allocation13 + $0x398] sm:$0xf0]  ;;  %v9282_v34 = vor.u32 %v10408_v40, %v9281_v12  ;;  %v9173_v7 = vld [vmem:[#allocation13 + $0x180] sm:$0xf] }
 0x38f   :  { %6313 = vmatpush.bf16.msra.mxu3 %v9222_v1  ;;  %6302 = vmatpush.bf16.msra.mxu2 %v9102_v48  ;;  %v10474_v1 = vld [vmem:[#allocation13 + $0x470] sm:$0xf0]  ;;  %v9186_v48 = vor.u32 %v10384_v39, %v9185_v41  ;;  %v9533_v62 = vld [vmem:[#allocation13 + $0x450] sm:$0xf]  ;;  %v10381_v56 = vld [vmem:[#allocation13 + $0x188] sm:$0xf0]  ;;  %v4532_v32 = vadd.f32 %v11068_v43, %v4519_v55 }
 0x390   :  { %v9546_v59 = vor.u32 %v10474_v1, %v9545_v28  ;;  %v9269_v8 = vld [vmem:[#allocation13 + $0x240] sm:$0xf]  ;;  %v9641_v50 = vld [vmem:[#allocation13 + $0x528] sm:$0xf]  ;;  %v10498_v13 = vld [vmem:[#allocation13 + $0x530] sm:$0xf0]  ;;  %v9174_v14 = vor.u32 %v10381_v56, %v9173_v7 }
 0x391   :  { %6326 = vmatpush.bf16.msrb.mxu0 %v9318_v45  ;;  %6290 = vmatpush.bf16.msra.mxu1 %v8994_v29  ;;  %v8982_v45 = vor.u32 %v10333_v25, %v8981_v21  ;;  %v4982_v20 = vmax.f32 %v11134_v35, 0.0  ;;  %v4856_v17 = vperm.slane %v11131_v58, 1  ;;  %v9438_v29 = vor.u32 %v10447_v63, %v9437_v36  ;;  %v9425_v21 = vld [vmem:[#allocation13 + $0x378] sm:$0xf]  ;;  %v4572_v25 = vpop.f32.mrf.mxu3  ;;  %v9629_v28 = vld [vmem:[#allocation13 + $0x510] sm:$0xf] }
 0x392   :  { %v4828_v53 = vperm.slane %v4812_v46, 0  ;;  %v4857_v42 = vperm.slane %v11131_v58, 5  ;;  %v4829_v3 = vperm.slane %v4813_v30, 0  ;;  %v9521_v23 = vld [vmem:[#allocation13 + $0x438] sm:$0xf]  ;;  %v9642_v9 = vor.u32 %v10498_v13, %v9641_v50  ;;  %v11178_v13 = vpop.f32.mrf.mxu1 }
 0x393   :  { %6314 = vmatpush.bf16.msra.mxu3 %v9210_v5  ;;  %6303 = vmatpush.bf16.msra.mxu2 %v9090_v49  ;;  %v10471_v5 = vld [vmem:[#allocation13 + $0x458] sm:$0xf0]  ;;  %v10444_v49 = vld [vmem:[#allocation13 + $0x380] sm:$0xf0]  ;;  %v4983_v27 = vmax.f32 %v4975_v2, 0.0  ;;  %v4872_v61 = vperm.slane %v4856_v17, 1  ;;  %v4545_v1 = vadd.f32 %v11112_v18, %v4532_v32  ;;  %v11163_v41 = vpack.c.bf16 %v4982_v20, %v4982_v20 }
 0x394   :  { %v9534_v15 = vor.u32 %v10471_v5, %v9533_v62  ;;  %v10495_v35 = vld [vmem:[#allocation13 + $0x518] sm:$0xf0]  ;;  %v9426_v43 = vor.u32 %v10444_v49, %v9425_v21  ;;  %v4836_v39 = vmul.f32 %v4828_v53, %v11061_v33  ;;  %v4873_v44 = vperm.slane %v4857_v42, 1  ;;  %v9413_v46 = vld [vmem:[#allocation13 + $0x360] sm:$0xf] }
 0x395   :  { %6327 = vmatpush.bf16.msrb.mxu0 %v9306_v11  ;;  %6291 = vmatpush.bf16.msra.mxu1 %v8982_v45  ;;  %v10405_v11 = vld [vmem:[#allocation13 + $0x248] sm:$0xf0]  ;;  %v4558_v12 = vadd.f32 %v11125_v6, %v4545_v1  ;;  %v4837_v40 = vmul.f32 %v4829_v3, %v11061_v33  ;;  %v4901_v51 = vperm.slane %v11131_v58, 6  ;;  %v9509_v18 = vld [vmem:[#allocation13 + $0x420] sm:$0xf]  ;;  %v4880_v4 = vmul.f32 %v4872_v61, %v11081_v22 }
 0x396   :  { %v9270_v26 = vor.u32 %v10405_v11, %v9269_v8  ;;  %v10441_v45 = vld [vmem:[#allocation13 + $0x368] sm:$0xf0]  ;;  %v9617_v36 = vld [vmem:[#allocation13 + $0x4f8] sm:$0xf]  ;;  %v10492_v57 = vld [vmem:[#allocation13 + $0x500] sm:$0xf0]  ;;  %v4881_v62 = vmul.f32 %v4873_v44, %v11081_v22  ;;  %v11186_v44 = vpop.f32.mrf.mxu0 }
 0x397   :  { %6315 = vmatpush.bf16.msra.mxu3 %v9198_v60  ;;  %6304 = vmatpush.bf16.msra.mxu2 %v9078_v24  ;;  %v10468_v60 = vld [vmem:[#allocation13 + $0x440] sm:$0xf0]  ;;  %v10465_v30 = vld [vmem:[#allocation13 + $0x428] sm:$0xf0]  ;;  %v9630_v24 = vor.u32 %v10495_v35, %v9629_v28  ;;  %v9414_v6 = vor.u32 %v10441_v45, %v9413_v46  ;;  %v4944_v63 = vperm.slane %v11131_v58, 3  ;;  %v4845_v7 = vadd.f32 %v4837_v40, %v4558_v12 }
 0x398   :  { %6292 = vmatmul.bf16.vlgmr.msra.gmra.mxu1 %v11148_v10  ;;  %v9522_v31 = vor.u32 %v10468_v60, %v9521_v23  ;;  %v9510_v5 = vor.u32 %v10465_v30, %v9509_v18  ;;  %v9401_v55 = vld [vmem:[#allocation13 + $0x348] sm:$0xf]  ;;  %v4917_v56 = vperm.slane %v4901_v51, 2  ;;  %v4945_v8 = vperm.slane %v11131_v58, 7  ;;  %v10462_v11 = vld [vmem:[#allocation13 + $0x410] sm:$0xf0] }
 0x399   :  { %6328 = vmatpush.bf16.msrb.mxu0 %v9294_v0  ;;  %6336 = vmatpush.bf16.msrb.mxu1 %v9450_v52  ;;  %v4900_v0 = vperm.slane %v11131_v58, 2  ;;  %v11169_v52 = vpack.c.bf16 %v4983_v27, %v4983_v27  ;;  %v9497_v2 = vld [vmem:[#allocation13 + $0x408] sm:$0xf]  ;;  %v9618_v50 = vor.u32 %v10492_v57, %v9617_v36  ;;  %v10489_v20 = vld [vmem:[#allocation13 + $0x4e8] sm:$0xf0]  ;;  %v4960_v42 = vperm.slane %v4944_v63, 3 }
 0x39a   :  { %6305 = vmatmul.bf16.vlgmr.msra.gmra.mxu2 %v11153_v37  ;;  %v10435_v21 = vld [vmem:[#allocation13 + $0x338] sm:$0xf0]  ;;  %v4889_v49 = vadd.f32 %v4881_v62, %v4845_v7  ;;  %v4925_v58 = vmul.f32 %v4917_v56, %v11079_v38  ;;  %v4961_v32 = vperm.slane %v4945_v8, 3  ;;  %v9485_v3 = vld [vmem:[#allocation13 + $0x3f0] sm:$0xf]  ;;  %v4598_v12 = vpop.f32.mrf.mxu1 }
 0x39b   :  { %6349 = vmatpush.bf16.msrb.mxu2 %v9546_v59  ;;  %6316 = vmatpush.bf16.msra.mxu3 %v9186_v48  ;;  %v4916_v59 = vperm.slane %v4900_v0, 2  ;;  %v4844_v48 = vadd.f32 %v4836_v39, %v11046_v19  ;;  %v9605_v19 = vld [vmem:[#allocation13 + $0x4e0] sm:$0xf]  ;;  %v10459_v25 = vld [vmem:[#allocation13 + $0x3f8] sm:$0xf0]  ;;  %v4968_v28 = vmul.f32 %v4960_v42, %v11100_v47  ;;  %v11184_v39 = vpop.f32.mrf.mxu2 }
 0x39c   :  { %v9593_v23 = vld [vmem:[#allocation13 + $0x4c8] sm:$0xf]  ;;  %v10486_v60 = vld [vmem:[#allocation13 + $0x4d0] sm:$0xf0]  ;;  %v9486_v35 = vor.u32 %v10459_v25, %v9485_v3  ;;  %v9377_v61 = vld [vmem:[#allocation13 + $0x318] sm:$0xf]  ;;  %v4933_v1 = vadd.f32 %v4925_v58, %v4889_v49 }
 0x39d   :  { %6329 = vmatpush.bf16.msrb.mxu0 %v9282_v34  ;;  %6337 = vmatpush.bf16.msrb.mxu1 %v9438_v29  ;;  %v10438_v34 = vld [vmem:[#allocation13 + $0x350] sm:$0xf0]  ;;  %v4888_v29 = vadd.f32 %v4880_v4, %v4844_v48  ;;  %v4924_v53 = vmul.f32 %v4916_v59, %v11079_v38  ;;  %v10432_v0 = vld [vmem:[#allocation13 + $0x320] sm:$0xf0]  ;;  %v9594_v45 = vor.u32 %v10486_v60, %v9593_v23  ;;  %v9581_v40 = vld [vmem:[#allocation13 + $0x4b0] sm:$0xf] }
 0x39e   :  { %v9402_v17 = vor.u32 %v10438_v34, %v9401_v55  ;;  %v10456_v46 = vld [vmem:[#allocation13 + $0x3e0] sm:$0xf0]  ;;  %v10483_v51 = vld [vmem:[#allocation13 + $0x4b8] sm:$0xf0]  ;;  %v9378_v18 = vor.u32 %v10432_v0, %v9377_v61  ;;  %v9365_v30 = vld [vmem:[#allocation13 + $0x300] sm:$0xf]  ;;  %v11188_v55 = vpop.f32.mrf.mxu3 }
 0x39f   :  { %6350 = vmatpush.bf16.msrb.mxu2 %v9534_v15  ;;  %6317 = vmatpush.bf16.msra.mxu3 %v9174_v14  ;;  %v9498_v15 = vor.u32 %v10462_v11, %v9497_v2  ;;  %v9389_v14 = vld [vmem:[#allocation13 + $0x330] sm:$0xf]  ;;  %v4932_v27 = vadd.f32 %v4924_v53, %v4888_v29  ;;  %v10429_v57 = vld [vmem:[#allocation13 + $0x308] sm:$0xf0]  ;;  %v9461_v4 = vld [vmem:[#allocation13 + $0x3c0] sm:$0xf]  ;;  %v9582_v48 = vor.u32 %v10483_v51, %v9581_v40  ;;  %v4637_v29 = vpop.f32.mrf.mxu0 }
 0x3a0   :  { %v10453_v59 = vld [vmem:[#allocation13 + $0x3c8] sm:$0xf0]  ;;  %v9067_v62 = vld [vmem:[#allocation13 + $0xb4] sm:$0xf0]  ;;  %v10480_v56 = vld [vmem:[#allocation13 + $0x4a0] sm:$0xf0]  ;;  %v9366_v8 = vor.u32 %v10429_v57, %v9365_v30 }
 0x3a1   :  { %6330 = vmatpush.bf16.msrb.mxu0 %v9270_v26  ;;  %6338 = vmatpush.bf16.msrb.mxu1 %v9426_v43  ;;  %v9606_v26 = vor.u32 %v10489_v20, %v9605_v19  ;;  %v4969_v43 = vmul.f32 %v4961_v32, %v11100_v47  ;;  %v10353_v63 = vld [vmem:[#allocation13 + $0xac] sm:$0xf]  ;;  %v9163_v34 = vld [vmem:[#allocation13 + $0x174] sm:$0xf0]  ;;  %v9462_v11 = vor.u32 %v10453_v59, %v9461_v4  ;;  %v10350_v19 = vld [vmem:[#allocation13 + $0x94] sm:$0xf] }
 0x3a2   :  { %6318 = vmatmul.bf16.vlgmr.msra.gmra.mxu3 %v11163_v41  ;;  %v9569_v7 = vld [vmem:[#allocation13 + $0x498] sm:$0xf]  ;;  %v9557_v49 = vld [vmem:[#allocation13 + $0x480] sm:$0xf]  ;;  %v10477_v58 = vld [vmem:[#allocation13 + $0x488] sm:$0xf0] }
 0x3a3   :  { %6362 = vmatpush.bf16.msrb.mxu3 %v9642_v9  ;;  %6351 = vmatpush.bf16.msrb.mxu2 %v9522_v31  ;;  %v9390_v9 = vor.u32 %v10435_v21, %v9389_v14  ;;  %v9473_v31 = vld [vmem:[#allocation13 + $0x3d8] sm:$0xf]  ;;  %v9570_v42 = vor.u32 %v10480_v56, %v9569_v7  ;;  %v10374_v14 = vld [vmem:[#allocation13 + $0x154] sm:$0xf]  ;;  %v9151_v21 = vld [vmem:[#allocation13 + $0x15c] sm:$0xf0] }
 0x3a4   :  { %6331 = vmatmul.bf16.vlgmr.msrb.gmra.mxu0 %v11169_v52  ;;  %v9474_v36 = vor.u32 %v10456_v46, %v9473_v31  ;;  %v10401_v32 = vld [vmem:[#allocation13 + $0x22c] sm:$0xf]  ;;  %v9259_v3 = vld [vmem:[#allocation13 + $0x234] sm:$0xf0]  ;;  %v9043_v61 = vld [vmem:[#allocation13 + $0x84] sm:$0xf0] }
 0x3a5   :  { %6339 = vmatpush.bf16.msrb.mxu1 %v9414_v6  ;;  %v4977_v6 = vadd.f32 %v4969_v43, %v4933_v1  ;;  %v10371_v1 = vld [vmem:[#allocation13 + $0x13c] sm:$0xf]  ;;  %v9139_v43 = vld [vmem:[#allocation13 + $0x144] sm:$0xf0]  ;;  %v9262_v31 = vor.u32 %v10401_v32, %v9259_v3  ;;  %v10398_v46 = vld [vmem:[#allocation13 + $0x214] sm:$0xf] }
 0x3a6   :  { %v4624_v0 = vpop.f32.mrf.mxu3  ;;  %v9142_v51 = vor.u32 %v10371_v1, %v9139_v43  ;;  %v9031_v30 = vld [vmem:[#allocation13 + $0x6c] sm:$0xf0]  ;;  %v9737_v4 = vld [vmem:[#allocation13 + $0x5e8] sm:$0xf]  ;;  %v10522_v59 = vld [vmem:[#allocation13 + $0x5f0] sm:$0xf0] }
 0x3a7   :  { %6363 = vmatpush.bf16.msrb.mxu3 %v9630_v24  ;;  %6352 = vmatpush.bf16.msrb.mxu2 %v9510_v5  ;;  %v4976_v24 = vadd.f32 %v4968_v28, %v4932_v27  ;;  %v10377_v5 = vld [vmem:[#allocation13 + $0x16c] sm:$0xf]  ;;  %v4985_v20 = vmax.f32 %v4977_v6, 0.0  ;;  %v9154_v27 = vor.u32 %v10374_v14, %v9151_v21  ;;  %v9558_v28 = vor.u32 %v10477_v58, %v9557_v49  ;;  %v10395_v6 = vld [vmem:[#allocation13 + $0x1fc] sm:$0xf] }
 0x3a8   :  { %v9166_v53 = vor.u32 %v10377_v5, %v9163_v34  ;;  %v10341_v34 = vld [vmem:[#allocation13 + $0x4c] sm:$0xf]  ;;  %v9019_v7 = vld [vmem:[#allocation13 + $0x54] sm:$0xf0]  ;;  %v9223_v29 = vld [vmem:[#allocation13 + $0x1ec] sm:$0xf0] }
 0x3a9   :  { %6340 = vmatpush.bf16.msrb.mxu1 %v9402_v17  ;;  %v4984_v2 = vmax.f32 %v4976_v24, 0.0  ;;  %v4611_v17 = vpop.f32.mrf.mxu2  ;;  %v10368_v24 = vld [vmem:[#allocation13 + $0x124] sm:$0xf]  ;;  %v10365_v56 = vld [vmem:[#allocation13 + $0x10c] sm:$0xf] }
 0x3aa   :  { %v10392_v17 = vld [vmem:[#allocation13 + $0x1e4] sm:$0xf]  ;;  %v10338_v14 = vld [vmem:[#allocation13 + $0x34] sm:$0xf]  ;;  %v9007_v49 = vld [vmem:[#allocation13 + $0x3c] sm:$0xf0] }
 0x3ab   :  { %6364 = vmatpush.bf16.msrb.mxu3 %v9618_v50  ;;  %6353 = vmatpush.bf16.msrb.mxu2 %v9498_v15  ;;  %v9070_v50 = vor.u32 %v10353_v63, %v9067_v62  ;;  %v9055_v15 = vld [vmem:[#allocation13 + $0x9c] sm:$0xf0]  ;;  %v11190_v25 = vpack.c.bf16 %v4984_v2, %v4984_v2  ;;  %v9738_v63 = vor.u32 %v10522_v59, %v9737_v4  ;;  %v9115_v2 = vld [vmem:[#allocation13 + $0x114] sm:$0xf0]  ;;  %v10335_v43 = vld [vmem:[#allocation13 + $0x1c] sm:$0xf] }
 0x3ac   :  { %v9058_v60 = vor.u32 %v10350_v19, %v9055_v15  ;;  %v10519_v19 = vld [vmem:[#allocation13 + $0x5d8] sm:$0xf0]  ;;  %v9022_v15 = vor.u32 %v10341_v34, %v9019_v7  ;;  %v9118_v21 = vor.u32 %v10365_v56, %v9115_v2  ;;  %v9103_v58 = vld [vmem:[#allocation13 + $0xfc] sm:$0xf0]  ;;  %v9226_v3 = vor.u32 %v10392_v17, %v9223_v29  ;;  %v10332_v59 = vld [vmem:[#allocation13 + $0x4] sm:$0xf] }
 0x3ad   :  { %6341 = vmatpush.bf16.msrb.mxu1 %v9390_v9  ;;  %v11195_v9 = vpack.c.bf16 %v4985_v20, %v4985_v20  ;;  %6375 = vmatpush.bf16.msra.mxu0 %v9738_v63  ;;  %v4648_v20 = vpop.f32.mrf.mxu1  ;;  %v9010_v0 = vor.u32 %v10338_v14, %v9007_v49  ;;  %v8983_v34 = vld [vmem:[#allocation13 + $0xc] sm:$0xf0]  ;;  %v10356_v7 = vld [vmem:[#allocation13 + $0xc4] sm:$0xf]  ;;  %v10449_v2 = vld [vmem:[#allocation13 + $0x3ac] sm:$0xf] }
 0x3ae   :  { %v10473_v29 = vld [vmem:[#allocation13 + $0x46c] sm:$0xf]  ;;  %v10383_v14 = vld [vmem:[#allocation13 + $0x19c] sm:$0xf] }
 0x3af   :  { %6365 = vmatpush.bf16.msrb.mxu3 %v9606_v26  ;;  %6354 = vmatpush.bf16.msrb.mxu2 %v9486_v35  ;;  %v11192_v26 = vld [vmem:[#allocation11] sm:$0xff] }
 0x3b0   :  { %v969_v23 = vperm.slane %v11192_v26, 6  ;;  %v10347_v35 = vld [vmem:[#allocation13 + $0x7c] sm:$0xf] }
 0x3b1   :  { %6342 = vmatpush.bf16.msrb.mxu1 %v9378_v18  ;;  %v9046_v40 = vor.u32 %v10347_v35, %v9043_v61  ;;  %v10344_v18 = vld [vmem:[#allocation13 + $0x64] sm:$0xf]  ;;  %v9211_v35 = vld [vmem:[#allocation13 + $0x1d4] sm:$0xf0] }
 0x3b2   :  { %v4571_v12 = vadd.f32 %v11138_v16, %v969_v23  ;;  %v9034_v16 = vor.u32 %v10344_v18, %v9031_v30 }
 0x3b3   :  { %6366 = vmatpush.bf16.msrb.mxu3 %v9594_v45  ;;  %6355 = vmatpush.bf16.msrb.mxu2 %v9474_v36  ;;  %v9247_v45 = vld [vmem:[#allocation13 + $0x21c] sm:$0xf0]  ;;  %v9127_v36 = vld [vmem:[#allocation13 + $0x12c] sm:$0xf0] }
 0x3b4   :  { %v9250_v57 = vor.u32 %v10398_v46, %v9247_v45  ;;  %v4584_v62 = vadd.f32 %v11127_v54, %v4571_v12  ;;  %v9130_v5 = vor.u32 %v10368_v24, %v9127_v36  ;;  %v8995_v46 = vld [vmem:[#allocation13 + $0x24] sm:$0xf0]  ;;  %v9701_v36 = vld [vmem:[#allocation13 + $0x5a0] sm:$0xf] }
 0x3b5   :  { %6343 = vmatpush.bf16.msrb.mxu1 %v9366_v8  ;;  %v9091_v45 = vld [vmem:[#allocation13 + $0xe4] sm:$0xf0]  ;;  %v4650_v4 = vpop.f32.mrf.mxu1 }
 0x3b6   :  { %v4597_v8 = vadd.f32 %v11178_v13, %v4584_v62  ;;  %v10362_v13 = vld [vmem:[#allocation13 + $0xf4] sm:$0xf] }
 0x3b7   :  { %6367 = vmatpush.bf16.msrb.mxu3 %v9582_v48  ;;  %6356 = vmatpush.bf16.msrb.mxu2 %v9462_v11  ;;  %v9235_v48 = vld [vmem:[#allocation13 + $0x204] sm:$0xf0] }
 0x3b8   :  { %6344 = vmatmul.bf16.vlgmr.msrb.gmra.mxu1 %v11190_v25  ;;  %v9238_v11 = vor.u32 %v10395_v6, %v9235_v48  ;;  %v10386_v6 = vld [vmem:[#allocation13 + $0x1b4] sm:$0xf]  ;;  %v9199_v48 = vld [vmem:[#allocation13 + $0x1bc] sm:$0xf0] }
 0x3b9   :  { %6388 = vmatpush.bf16.msra.mxu1 %v9070_v50  ;;  %v9725_v50 = vld [vmem:[#allocation13 + $0x5d0] sm:$0xf]  ;;  %v9202_v17 = vor.u32 %v10386_v6, %v9199_v48  ;;  %v9427_v48 = vld [vmem:[#allocation13 + $0x384] sm:$0xf0] }
 0x3ba   :  { %6357 = vmatmul.bf16.vlgmr.msrb.gmra.mxu2 %v11195_v9  ;;  %v9726_v54 = vor.u32 %v10519_v19, %v9725_v50 }
 0x3bb   :  { %6401 = vmatpush.bf16.msra.mxu2 %v9166_v53  ;;  %6368 = vmatpush.bf16.msrb.mxu3 %v9570_v42  ;;  %v11202_v53 = vld [vmem:[#allocation10 + $0x18] sm:$0xff]  ;;  %v4610_v42 = vadd.f32 %v11184_v39, %v4597_v8  ;;  %v10389_v39 = vld [vmem:[#allocation13 + $0x1cc] sm:$0xf] }
 0x3bc   :  { %6376 = vmatpush.bf16.msra.mxu0 %v9726_v54  ;;  %v4814_v23 = vperm.slane %v11202_v53, 0  ;;  %v4902_v1 = vperm.slane %v11202_v53, 2  ;;  %v9214_v24 = vor.u32 %v10389_v39, %v9211_v35  ;;  %v9079_v8 = vld [vmem:[#allocation13 + $0xcc] sm:$0xf0]  ;;  %v10510_v54 = vld [vmem:[#allocation13 + $0x590] sm:$0xf0] }
 0x3bd   :  { %6389 = vmatpush.bf16.msra.mxu1 %v9058_v60  ;;  %v4623_v32 = vadd.f32 %v11188_v55, %v4610_v42  ;;  %v4858_v60 = vperm.slane %v11202_v53, 1  ;;  %v10359_v55 = vld [vmem:[#allocation13 + $0xdc] sm:$0xf]  ;;  %v4674_v42 = vpop.f32.mrf.mxu3 }
 0x3be   :  { %v4830_v18 = vperm.slane %v4814_v23, 0  ;;  %v9094_v56 = vor.u32 %v10359_v55, %v9091_v45  ;;  %v9082_v23 = vor.u32 %v10356_v7, %v9079_v8  ;;  %v10507_v55 = vld [vmem:[#allocation13 + $0x578] sm:$0xf0]  ;;  %v9535_v45 = vld [vmem:[#allocation13 + $0x45c] sm:$0xf0] }
 0x3bf   :  { %6402 = vmatpush.bf16.msra.mxu2 %v9154_v27  ;;  %6369 = vmatpush.bf16.msrb.mxu3 %v9558_v28  ;;  %v9713_v27 = vld [vmem:[#allocation13 + $0x5b8] sm:$0xf]  ;;  %v10516_v28 = vld [vmem:[#allocation13 + $0x5c0] sm:$0xf0]  ;;  %v4636_v12 = vadd.f32 %v11186_v44, %v4623_v32  ;;  %v4874_v30 = vperm.slane %v4858_v60, 1  ;;  %v8998_v44 = vor.u32 %v10335_v43, %v8995_v46 }
 0x3c0   :  { %v9714_v61 = vor.u32 %v10516_v28, %v9713_v27  ;;  %v4838_v19 = vmul.f32 %v4830_v18, %v11061_v33  ;;  %v10446_v27 = vld [vmem:[#allocation13 + $0x394] sm:$0xf]  ;;  %v9439_v28 = vld [vmem:[#allocation13 + $0x39c] sm:$0xf0]  ;;  %v9677_v46 = vld [vmem:[#allocation13 + $0x570] sm:$0xf] }
 0x3c1   :  { %6390 = vmatpush.bf16.msra.mxu1 %v9046_v40  ;;  %v4661_v40 = vpop.f32.mrf.mxu2  ;;  %v4649_v62 = vadd.f32 %v4648_v20, %v4636_v12  ;;  %v9689_v20 = vld [vmem:[#allocation13 + $0x588] sm:$0xf]  ;;  %v10380_v12 = vld [vmem:[#allocation13 + $0x184] sm:$0xf]  ;;  %v9678_v18 = vor.u32 %v10507_v55, %v9677_v46  ;;  %v9643_v8 = vld [vmem:[#allocation13 + $0x534] sm:$0xf0] }
 0x3c2   :  { %6377 = vmatpush.bf16.msra.mxu0 %v9714_v61  ;;  %v9690_v49 = vor.u32 %v10510_v54, %v9689_v20  ;;  %v9653_v20 = vld [vmem:[#allocation13 + $0x540] sm:$0xf]  ;;  %v10501_v54 = vld [vmem:[#allocation13 + $0x548] sm:$0xf0]  ;;  %v9619_v46 = vld [vmem:[#allocation13 + $0x504] sm:$0xf0] }
 0x3c3   :  { %6414 = vmatpush.bf16.msra.mxu3 %v9262_v31  ;;  %6403 = vmatpush.bf16.msra.mxu2 %v9142_v51  ;;  %v9106_v31 = vor.u32 %v10362_v13, %v9103_v58  ;;  %v11210_v51 = vpop.f32.mrf.mxu0  ;;  %v4662_v50 = vadd.f32 %v4661_v40, %v4649_v62  ;;  %v4882_v58 = vmul.f32 %v4874_v30, %v11081_v22  ;;  %v9175_v40 = vld [vmem:[#allocation13 + $0x18c] sm:$0xf0]  ;;  %v10504_v62 = vld [vmem:[#allocation13 + $0x560] sm:$0xf0] }
 0x3c4   :  { %v9178_v6 = vor.u32 %v10380_v12, %v9175_v40  ;;  %v10434_v40 = vld [vmem:[#allocation13 + $0x334] sm:$0xf] }
 0x3c5   :  { %6391 = vmatpush.bf16.msra.mxu1 %v9034_v16  ;;  %v4918_v16 = vperm.slane %v4902_v1, 2  ;;  %v4675_v13 = vadd.f32 %v4674_v42, %v4662_v50  ;;  %v9415_v50 = vld [vmem:[#allocation13 + $0x36c] sm:$0xf0] }
 0x3c7   :  { %6415 = vmatpush.bf16.msra.mxu3 %v9250_v57  ;;  %6404 = vmatpush.bf16.msra.mxu2 %v9130_v5  ;;  %v10513_v57 = vld [vmem:[#allocation13 + $0x5a8] sm:$0xf0]  ;;  %v4946_v5 = vperm.slane %v11202_v53, 3  ;;  %v4846_v39 = vadd.f32 %v4838_v19, %v4675_v13  ;;  %v4926_v35 = vmul.f32 %v4918_v16, %v11079_v38  ;;  %v4676_v16 = vpop.f32.mrf.mxu3  ;;  %v10464_v19 = vld [vmem:[#allocation13 + $0x424] sm:$0xf] }
 0x3c8   :  { %v9702_v63 = vor.u32 %v10513_v57, %v9701_v36  ;;  %v9442_v36 = vor.u32 %v10446_v27, %v9439_v28  ;;  %v10443_v57 = vld [vmem:[#allocation13 + $0x37c] sm:$0xf]  ;;  %v10437_v27 = vld [vmem:[#allocation13 + $0x34c] sm:$0xf]  ;;  %v9403_v28 = vld [vmem:[#allocation13 + $0x354] sm:$0xf0] }
 0x3c9   :  { %6392 = vmatpush.bf16.msra.mxu1 %v9022_v15  ;;  %v9547_v15 = vld [vmem:[#allocation13 + $0x474] sm:$0xf0]  ;;  %v4962_v32 = vperm.slane %v4946_v5, 3  ;;  %v4663_v61 = vpop.f32.mrf.mxu2  ;;  %v4890_v30 = vadd.f32 %v4882_v58, %v4846_v39  ;;  %v10467_v5 = vld [vmem:[#allocation13 + $0x43c] sm:$0xf] }
 0x3ca   :  { %6378 = vmatpush.bf16.msra.mxu0 %v9702_v63  ;;  %v9550_v1 = vor.u32 %v10473_v29, %v9547_v15  ;;  %v9665_v63 = vld [vmem:[#allocation13 + $0x558] sm:$0xf]  ;;  %v9511_v15 = vld [vmem:[#allocation13 + $0x42c] sm:$0xf0]  ;;  %v10494_v58 = vld [vmem:[#allocation13 + $0x514] sm:$0xf] }
 0x3cb   :  { %6416 = vmatpush.bf16.msra.mxu3 %v9238_v11  ;;  %6405 = vmatpush.bf16.msra.mxu2 %v9118_v21  ;;  %v9451_v11 = vld [vmem:[#allocation13 + $0x3b4] sm:$0xf0]  ;;  %v9187_v21 = vld [vmem:[#allocation13 + $0x1a4] sm:$0xf0]  ;;  %v4934_v4 = vadd.f32 %v4926_v35, %v4890_v30  ;;  %v10461_v39 = vld [vmem:[#allocation13 + $0x40c] sm:$0xf] }
 0x3cc   :  { %v9454_v60 = vor.u32 %v10449_v2, %v9451_v11  ;;  %v9190_v43 = vor.u32 %v10383_v14, %v9187_v21  ;;  %v9430_v2 = vor.u32 %v10443_v57, %v9427_v48  ;;  %v10440_v11 = vld [vmem:[#allocation13 + $0x364] sm:$0xf]  ;;  %v9654_v14 = vor.u32 %v10501_v54, %v9653_v20  ;;  %v10425_v21 = vld [vmem:[#allocation13 + $0x2ec] sm:$0xf]  ;;  %v9499_v61 = vld [vmem:[#allocation13 + $0x414] sm:$0xf0] }
 0x3cd   :  { %6393 = vmatpush.bf16.msra.mxu1 %v9010_v0  ;;  %v4689_v0 = vpop.f32.mrf.mxu0  ;;  %v9502_v12 = vor.u32 %v10461_v39, %v9499_v61  ;;  %v10458_v30 = vld [vmem:[#allocation13 + $0x3f4] sm:$0xf]  ;;  %v10419_v57 = vld [vmem:[#allocation13 + $0x2bc] sm:$0xf]  ;;  %v10428_v54 = vld [vmem:[#allocation13 + $0x304] sm:$0xf] }
 0x3ce   :  { %6379 = vmatpush.bf16.msra.mxu0 %v9690_v49  ;;  %v9355_v49 = vld [vmem:[#allocation13 + $0x2f4] sm:$0xf0]  ;;  %v10422_v0 = vld [vmem:[#allocation13 + $0x2d4] sm:$0xf]  ;;  %v10431_v16 = vld [vmem:[#allocation13 + $0x31c] sm:$0xf] }
 0x3cf   :  { %6417 = vmatpush.bf16.msra.mxu3 %v9226_v3  ;;  %6406 = vmatpush.bf16.msra.mxu2 %v9106_v31  ;;  %v8986_v3 = vor.u32 %v10332_v59, %v8983_v34  ;;  %v10470_v31 = vld [vmem:[#allocation13 + $0x454] sm:$0xf]  ;;  %v9666_v34 = vor.u32 %v10504_v62, %v9665_v63  ;;  %v9169_v39 = vld [vmem:[#allocation13 + $0x170] sm:$0xf] }
 0x3d0   :  { %v9538_v59 = vor.u32 %v10470_v31, %v9535_v45  ;;  %v10491_v31 = vld [vmem:[#allocation13 + $0x4fc] sm:$0xf]  ;;  %v9406_v45 = vor.u32 %v10437_v27, %v9403_v28  ;;  %v11228_v27 = vpop.f32.mrf.mxu3  ;;  %v9583_v28 = vld [vmem:[#allocation13 + $0x4bc] sm:$0xf0] }
 0x3d1   :  { %6394 = vmatpush.bf16.msra.mxu1 %v8998_v44  ;;  %v9523_v44 = vld [vmem:[#allocation13 + $0x444] sm:$0xf0] }
 0x3d2   :  { %6380 = vmatpush.bf16.msra.mxu0 %v9678_v18  ;;  %v9526_v29 = vor.u32 %v10467_v5, %v9523_v44  ;;  %v9391_v18 = vld [vmem:[#allocation13 + $0x33c] sm:$0xf0]  ;;  %v9379_v5 = vld [vmem:[#allocation13 + $0x324] sm:$0xf0]  ;;  %v10455_v44 = vld [vmem:[#allocation13 + $0x3dc] sm:$0xf] }
 0x3d3   :  { %6418 = vmatpush.bf16.msra.mxu3 %v9214_v24  ;;  %6407 = vmatpush.bf16.msra.mxu2 %v9094_v56  ;;  %v4970_v24 = vmul.f32 %v4962_v32, %v11100_v47  ;;  %v10497_v56 = vld [vmem:[#allocation13 + $0x52c] sm:$0xf]  ;;  %v9631_v32 = vld [vmem:[#allocation13 + $0x51c] sm:$0xf0]  ;;  %v9394_v63 = vor.u32 %v10434_v40, %v9391_v18  ;;  %v9382_v20 = vor.u32 %v10431_v16, %v9379_v5 }
 0x3d4   :  { %v9646_v42 = vor.u32 %v10497_v56, %v9643_v8  ;;  %v9634_v35 = vor.u32 %v10494_v58, %v9631_v32  ;;  %v9475_v8 = vld [vmem:[#allocation13 + $0x3e4] sm:$0xf0]  ;;  %v9073_v58 = vld [vmem:[#allocation13 + $0xb0] sm:$0xf] }
 0x3d5   :  { %6395 = vmatpush.bf16.msra.mxu1 %v8986_v3  ;;  %v4978_v7 = vadd.f32 %v4970_v24, %v4934_v4  ;;  %v9358_v3 = vor.u32 %v10425_v21, %v9355_v49  ;;  %v9622_v24 = vor.u32 %v10491_v31, %v9619_v46  ;;  %v9331_v4 = vld [vmem:[#allocation13 + $0x2c4] sm:$0xf0]  ;;  %v9463_v21 = vld [vmem:[#allocation13 + $0x3cc] sm:$0xf0]  ;;  %v10482_v49 = vld [vmem:[#allocation13 + $0x4b4] sm:$0xf] }
 0x3d6   :  { %6381 = vmatpush.bf16.msra.mxu0 %v9666_v34  ;;  %v9334_v48 = vor.u32 %v10419_v57, %v9331_v4  ;;  %v11224_v34 = vpop.f32.mrf.mxu2  ;;  %v10479_v46 = vld [vmem:[#allocation13 + $0x49c] sm:$0xf]  ;;  %v9586_v40 = vor.u32 %v10482_v49, %v9583_v28  ;;  %v9571_v57 = vld [vmem:[#allocation13 + $0x4a4] sm:$0xf0]  ;;  %v9157_v4 = vld [vmem:[#allocation13 + $0x158] sm:$0xf] }
 0x3d7   :  { %6419 = vmatpush.bf16.msra.mxu3 %v9202_v17  ;;  %6408 = vmatpush.bf16.msra.mxu2 %v9082_v23  ;;  %v4986_v17 = vmax.f32 %v4978_v7, 0.0  ;;  %v9418_v23 = vor.u32 %v10440_v11, %v9415_v50  ;;  %v11226_v7 = vpop.f32.mrf.mxu0  ;;  %v9319_v11 = vld [vmem:[#allocation13 + $0x2ac] sm:$0xf0]  ;;  %v9574_v16 = vor.u32 %v10479_v46, %v9571_v57  ;;  %v10346_v49 = vld [vmem:[#allocation13 + $0x70] sm:$0xf0] }
 0x3d8   :  { %6396 = vmatmul.bf16.vlgmr.msra.gmra.mxu1 %v11148_v10  ;;  %v9253_v28 = vld [vmem:[#allocation13 + $0x218] sm:$0xf] }
 0x3d9   :  { %6440 = vmatpush.bf16.msrb.mxu1 %v9454_v60  ;;  %v11219_v13 = vpack.c.bf16 %v4986_v17, %v4986_v17  ;;  %v9514_v60 = vor.u32 %v10464_v19, %v9511_v15  ;;  %v10485_v19 = vld [vmem:[#allocation13 + $0x4cc] sm:$0xf]  ;;  %v9595_v17 = vld [vmem:[#allocation13 + $0x4d4] sm:$0xf0]  ;;  %v10452_v15 = vld [vmem:[#allocation13 + $0x3c4] sm:$0xf] }
 0x3da   :  { %6409 = vmatmul.bf16.vlgmr.msra.gmra.mxu2 %v11153_v37  ;;  %6382 = vmatpush.bf16.msra.mxu0 %v9654_v14  ;;  %v9478_v14 = vor.u32 %v10455_v44, %v9475_v8  ;;  %v9598_v32 = vor.u32 %v10485_v19, %v9595_v17  ;;  %v10349_v44 = vld [vmem:[#allocation13 + $0x88] sm:$0xf0]  ;;  %v9283_v8 = vld [vmem:[#allocation13 + $0x264] sm:$0xf0]  ;;  %v9013_v57 = vld [vmem:[#allocation13 + $0x38] sm:$0xf] }
 0x3db   :  { %6453 = vmatpush.bf16.msrb.mxu2 %v9550_v1  ;;  %6420 = vmatpush.bf16.msra.mxu3 %v9190_v43  ;;  %v9343_v1 = vld [vmem:[#allocation13 + $0x2dc] sm:$0xf0]  ;;  %v11222_v43 = vpop.f32.mrf.mxu1  ;;  %v10373_v19 = vld [vmem:[#allocation13 + $0x148] sm:$0xf0] }
 0x3dc   :  { %6370 = vmatmul.bf16.vlgmr.msrb.gmra.mxu3 %v11219_v13  ;;  %v9346_v55 = vor.u32 %v10422_v0, %v9343_v1  ;;  %v9466_v1 = vor.u32 %v10452_v15, %v9463_v21  ;;  %v9037_v21 = vld [vmem:[#allocation13 + $0x68] sm:$0xf] }
 0x3dd   :  { %6441 = vmatpush.bf16.msrb.mxu1 %v9442_v36  ;;  %v9487_v36 = vld [vmem:[#allocation13 + $0x3fc] sm:$0xf0] }
 0x3de   :  { %6427 = vmatpush.bf16.msrb.mxu0 %v9358_v3  ;;  %v9490_v62 = vor.u32 %v10458_v30, %v9487_v36  ;;  %v10355_v3 = vld [vmem:[#allocation13 + $0xb8] sm:$0xf0]  ;;  %v10352_v30 = vld [vmem:[#allocation13 + $0xa0] sm:$0xf0]  ;;  %v9295_v36 = vld [vmem:[#allocation13 + $0x27c] sm:$0xf0] }
 0x3df   :  { %6454 = vmatpush.bf16.msrb.mxu2 %v9538_v59  ;;  %6421 = vmatpush.bf16.msra.mxu3 %v9178_v6  ;;  %v10488_v59 = vld [vmem:[#allocation13 + $0x4e4] sm:$0xf]  ;;  %v9607_v6 = vld [vmem:[#allocation13 + $0x4ec] sm:$0xf0]  ;;  %v9074_v31 = vor.u32 %v10355_v3, %v9073_v58  ;;  %v9133_v3 = vld [vmem:[#allocation13 + $0x128] sm:$0xf] }
 0x3e0   :  { %v9610_v56 = vor.u32 %v10488_v59, %v9607_v6  ;;  %v10376_v59 = vld [vmem:[#allocation13 + $0x160] sm:$0xf0] }
 0x3e1   :  { %6442 = vmatpush.bf16.msrb.mxu1 %v9430_v2  ;;  %v10416_v2 = vld [vmem:[#allocation13 + $0x2a4] sm:$0xf]  ;;  %v9158_v5 = vor.u32 %v10376_v59, %v9157_v4 }
 0x3e2   :  { %6428 = vmatpush.bf16.msrb.mxu0 %v9346_v55  ;;  %v9061_v55 = vld [vmem:[#allocation13 + $0x98] sm:$0xf]  ;;  %v10404_v58 = vld [vmem:[#allocation13 + $0x244] sm:$0xf] }
 0x3e3   :  { %6455 = vmatpush.bf16.msrb.mxu2 %v9526_v29  ;;  %6466 = vmatpush.bf16.msrb.mxu3 %v9646_v42  ;;  %v4702_v50 = vpop.f32.mrf.mxu1  ;;  %v9322_v29 = vor.u32 %v10416_v2, %v9319_v11  ;;  %v9367_v42 = vld [vmem:[#allocation13 + $0x30c] sm:$0xf0]  ;;  %v4728_v2 = vpop.f32.mrf.mxu3  ;;  %v10340_v4 = vld [vmem:[#allocation13 + $0x40] sm:$0xf0] }
 0x3e4   :  { %v9370_v0 = vor.u32 %v10428_v54, %v9367_v42  ;;  %v9559_v11 = vld [vmem:[#allocation13 + $0x48c] sm:$0xf0]  ;;  %v9145_v50 = vld [vmem:[#allocation13 + $0x140] sm:$0xf]  ;;  %v970_v54 = vperm.slane %v11192_v26, 7  ;;  %v9038_v26 = vor.u32 %v10346_v49, %v9037_v21 }
 0x3e5   :  { %6443 = vmatpush.bf16.msrb.mxu1 %v9418_v23  ;;  %v10413_v23 = vld [vmem:[#allocation13 + $0x28c] sm:$0xf]  ;;  %v8989_v49 = vld [vmem:[#allocation13 + $0x8] sm:$0xf] }
 0x3e6   :  { %6429 = vmatpush.bf16.msrb.mxu0 %v9334_v48  ;;  %v9062_v48 = vor.u32 %v10352_v30, %v9061_v55  ;;  %v10397_v30 = vld [vmem:[#allocation13 + $0x208] sm:$0xf0] }
 0x3e7   :  { %6456 = vmatpush.bf16.msrb.mxu2 %v9514_v60  ;;  %6467 = vmatpush.bf16.msrb.mxu3 %v9634_v35  ;;  %v9307_v60 = vld [vmem:[#allocation13 + $0x294] sm:$0xf0]  ;;  %v10379_v35 = vld [vmem:[#allocation13 + $0x178] sm:$0xf0] }
 0x3e8   :  { %v9310_v61 = vor.u32 %v10413_v23, %v9307_v60  ;;  %v9170_v18 = vor.u32 %v10379_v35, %v9169_v39  ;;  %v10370_v23 = vld [vmem:[#allocation13 + $0x130] sm:$0xf0]  ;;  %v9271_v60 = vld [vmem:[#allocation13 + $0x24c] sm:$0xf0]  ;;  %v10400_v39 = vld [vmem:[#allocation13 + $0x220] sm:$0xf0] }
 0x3e9   :  { %6444 = vmatpush.bf16.msrb.mxu1 %v9406_v45  ;;  %v4715_v45 = vpop.f32.mrf.mxu2  ;;  %v9274_v35 = vor.u32 %v10404_v58, %v9271_v60  ;;  %v9254_v55 = vor.u32 %v10400_v39, %v9253_v28  ;;  %v10334_v58 = vld [vmem:[#allocation13 + $0x10] sm:$0xf0]  ;;  %v9205_v28 = vld [vmem:[#allocation13 + $0x1b8] sm:$0xf]  ;;  %v9457_v39 = vld [vmem:[#allocation13 + $0x3b0] sm:$0xf] }
 0x3ea   :  { %6430 = vmatpush.bf16.msrb.mxu0 %v9322_v29  ;;  %v9265_v29 = vld [vmem:[#allocation13 + $0x230] sm:$0xf] }
 0x3eb   :  { %6457 = vmatpush.bf16.msrb.mxu2 %v9502_v12  ;;  %6468 = vmatpush.bf16.msrb.mxu3 %v9622_v24  ;;  %v4741_v12 = vpop.f32.mrf.mxu0  ;;  %v10410_v24 = vld [vmem:[#allocation13 + $0x274] sm:$0xf]  ;;  %v9121_v45 = vld [vmem:[#allocation13 + $0x110] sm:$0xf] }
 0x3ec   :  { %6422 = vmatmul.bf16.vlgmr.msra.gmra.mxu3 %v11163_v41  ;;  %v9298_v6 = vor.u32 %v10410_v24, %v9295_v36  ;;  %v10367_v12 = vld [vmem:[#allocation13 + $0x118] sm:$0xf0] }
 0x3ed   :  { %6445 = vmatpush.bf16.msrb.mxu1 %v9394_v63  ;;  %v10476_v63 = vld [vmem:[#allocation13 + $0x484] sm:$0xf]  ;;  %v9122_v36 = vor.u32 %v10367_v12, %v9121_v45  ;;  %v8990_v45 = vor.u32 %v10334_v58, %v8989_v49  ;;  %v10521_v49 = vld [vmem:[#allocation13 + $0x5ec] sm:$0xf] }
 0x3ee   :  { %6431 = vmatpush.bf16.msrb.mxu0 %v9310_v61  ;;  %v9562_v15 = vor.u32 %v10476_v63, %v9559_v11  ;;  %v4688_v61 = vadd.f32 %v11210_v51, %v970_v54  ;;  %v9229_v63 = vld [vmem:[#allocation13 + $0x1e8] sm:$0xf]  ;;  %v10391_v54 = vld [vmem:[#allocation13 + $0x1d8] sm:$0xf0] }
 0x3ef   :  { %6458 = vmatpush.bf16.msrb.mxu2 %v9490_v62  ;;  %6469 = vmatpush.bf16.msrb.mxu3 %v9610_v56  ;;  %v9049_v62 = vld [vmem:[#allocation13 + $0x80] sm:$0xf]  ;;  %v10407_v56 = vld [vmem:[#allocation13 + $0x25c] sm:$0xf] }
 0x3f0   :  { %v9286_v17 = vor.u32 %v10407_v56, %v9283_v8  ;;  %v9050_v42 = vor.u32 %v10349_v44, %v9049_v62  ;;  %v4701_v46 = vadd.f32 %v11222_v43, %v4688_v61  ;;  %v10394_v62 = vld [vmem:[#allocation13 + $0x1f0] sm:$0xf0]  ;;  %v9001_v44 = vld [vmem:[#allocation13 + $0x20] sm:$0xf]  ;;  %v10337_v56 = vld [vmem:[#allocation13 + $0x28] sm:$0xf0] }
 0x3f1   :  { %6446 = vmatpush.bf16.msrb.mxu1 %v9382_v20  ;;  %v10403_v20 = vld [vmem:[#allocation13 + $0x238] sm:$0xf0]  ;;  %v9002_v21 = vor.u32 %v10337_v56, %v9001_v44 }
 0x3f2   :  { %6432 = vmatpush.bf16.msrb.mxu0 %v9298_v6  ;;  %v4714_v24 = vadd.f32 %v11224_v34, %v4701_v46  ;;  %v9109_v6 = vld [vmem:[#allocation13 + $0xf8] sm:$0xf]  ;;  %v9014_v34 = vor.u32 %v10340_v4, %v9013_v57 }
 0x3f3   :  { %6459 = vmatpush.bf16.msrb.mxu2 %v9478_v14  ;;  %6470 = vmatpush.bf16.msrb.mxu3 %v9598_v32  ;;  %v9146_v14 = vor.u32 %v10373_v19, %v9145_v50  ;;  %v9266_v32 = vor.u32 %v10403_v20, %v9265_v29  ;;  %v9097_v50 = vld [vmem:[#allocation13 + $0xe0] sm:$0xf]  ;;  %v10361_v19 = vld [vmem:[#allocation13 + $0xe8] sm:$0xf0]  ;;  %v9217_v20 = vld [vmem:[#allocation13 + $0x1d0] sm:$0xf] }
 0x3f4   :  { %v4727_v43 = vadd.f32 %v11228_v27, %v4714_v24  ;;  %v9230_v27 = vor.u32 %v10394_v62, %v9229_v63  ;;  %v9218_v60 = vor.u32 %v10391_v54, %v9217_v20  ;;  %v9541_v63 = vld [vmem:[#allocation13 + $0x458] sm:$0xf]  ;;  %v9649_v20 = vld [vmem:[#allocation13 + $0x530] sm:$0xf]  ;;  %v10499_v54 = vld [vmem:[#allocation13 + $0x538] sm:$0xf0] }
 0x3f5   :  { %6447 = vmatpush.bf16.msrb.mxu1 %v9370_v0  ;;  %v9134_v0 = vor.u32 %v10370_v23, %v9133_v3  ;;  %v10358_v3 = vld [vmem:[#allocation13 + $0xd0] sm:$0xf0]  ;;  %v9650_v58 = vor.u32 %v10499_v54, %v9649_v20  ;;  %v10487_v20 = vld [vmem:[#allocation13 + $0x4d8] sm:$0xf0] }
 0x3f6   :  { %6433 = vmatpush.bf16.msrb.mxu0 %v9286_v17  ;;  %v4740_v8 = vadd.f32 %v11226_v7, %v4727_v43  ;;  %v9098_v7 = vor.u32 %v10361_v19, %v9097_v50  ;;  %v9193_v43 = vld [vmem:[#allocation13 + $0x1a0] sm:$0xf]  ;;  %v10382_v19 = vld [vmem:[#allocation13 + $0x190] sm:$0xf0] }
 0x3f7   :  { %6460 = vmatpush.bf16.msrb.mxu2 %v9466_v1  ;;  %6471 = vmatpush.bf16.msrb.mxu3 %v9586_v40  ;;  %v9025_v1 = vld [vmem:[#allocation13 + $0x50] sm:$0xf]  ;;  %v4752_v40 = vpop.f32.mrf.mxu1 }
 0x3f8   :  { %6448 = vmatmul.bf16.vlgmr.msrb.gmra.mxu1 %v11190_v25 }
 0x3f9   :  { %6492 = vmatpush.bf16.msra.mxu1 %v9074_v31  ;;  %v10343_v31 = vld [vmem:[#allocation13 + $0x58] sm:$0xf0] }
 0x3fa   :  { %6461 = vmatmul.bf16.vlgmr.msrb.gmra.mxu2 %v11195_v9  ;;  %6434 = vmatpush.bf16.msrb.mxu0 %v9274_v35  ;;  %v9026_v51 = vor.u32 %v10343_v31, %v9025_v1  ;;  %v10451_v35 = vld [vmem:[#allocation13 + $0x3b8] sm:$0xf0] }
 0x3fb   :  { %6505 = vmatpush.bf16.msra.mxu2 %v9170_v18  ;;  %6472 = vmatpush.bf16.msrb.mxu3 %v9574_v16  ;;  %v9241_v18 = vld [vmem:[#allocation13 + $0x200] sm:$0xf]  ;;  %v4815_v16 = vperm.slane %v11202_v53, 4  ;;  %v10475_v1 = vld [vmem:[#allocation13 + $0x478] sm:$0xf0] }
 0x3fc   :  { %v9242_v59 = vor.u32 %v10397_v30, %v9241_v18  ;;  %v9458_v18 = vor.u32 %v10451_v35, %v9457_v39 }
 0x3fd   :  { %6493 = vmatpush.bf16.msra.mxu1 %v9062_v48  ;;  %v10364_v48 = vld [vmem:[#allocation13 + $0x100] sm:$0xf0]  ;;  %v4765_v2 = vpop.f32.mrf.mxu2  ;;  %v4831_v29 = vperm.slane %v4815_v16, 0 }
 0x3ff   :  { %6506 = vmatpush.bf16.msra.mxu2 %v9158_v5  ;;  %6473 = vmatpush.bf16.msrb.mxu3 %v9562_v15  ;;  %v9110_v5 = vor.u32 %v10364_v48, %v9109_v6  ;;  %v4754_v17 = vpop.f32.mrf.mxu1  ;;  %v4859_v15 = vperm.slane %v11202_v53, 5  ;;  %v4839_v24 = vmul.f32 %v4831_v29, %v11061_v33  ;;  %v10448_v6 = vld [vmem:[#allocation13 + $0x3a0] sm:$0xf0]  ;;  %v10385_v48 = vld [vmem:[#allocation13 + $0x1a8] sm:$0xf0] }
 0x400   :  { %v9194_v56 = vor.u32 %v10385_v48, %v9193_v43  ;;  %v10469_v17 = vld [vmem:[#allocation13 + $0x448] sm:$0xf0]  ;;  %v9715_v43 = vld [vmem:[#allocation13 + $0x5c4] sm:$0xf0]  ;;  %v10436_v48 = vld [vmem:[#allocation13 + $0x340] sm:$0xf0] }
 0x401   :  { %6494 = vmatpush.bf16.msra.mxu1 %v9050_v42  ;;  %v4791_v11 = vpop.f32.mrf.mxu0  ;;  %v4753_v42 = vadd.f32 %v4752_v40, %v4740_v8  ;;  %v4875_v46 = vperm.slane %v4859_v15, 1 }
 0x402   :  { %6474 = vmatmul.bf16.vlgmr.msrb.gmra.mxu3 %v11219_v13 }
 0x403   :  { %6507 = vmatpush.bf16.msra.mxu2 %v9146_v14  ;;  %6518 = vmatpush.bf16.msra.mxu3 %v9266_v32  ;;  %v4903_v14 = vperm.slane %v11202_v53, 6  ;;  %v9085_v32 = vld [vmem:[#allocation13 + $0xc8] sm:$0xf]  ;;  %v4766_v23 = vadd.f32 %v4765_v2, %v4753_v42  ;;  %v4883_v16 = vmul.f32 %v4875_v46, %v11081_v22  ;;  %v9529_v22 = vld [vmem:[#allocation13 + $0x440] sm:$0xf] }
 0x404   :  { %v9086_v40 = vor.u32 %v10358_v3, %v9085_v32  ;;  %v9181_v2 = vld [vmem:[#allocation13 + $0x188] sm:$0xf]  ;;  %v10442_v32 = vld [vmem:[#allocation13 + $0x370] sm:$0xf0] }
 0x405   :  { %6495 = vmatpush.bf16.msra.mxu1 %v9038_v26  ;;  %v4778_v61 = vpop.f32.mrf.mxu3  ;;  %v10388_v26 = vld [vmem:[#allocation13 + $0x1c0] sm:$0xf0]  ;;  %v4919_v12 = vperm.slane %v4903_v14, 2  ;;  %v9182_v14 = vor.u32 %v10382_v19, %v9181_v2  ;;  %v9517_v3 = vld [vmem:[#allocation13 + $0x428] sm:$0xf] }
 0x406   :  { %v4779_v31 = vadd.f32 %v4778_v61, %v4766_v23  ;;  %v9206_v57 = vor.u32 %v10388_v26, %v9205_v28  ;;  %v10466_v23 = vld [vmem:[#allocation13 + $0x430] sm:$0xf0]  ;;  %v10496_v28 = vld [vmem:[#allocation13 + $0x520] sm:$0xf0]  ;;  %v9481_v19 = vld [vmem:[#allocation13 + $0x3e0] sm:$0xf] }
 0x407   :  { %6508 = vmatpush.bf16.msra.mxu2 %v9134_v0  ;;  %6519 = vmatpush.bf16.msra.mxu3 %v9254_v55  ;;  %v9553_v0 = vld [vmem:[#allocation13 + $0x470] sm:$0xf]  ;;  %v4947_v55 = vperm.slane %v11202_v53, 7  ;;  %v10472_v53 = vld [vmem:[#allocation13 + $0x460] sm:$0xf0]  ;;  %v9518_v26 = vor.u32 %v10466_v23, %v9517_v3 }
 0x408   :  { %v4792_v30 = vadd.f32 %v4791_v11, %v4779_v31  ;;  %v9554_v4 = vor.u32 %v10475_v1, %v9553_v0  ;;  %v9542_v8 = vor.u32 %v10472_v53, %v9541_v63  ;;  %v9433_v11 = vld [vmem:[#allocation13 + $0x380] sm:$0xf]  ;;  %v10518_v0 = vld [vmem:[#allocation13 + $0x5d4] sm:$0xf]  ;;  %v9409_v31 = vld [vmem:[#allocation13 + $0x350] sm:$0xf] }
 0x409   :  { %6496 = vmatpush.bf16.msra.mxu1 %v9026_v51  ;;  %v4767_v51 = vpop.f32.mrf.mxu2  ;;  %v9727_v1 = vld [vmem:[#allocation13 + $0x5dc] sm:$0xf0]  ;;  %v9493_v63 = vld [vmem:[#allocation13 + $0x3f8] sm:$0xf]  ;;  %v10460_v53 = vld [vmem:[#allocation13 + $0x400] sm:$0xf0] }
 0x40a   :  { %v4847_v62 = vadd.f32 %v4839_v24, %v4792_v30  ;;  %v10493_v30 = vld [vmem:[#allocation13 + $0x508] sm:$0xf0]  ;;  %v9730_v51 = vor.u32 %v10518_v0, %v9727_v1  ;;  %v9589_v23 = vld [vmem:[#allocation13 + $0x4b8] sm:$0xf]  ;;  %v9679_v0 = vld [vmem:[#allocation13 + $0x57c] sm:$0xf0] }
 0x40b   :  { %6509 = vmatpush.bf16.msra.mxu2 %v9122_v36  ;;  %6520 = vmatpush.bf16.msra.mxu3 %v9242_v59  ;;  %v4793_v36 = vpop.f32.mrf.mxu0  ;;  %v9445_v59 = vld [vmem:[#allocation13 + $0x398] sm:$0xf] }
 0x40c   :  { %v9446_v33 = vor.u32 %v10448_v6, %v9445_v59  ;;  %v4891_v44 = vadd.f32 %v4883_v16, %v4847_v62  ;;  %v9397_v59 = vld [vmem:[#allocation13 + $0x338] sm:$0xf]  ;;  %v9613_v62 = vld [vmem:[#allocation13 + $0x4e8] sm:$0xf]  ;;  %v10490_v16 = vld [vmem:[#allocation13 + $0x4f0] sm:$0xf0] }
 0x40d   :  { %6497 = vmatpush.bf16.msra.mxu1 %v9014_v34  ;;  %v4963_v34 = vperm.slane %v4947_v55, 3  ;;  %v4780_v50 = vpop.f32.mrf.mxu3  ;;  %v10439_v55 = vld [vmem:[#allocation13 + $0x358] sm:$0xf0] }
 0x40e   :  { %v9410_v36 = vor.u32 %v10439_v55, %v9409_v31  ;;  %v10433_v50 = vld [vmem:[#allocation13 + $0x328] sm:$0xf0] }
 0x40f   :  { %6510 = vmatpush.bf16.msra.mxu2 %v9110_v5  ;;  %6521 = vmatpush.bf16.msra.mxu3 %v9230_v27  ;;  %v4927_v5 = vmul.f32 %v4919_v12, %v11079_v38  ;;  %v10445_v27 = vld [vmem:[#allocation13 + $0x388] sm:$0xf0]  ;;  %v4971_v38 = vmul.f32 %v4963_v34, %v11100_v47  ;;  %v9637_v47 = vld [vmem:[#allocation13 + $0x518] sm:$0xf]  ;;  %v10463_v12 = vld [vmem:[#allocation13 + $0x418] sm:$0xf0] }
 0x410   :  { %v9434_v42 = vor.u32 %v10445_v27, %v9433_v11  ;;  %v9638_v46 = vor.u32 %v10496_v28, %v9637_v47  ;;  %v9614_v27 = vor.u32 %v10490_v16, %v9613_v62  ;;  %v9349_v16 = vld [vmem:[#allocation13 + $0x2d8] sm:$0xf] }
 0x411   :  { %6498 = vmatpush.bf16.msra.mxu1 %v9002_v21  ;;  %v4935_v29 = vadd.f32 %v4927_v5, %v4891_v44  ;;  %v9530_v21 = vor.u32 %v10469_v17, %v9529_v22  ;;  %v10512_v44 = vld [vmem:[#allocation13 + $0x5a4] sm:$0xf]  ;;  %v10457_v22 = vld [vmem:[#allocation13 + $0x3e8] sm:$0xf0] }
 0x413   :  { %6511 = vmatpush.bf16.msra.mxu2 %v9098_v7  ;;  %6522 = vmatpush.bf16.msra.mxu3 %v9218_v60  ;;  %v4979_v15 = vadd.f32 %v4971_v38, %v4935_v29  ;;  %v9739_v7 = vld [vmem:[#allocation13 + $0x5f4] sm:$0xf0]  ;;  %v9601_v38 = vld [vmem:[#allocation13 + $0x4d0] sm:$0xf] }
 0x414   :  { %v9742_v39 = vor.u32 %v10521_v49, %v9739_v7  ;;  %v9373_v49 = vld [vmem:[#allocation13 + $0x308] sm:$0xf]  ;;  %v9602_v7 = vor.u32 %v10487_v20, %v9601_v38 }
 0x415   :  { %6499 = vmatpush.bf16.msra.mxu1 %v8990_v45  ;;  %v4987_v60 = vmax.f32 %v4979_v15, 0.0  ;;  %v9505_v45 = vld [vmem:[#allocation13 + $0x410] sm:$0xf]  ;;  %v9482_v15 = vor.u32 %v10457_v22, %v9481_v19  ;;  %v10415_v22 = vld [vmem:[#allocation13 + $0x298] sm:$0xf0] }
 0x416   :  { %v9313_v19 = vld [vmem:[#allocation13 + $0x290] sm:$0xf] }
 0x417   :  { %6512 = vmatpush.bf16.msra.mxu2 %v9086_v40  ;;  %6523 = vmatpush.bf16.msra.mxu3 %v9206_v57  ;;  %v11252_v35 = vpack.c.bf16 %v4987_v60, %v4987_v60  ;;  %v6293_v40 = vpop.f32.mrf.mxu1  ;;  %v9506_v57 = vor.u32 %v10463_v12, %v9505_v45  ;;  %v10484_v60 = vld [vmem:[#allocation13 + $0x4c0] sm:$0xf0]  ;;  %v9577_v45 = vld [vmem:[#allocation13 + $0x4a0] sm:$0xf]  ;;  %v10481_v12 = vld [vmem:[#allocation13 + $0x4a8] sm:$0xf0] }
 0x418   :  { %6500 = vmatmul.bf16.vlgmr.msra.gmra.mxu1 %v11148_v10  ;;  %v9421_v10 = vld [vmem:[#allocation13 + $0x368] sm:$0xf] }
 0x419   :  { %6544 = vmatpush.bf16.msrb.mxu1 %v9458_v18  ;;  %v9422_v61 = vor.u32 %v10442_v32, %v9421_v10  ;;  %6383 = vmatmul.bf16.vlgmr.msra.gmra.mxu0 %v11252_v35  ;;  %v9625_v18 = vld [vmem:[#allocation13 + $0x500] sm:$0xf]  ;;  %v10430_v10 = vld [vmem:[#allocation13 + $0x310] sm:$0xf0] }
 0x41a   :  { %6513 = vmatmul.bf16.vlgmr.msra.gmra.mxu2 %v11153_v37  ;;  %v11250_v37 = vld [vmem:[#allocation14] sm:$0x7]  ;;  %6479 = vmatpush.bf16.msra.mxu0 %v9742_v39  ;;  %v9626_v6 = vor.u32 %v10493_v30, %v9625_v18  ;;  %v10454_v32 = vld [vmem:[#allocation13 + $0x3d0] sm:$0xf0]  ;;  %v9374_v39 = vor.u32 %v10430_v10, %v9373_v49  ;;  %v10503_v18 = vld [vmem:[#allocation13 + $0x55c] sm:$0xf] }
 0x41b   :  { %6557 = vmatpush.bf16.msrb.mxu2 %v9554_v4  ;;  %6524 = vmatpush.bf16.msra.mxu3 %v9194_v56  ;;  %v5254_v24 = vperm.slane %v11250_v37, 0  ;;  %v10515_v4 = vld [vmem:[#allocation13 + $0x5bc] sm:$0xf]  ;;  %v9703_v56 = vld [vmem:[#allocation13 + $0x5ac] sm:$0xf0] }
 0x41c   :  { %v9718_v34 = vor.u32 %v10515_v4, %v9715_v43  ;;  %v9706_v54 = vor.u32 %v10512_v44, %v9703_v56  ;;  %v9667_v30 = vld [vmem:[#allocation13 + $0x564] sm:$0xf0]  ;;  %v10500_v43 = vld [vmem:[#allocation13 + $0x544] sm:$0xf]  ;;  %v9745_v49 = vld [vmem:[#allocation13 + $0x5f0] sm:$0xf] }
 0x41d   :  { %6545 = vmatpush.bf16.msrb.mxu1 %v9446_v33  ;;  %v6294_v5 = vadd.f32 %v6293_v40, %v5254_v24  ;;  %v9494_v33 = vor.u32 %v10460_v53, %v9493_v63  ;;  %v6306_v2 = vpop.f32.mrf.mxu2  ;;  %v9578_v24 = vor.u32 %v10481_v12, %v9577_v45  ;;  %v9670_v4 = vor.u32 %v10503_v18, %v9667_v30  ;;  %v10427_v63 = vld [vmem:[#allocation13 + $0x2f8] sm:$0xf0]  ;;  %v9325_v56 = vld [vmem:[#allocation13 + $0x2a8] sm:$0xf]  ;;  %v9697_v12 = vld [vmem:[#allocation13 + $0x590] sm:$0xf] }
 0x41e   :  { %6480 = vmatpush.bf16.msra.mxu0 %v9730_v51 }
 0x41f   :  { %6558 = vmatpush.bf16.msrb.mxu2 %v9542_v8  ;;  %6525 = vmatpush.bf16.msra.mxu3 %v9182_v14  ;;  %v9385_v8 = vld [vmem:[#allocation13 + $0x320] sm:$0xf]  ;;  %v6307_v17 = vadd.f32 %v6306_v2, %v6294_v5  ;;  %v6295_v29 = vpop.f32.mrf.mxu1  ;;  %v10509_v14 = vld [vmem:[#allocation13 + $0x58c] sm:$0xf] }
 0x420   :  { %v9301_v29 = vld [vmem:[#allocation13 + $0x278] sm:$0xf] }
 0x421   :  { %6546 = vmatpush.bf16.msrb.mxu1 %v9434_v42  ;;  %v6332_v11 = vpop.f32.mrf.mxu0  ;;  %v9386_v42 = vor.u32 %v10433_v50, %v9385_v8  ;;  %v10418_v8 = vld [vmem:[#allocation13 + $0x2b0] sm:$0xf0] }
 0x422   :  { %6526 = vmatmul.bf16.vlgmr.msra.gmra.mxu3 %v11163_v41  ;;  %v9398_v41 = vor.u32 %v10436_v48, %v9397_v59  ;;  %6481 = vmatpush.bf16.msra.mxu0 %v9718_v34  ;;  %v9655_v59 = vld [vmem:[#allocation13 + $0x54c] sm:$0xf0]  ;;  %v10424_v34 = vld [vmem:[#allocation13 + $0x2e0] sm:$0xf0]  ;;  %v9326_v50 = vor.u32 %v10418_v8, %v9325_v56  ;;  %v5256_v8 = vperm.slane %v11250_v37, 2 }
 0x423   :  { %6559 = vmatpush.bf16.msrb.mxu2 %v9530_v21  ;;  %6570 = vmatpush.bf16.msrb.mxu3 %v9650_v58  ;;  %v9691_v21 = vld [vmem:[#allocation13 + $0x594] sm:$0xf0]  ;;  %v9469_v58 = vld [vmem:[#allocation13 + $0x3c8] sm:$0xf]  ;;  %v9361_v48 = vld [vmem:[#allocation13 + $0x2f0] sm:$0xf]  ;;  %v9658_v53 = vor.u32 %v10500_v43, %v9655_v59 }
 0x424   :  { %v9694_v28 = vor.u32 %v10509_v14, %v9691_v21  ;;  %v9362_v62 = vor.u32 %v10427_v63, %v9361_v48  ;;  %v9277_v14 = vld [vmem:[#allocation13 + $0x248] sm:$0xf]  ;;  %v10406_v21 = vld [vmem:[#allocation13 + $0x250] sm:$0xf0]  ;;  %v10505_v43 = vld [vmem:[#allocation13 + $0x568] sm:$0xf0] }
 0x425   :  { %6547 = vmatpush.bf16.msrb.mxu1 %v9422_v61  ;;  %v6319_v3 = vpop.f32.mrf.mxu3  ;;  %v9470_v61 = vor.u32 %v10454_v32, %v9469_v58  ;;  %v6308_v1 = vpop.f32.mrf.mxu2  ;;  %v9278_v10 = vor.u32 %v10406_v21, %v9277_v14  ;;  %v9733_v32 = vld [vmem:[#allocation13 + $0x5d8] sm:$0xf]  ;;  %v9661_v48 = vld [vmem:[#allocation13 + $0x548] sm:$0xf]  ;;  %v10502_v63 = vld [vmem:[#allocation13 + $0x550] sm:$0xf0] }
 0x426   :  { %v6320_v47 = vadd.f32 %v6319_v3, %v6307_v17  ;;  %6482 = vmatpush.bf16.msra.mxu0 %v9706_v54  ;;  %v9314_v17 = vor.u32 %v10415_v22, %v9313_v19  ;;  %v9289_v54 = vld [vmem:[#allocation13 + $0x260] sm:$0xf]  ;;  %v10520_v3 = vld [vmem:[#allocation13 + $0x5e0] sm:$0xf0]  ;;  %v10514_v1 = vld [vmem:[#allocation13 + $0x5b0] sm:$0xf0] }
 0x427   :  { %6560 = vmatpush.bf16.msrb.mxu2 %v9518_v26  ;;  %6571 = vmatpush.bf16.msrb.mxu3 %v9638_v46  ;;  %v10506_v26 = vld [vmem:[#allocation13 + $0x574] sm:$0xf]  ;;  %v9590_v46 = vor.u32 %v10484_v60, %v9589_v23  ;;  %v9734_v60 = vor.u32 %v10520_v3, %v9733_v32 }
 0x428   :  { %v6333_v55 = vadd.f32 %v6332_v11, %v6320_v47  ;;  %v9682_v40 = vor.u32 %v10506_v26, %v9679_v0  ;;  %v5255_v47 = vperm.slane %v11250_v37, 1  ;;  %v9709_v0 = vld [vmem:[#allocation13 + $0x5a8] sm:$0xf] }
 0x429   :  { %6548 = vmatpush.bf16.msrb.mxu1 %v9410_v36  ;;  %v6334_v31 = vpop.f32.mrf.mxu0  ;;  %6435 = vmatmul.bf16.vlgmr.msrb.gmra.mxu0 %v11169_v52  ;;  %v9565_v36 = vld [vmem:[#allocation13 + $0x488] sm:$0xf]  ;;  %v9710_v45 = vor.u32 %v10514_v1, %v9709_v0 }
 0x42a   :  { %6483 = vmatpush.bf16.msra.mxu0 %v9694_v28  ;;  %v9721_v28 = vld [vmem:[#allocation13 + $0x5c0] sm:$0xf] }
 0x42b   :  { %6561 = vmatpush.bf16.msrb.mxu2 %v9506_v57  ;;  %6572 = vmatpush.bf16.msrb.mxu3 %v9626_v6  ;;  %v10478_v57 = vld [vmem:[#allocation13 + $0x490] sm:$0xf0] }
 0x42c   :  { %v9566_v6 = vor.u32 %v10478_v57, %v9565_v36  ;;  %v10508_v36 = vld [vmem:[#allocation13 + $0x580] sm:$0xf0] }
 0x42d   :  { %6549 = vmatpush.bf16.msrb.mxu1 %v9398_v41  ;;  %v6321_v51 = vpop.f32.mrf.mxu3 }
 0x42e   :  { %6484 = vmatpush.bf16.msra.mxu0 %v9682_v40  ;;  %v10511_v40 = vld [vmem:[#allocation13 + $0x598] sm:$0xf0]  ;;  %v9685_v51 = vld [vmem:[#allocation13 + $0x578] sm:$0xf] }
 0x42f   :  { %6562 = vmatpush.bf16.msrb.mxu2 %v9494_v33  ;;  %6573 = vmatpush.bf16.msrb.mxu3 %v9614_v27  ;;  %v10421_v33 = vld [vmem:[#allocation13 + $0x2c8] sm:$0xf0]  ;;  %v9698_v30 = vor.u32 %v10511_v40, %v9697_v12 }
 0x431   :  { %6550 = vmatpush.bf16.msrb.mxu1 %v9386_v42  ;;  %v10409_v42 = vld [vmem:[#allocation13 + $0x268] sm:$0xf0] }
 0x432   :  { %6485 = vmatpush.bf16.msra.mxu0 %v9670_v4  ;;  %v9673_v4 = vld [vmem:[#allocation13 + $0x560] sm:$0xf] }
 0x433   :  { %6563 = vmatpush.bf16.msrb.mxu2 %v9482_v15  ;;  %6574 = vmatpush.bf16.msrb.mxu3 %v9602_v7  ;;  %v9290_v15 = vor.u32 %v10409_v42, %v9289_v54  ;;  %v10523_v7 = vld [vmem:[#allocation13 + $0x5f8] sm:$0xf0] }
 0x434   :  { %v9746_v58 = vor.u32 %v10523_v7, %v9745_v49 }
 0x435   :  { %6551 = vmatpush.bf16.msrb.mxu1 %v9374_v39  ;;  %v6345_v5 = vpop.f32.mrf.mxu1  ;;  %v10517_v39 = vld [vmem:[#allocation13 + $0x5c8] sm:$0xf0] }
 0x436   :  { %6486 = vmatpush.bf16.msra.mxu0 %v9658_v53  ;;  %v6346_v41 = vadd.f32 %v6345_v5, %v6333_v55  ;;  %v9662_v53 = vor.u32 %v10502_v63, %v9661_v48 }
 0x437   :  { %6564 = vmatpush.bf16.msrb.mxu2 %v9470_v61  ;;  %6575 = vmatpush.bf16.msrb.mxu3 %v9590_v46  ;;  %v9722_v61 = vor.u32 %v10517_v39, %v9721_v28 }
 0x438   :  { %6552 = vmatmul.bf16.vlgmr.msrb.gmra.mxu1 %v11190_v25  ;;  %v9350_v25 = vor.u32 %v10424_v34, %v9349_v16 }
 0x439   :  { %6487 = vmatmul.bf16.vlgmr.msra.gmra.mxu0 %v11252_v35 }
 0x43a   :  { %6565 = vmatmul.bf16.vlgmr.msrb.gmra.mxu2 %v11195_v9  ;;  %6531 = vmatpush.bf16.msrb.mxu0 %v9362_v62  ;;  %v9337_v9 = vld [vmem:[#allocation13 + $0x2c0] sm:$0xf] }
 0x43b   :  { %6576 = vmatpush.bf16.msrb.mxu3 %v9578_v24  ;;  %v9338_v44 = vor.u32 %v10421_v33, %v9337_v9 }
 0x43d   :  { %v6358_v2 = vpop.f32.mrf.mxu2  ;;  %v6347_v27 = vpop.f32.mrf.mxu1 }
 0x43e   :  { %6532 = vmatpush.bf16.msrb.mxu0 %v9350_v25  ;;  %v6359_v11 = vadd.f32 %v6358_v2, %v6346_v41 }
 0x43f   :  { %6577 = vmatpush.bf16.msrb.mxu3 %v9566_v6  ;;  %v9674_v6 = vor.u32 %v10505_v43, %v9673_v4  ;;  %v10549_v43 = vld [vmem:[#allocation2] ss:$0 sm:$0xff] }
 0x442   :  { %6578 = vmatmul.bf16.vlgmr.msrb.gmra.mxu3 %v11219_v13  ;;  %6533 = vmatpush.bf16.msrb.mxu0 %v9338_v44  ;;  %v10412_v13 = vld [vmem:[#allocation13 + $0x280] sm:$0xf0] }
 0x443   :  { %v9302_v20 = vor.u32 %v10412_v13, %v9301_v29 }
 0x445   :  { %v6360_v38 = vpop.f32.mrf.mxu2 }
 0x446   :  { %6534 = vmatpush.bf16.msrb.mxu0 %v9326_v50 }
 0x44a   :  { %6535 = vmatpush.bf16.msrb.mxu0 %v9314_v17 }
 0x44e   :  { %6536 = vmatpush.bf16.msrb.mxu0 %v9302_v20 }
 0x452   :  { %6537 = vmatpush.bf16.msrb.mxu0 %v9290_v15 }
 0x455   :  { %v6397_v23 = vpop.f32.mrf.mxu1 }
 0x456   :  { %6538 = vmatpush.bf16.msrb.mxu0 %v9278_v10  ;;  %v6398_v26 = vadd.f32 %v6397_v23, %v5255_v47  ;;  %v6599_v10 = vld [vmem:[#allocation16] sm:$0x7] }
 0x457   :  { %v6601_v3 = vperm.slane %v6599_v10, 0 }
 0x459   :  { %6539 = vmatmul.bf16.vlgmr.msrb.gmra.mxu0 %v11169_v52  ;;  %v9686_v52 = vor.u32 %v10508_v36, %v9685_v51  ;;  %v6603_v51 = vperm.slane %v6599_v10, 2 }
 0x45a   :  { %6583 = vmatpush.bf16.msra.mxu0 %v9746_v58 }
 0x45d   :  { %v6410_v31 = vpop.f32.mrf.mxu2  ;;  %v6399_v55 = vpop.f32.mrf.mxu1 }
 0x45e   :  { %6584 = vmatpush.bf16.msra.mxu0 %v9734_v60  ;;  %v6411_v46 = vadd.f32 %v6410_v31, %v6398_v26  ;;  %v6602_v60 = vperm.slane %v6599_v10, 1 }
 0x45f   :  { %v6371_v18 = vpop.f32.mrf.mxu3 }
 0x460   :  { %v6372_v24 = vadd.f32 %v6371_v18, %v6359_v11 }
 0x462   :  { %6585 = vmatpush.bf16.msra.mxu0 %v9722_v61 }
 0x465   :  { %v6412_v57 = vpop.f32.mrf.mxu2 }
 0x466   :  { %6586 = vmatpush.bf16.msra.mxu0 %v9710_v45 }
 0x467   :  { %v6373_v59 = vpop.f32.mrf.mxu3 }
 0x46a   :  { %6587 = vmatpush.bf16.msra.mxu0 %v9698_v30 }
 0x46e   :  { %6588 = vmatpush.bf16.msra.mxu0 %v9686_v52 }
 0x46f   :  { %v6423_v62 = vpop.f32.mrf.mxu3 }
 0x470   :  { %v6424_v34 = vadd.f32 %v6423_v62, %v6411_v46 }
 0x472   :  { %6589 = vmatpush.bf16.msra.mxu0 %v9674_v6 }
 0x475   :  { %v6449_v16 = vpop.f32.mrf.mxu1 }
 0x476   :  { %6590 = vmatpush.bf16.msra.mxu0 %v9662_v53 }
 0x477   :  { %v6425_v41 = vpop.f32.mrf.mxu3 }
 0x479   :  { %6591 = vmatmul.bf16.vlgmr.msra.gmra.mxu0 %v11252_v35 }
 0x47d   :  { %v6462_v5 = vpop.f32.mrf.mxu2  ;;  %v6451_v25 = vpop.f32.mrf.mxu1 }
 0x485   :  { %v6464_v9 = vpop.f32.mrf.mxu2  ;;  %v6475_v33 = vpop.f32.mrf.mxu3 }
 0x48d   :  { %v6477_v44 = vpop.f32.mrf.mxu3 }
 0x495   :  { %v6501_v56 = vpop.f32.mrf.mxu1 }
 0x496   :  { %v6502_v2 = vadd.f32 %v6501_v56, %v5256_v8  ;;  %v6384_v19 = vpop.f32.mrf.mxu0 }
 0x497   :  { %v6385_v22 = vadd.f32 %v6384_v19, %v6372_v24 }
 0x499   :  { %v6596_v32 = vmax.f32 %v6385_v22, 0.0 }
 0x49b   :  { %v6607_v61 = vmul.f32 %v6601_v3, %v6596_v32 }
 0x49d   :  { %v6514_v11 = vpop.f32.mrf.mxu2  ;;  %v6503_v50 = vpop.f32.mrf.mxu1 }
 0x49e   :  { %v6515_v27 = vadd.f32 %v6514_v11, %v6502_v2  ;;  %v6386_v38 = vpop.f32.mrf.mxu0 }
 0x4a5   :  { %v6516_v17 = vpop.f32.mrf.mxu2  ;;  %v6527_v29 = vpop.f32.mrf.mxu3 }
 0x4a6   :  { %v6528_v13 = vadd.f32 %v6527_v29, %v6515_v27  ;;  %v6436_v20 = vpop.f32.mrf.mxu0 }
 0x4a7   :  { %v6437_v54 = vadd.f32 %v6436_v20, %v6424_v34 }
 0x4a9   :  { %v6450_v42 = vadd.f32 %v6449_v16, %v6437_v54 }
 0x4ab   :  { %v6463_v14 = vadd.f32 %v6462_v5, %v6450_v42 }
 0x4ad   :  { %v6529_v35 = vpop.f32.mrf.mxu3  ;;  %v6476_v21 = vadd.f32 %v6475_v33, %v6463_v14 }
 0x4ae   :  { %v6438_v49 = vpop.f32.mrf.mxu0 }
 0x4b5   :  { %v6553_v15 = vpop.f32.mrf.mxu1 }
 0x4b6   :  { %v6488_v58 = vpop.f32.mrf.mxu0 }
 0x4b7   :  { %v6489_v23 = vadd.f32 %v6488_v58, %v6476_v21 }
 0x4b9   :  { %v6597_v47 = vmax.f32 %v6489_v23, 0.0 }
 0x4bb   :  { %v6608_v26 = vmul.f32 %v6602_v60, %v6597_v47 }
 0x4bd   :  { %v6566_v7 = vpop.f32.mrf.mxu2  ;;  %v6555_v37 = vpop.f32.mrf.mxu1  ;;  %v6610_v0 = vadd.f32 %v6608_v26, %v6607_v61 }
 0x4be   :  { %v6490_v1 = vpop.f32.mrf.mxu0 }
 0x4c5   :  { %v6568_v28 = vpop.f32.mrf.mxu2  ;;  %v6579_v39 = vpop.f32.mrf.mxu3 }
 0x4cd   :  { %v6581_v31 = vpop.f32.mrf.mxu3 }
 0x4d6   :  { %v6540_v46 = vpop.f32.mrf.mxu0 }
 0x4d7   :  { %v6541_v45 = vadd.f32 %v6540_v46, %v6528_v13 }
 0x4d9   :  { %v6554_v12 = vadd.f32 %v6553_v15, %v6541_v45 }
 0x4db   :  { %v6567_v40 = vadd.f32 %v6566_v7, %v6554_v12 }
 0x4dd   :  { %v6580_v18 = vadd.f32 %v6579_v39, %v6567_v40 }
 0x4de   :  { %v6542_v55 = vpop.f32.mrf.mxu0 }
 0x4f6   :  { %v6592_v30 = vpop.f32.mrf.mxu0 }
 0x4f7   :  { %v6593_v24 = vadd.f32 %v6592_v30, %v6580_v18 }
 0x4f9   :  { %v6598_v36 = vmax.f32 %v6593_v24, 0.0 }
 0x4fb   :  { %v6609_v57 = vmul.f32 %v6603_v51, %v6598_v36 }
 0x4fd   :  { %v6611_v52 = vadd.f32 %v6610_v0, %v6609_v57 }
 0x4fe   :  { %v6594_v4 = vpop.f32.mrf.mxu0 }
 0x4ff   :  { %6612 = vadd.xlane.f32.xlu2 %v6611_v52 }
 0x572   :  { %v6613_v59 = vpop.xlane.xlu2 %6612 }
 0x573   :  { %v6618_v6 = vadd.f32 %v10549_v43, %v6613_v59 }
 0x575   :  { %6620 = vst.msk [vmem:[%s11279_s10] sm:$0xff] %vm6619_vm1, %v6618_v6 }
 0x576   :  { %6625 = vsyncpa [#allocation4], 1 }
 0x577   :  { %6626 = vsyncpa [#allocation6], 1 }
 0x578   :  { %6627 = vsyncpa [#allocation9], 1 }
 0x579   :  { %6628 = vsyncpa [#allocation12], 1 }
 0x57a   :  { %6629 = vsyncpa [#allocation15], 1 }

</bundles_post_ra>
